<compile_context>
chip_gen: v7x
topology: tpu7x:2x2x1
jax: 0.10.0
libtpu: 0.0.40
codegen_flags: <defaults>
</compile_context>

<pallas_src>
import math
import functools

import numpy as np
import jax
import jax.numpy as jnp
from jax import lax
from jax.experimental import pallas as pl
from jax.experimental.pallas import tpu as pltpu


def _prob_attention_kernel(q_ref, k_ref, v_ref, cnt_ref, out_ref, *,
                           H, D, n_top, n_top_pad, scale, mask_flag):
    """One batch element of ProbAttention over all H heads.

    q_ref:   (1, L_Q, H*D) f32 queries   (native [B, L, H, D] layout, merged)
    k_ref:   (1, L_K, H*D) f32 keys
    v_ref:   (1, L_V, H*D) f32 values
    cnt_ref: (L_K, L_Q)    bf16 multiplicity of each sampled key per query
    out_ref: (1, L_Q, H*D) context output (lane-dense)
    """
    L_Q = q_ref.shape[1]
    L_K = k_ref.shape[1]
    L_V = v_ref.shape[1]
    neg = jnp.float32(-1e30)

    # grid-invariant sampled-key multiplicities (fetched once by the pipeline)
    cnt = cnt_ref[...].astype(jnp.float32)                       # (L_K, L_Q)
    present = cnt > 0.0

    # small iotas only (no (L, L) int32 temporaries); hoisted out of all loops
    lane_iota = lax.broadcasted_iota(jnp.int32, (1, L_Q), 1)
    lane_iota_f = lane_iota.astype(jnp.float32)
    key_iota_f = lax.broadcasted_iota(jnp.int32, (1, L_K), 1).astype(jnp.float32)
    q_iota_col = lax.broadcasted_iota(jnp.int32, (L_Q, 1), 0)
    slot_iota = lax.broadcasted_iota(jnp.int32, (1, n_top_pad), 1)
    slot_col = lax.broadcasted_iota(jnp.int32, (n_top_pad, 1), 0)
    head_iota = lax.broadcasted_iota(jnp.int32, (H, 1), 0)

    if mask_flag:
        # lower-triangular (incl. diagonal) matrix for the causal V cumsum,
        # built from two small iotas, shared by all heads (hoisted).
        row_v = lax.broadcasted_iota(jnp.int32, (L_V, 1), 0)
        col_v = lax.broadcasted_iota(jnp.int32, (1, L_V), 1)
        tri = (col_v <= row_v).astype(jnp.bfloat16)              # (L_V, L_V)

    # ---- phase 1: sparsity measure M for every (head, query) -----------------
    M_all = jnp.zeros((H, L_Q), jnp.float32)
    for h in range(H):
        sl = slice(h * D, (h + 1) * D)
        Qh = q_ref[0, :, sl].astype(jnp.bfloat16)                # (L_Q, D)
        Kh = k_ref[0, :, sl].astype(jnp.bfloat16)                # (L_K, D)
        S_T = jnp.einsum('kd,qd->kq', Kh, Qh,
                         preferred_element_type=jnp.float32)     # (L_K, L_Q)
        samp_max = jnp.max(jnp.where(present, S_T, neg), axis=0, keepdims=True)
        samp_sum = jnp.sum(S_T * cnt, axis=0, keepdims=True)
        m_h = samp_max - samp_sum * jnp.float32(1.0 / L_K)       # (1, L_Q)
        M_all = jnp.where(head_iota == h, m_h, M_all)

    # ---- phase 2: top-n_top query selection, all heads at once ---------------
    # A single serial argmax chain of length n_top over (H, L_Q): the serial
    # XLU-latency section is paid once instead of H times.  Padded slots keep
    # the sentinel L_Q, so their one-hot rows/columns below are all-zero.
    idx_all = jnp.full((H, n_top_pad), L_Q, jnp.int32)
    Mw = M_all
    for i in range(n_top):
        mmax = jnp.max(Mw, axis=-1, keepdims=True)                         # (H, 1)
        sel = jnp.min(jnp.where(Mw == mmax, lane_iota, L_Q),
                      axis=-1, keepdims=True)                              # (H, 1)
        idx_all = jnp.where(slot_iota == i, sel, idx_all)
        Mw = jnp.where(lane_iota == sel, neg, Mw)

    # ---- phase 3: re-score selected queries, softmax, combine with ctx0 ------
    for h in range(H):
        sl = slice(h * D, (h + 1) * D)
        Qh = q_ref[0, :, sl].astype(jnp.bfloat16)
        Kh = k_ref[0, :, sl].astype(jnp.bfloat16)
        Vh_f = v_ref[0, :, sl]                                   # (L_V, D) f32
        Vh_b = Vh_f.astype(jnp.bfloat16)

        idx_row = idx_all[h:h + 1, :]                            # (1, n_top_pad)
        idx_row_f = idx_row.astype(jnp.float32)
        # column-oriented copy of this head's indices via broadcast-compare +
        # lane reduction (avoids an in-kernel transpose).
        idx_col = jnp.sum(jnp.where(slot_iota == slot_col, idx_row_f, 0.0),
                          axis=-1, keepdims=True)                # (n_top_pad, 1)

        Sel = (lane_iota_f == idx_col).astype(jnp.bfloat16)      # (n_top_pad, L_Q)
        SelT_f = (q_iota_col == idx_row).astype(jnp.float32)     # (L_Q, n_top_pad)

        # exact row gather of the selected queries, then scores vs. all keys
        Qr = jnp.dot(Sel, Qh, preferred_element_type=jnp.float32)
        scores = jnp.einsum('ud,kd->uk', Qr.astype(jnp.bfloat16), Kh,
                            preferred_element_type=jnp.float32)  # (n_top_pad, L_K)
        scores = scores * jnp.float32(scale)

        if mask_flag:
            # ProbMask: key k masked iff k > selected query position
            scores = jnp.where(key_iota_f <= idx_col, scores, neg)
            # initial context = V.cumsum(dim=-2) as a bf16 MXU matmul
            ctx0 = jnp.dot(tri, Vh_b, preferred_element_type=jnp.float32)
        else:
            # initial context = mean(V) broadcast over L_Q
            ctx0 = jnp.broadcast_to(jnp.mean(Vh_f, axis=0, keepdims=True),
                                    (L_Q, D))

        smax = jnp.max(scores, axis=-1, keepdims=True)
        p = jnp.exp(scores - smax)
        attn = p * pl.reciprocal(jnp.sum(p, axis=-1, keepdims=True), approx=True)
        upd = jnp.dot(attn.astype(jnp.bfloat16), Vh_b,
                      preferred_element_type=jnp.float32)        # (n_top_pad, D)

        # scatter the updated rows back into the initial context
        upd_full = jnp.dot(SelT_f, upd, preferred_element_type=jnp.float32)
        selected = jnp.sum(SelT_f, axis=-1, keepdims=True)       # (L_Q, 1)
        ctx_h = jnp.where(selected > 0.0, upd_full, ctx0)
        out_ref[0, :, sl] = ctx_h.astype(out_ref.dtype)


def _vmem_limit_bytes(L_Q, L_K, L_V, H, D, n_top_pad, mask_flag,
                      in_bytes, out_bytes):
    f32, bf16 = 4, 2
    HD = H * D
    need = 0
    # double-buffered pipeline blocks
    need += 2 * (L_Q + L_K + L_V) * HD * in_bytes     # q, k, v blocks
    need += 2 * L_K * L_Q * bf16                      # cnt (grid-invariant)
    need += 2 * L_Q * HD * out_bytes                  # output block
    # dominant in-kernel temporaries
    need += 3 * L_K * L_Q * f32                       # S_T + masked/weighted copies
    need += 2 * L_K * L_Q * f32                       # cnt f32 + present
    if mask_flag:
        need += L_V * L_V * bf16                      # causal tri
    need += 6 * max(L_Q, L_K) * D * f32               # per-head panels / ctx temps
    need += 6 * max(L_Q, L_K) * max(n_top_pad, 8) * f32   # Sel/SelT/scores/attn
    need += 4 * H * max(L_Q, 128) * f32               # M_all / Mw / idx
    need = int(need * 1.25) + (2 << 20)               # scheduling slack, no 2x fudge
    try:
        cap = int(pltpu.get_tpu_info().vmem_capacity_bytes)
    except Exception:
        cap = 64 * 1024 * 1024                        # v7x per-core (most restrictive)
    cap = (cap * 7) // 8                              # headroom for compiler scratch
    return int(min(max(need, 8 << 20), cap))


def prob_attention_pallas(queries, keys, values, index_sample, *,
                          factor=5, scale=None, mask_flag=True,
                          out_dtype=jnp.float32):
    """ProbAttention.forward.

    Returns (context, None) with context in [B, L_Q, H, D] layout (lane-dense
    kernel output); the PyTorch module's [B, H, L_Q, D] is
    jnp.transpose(context, (0, 2, 1, 3)).  Set out_dtype=jnp.bfloat16 to halve
    the output writeback (useful on v5e) if downstream accepts it.
    """
    B, L_Q, H, D = queries.shape
    _, L_K, _, _ = keys.shape
    L_V = values.shape[1]
    HD = H * D

    n_top = factor * int(np.ceil(np.log(L_Q)))
    n_top = n_top if n_top < L_Q else L_Q
    n_top_pad = ((n_top + 7) // 8) * 8                # sublane-aligned selected tiles
    scl = float(scale) if scale is not None else 1.0 / math.sqrt(D)
    if mask_flag:
        assert L_Q == L_V, "causal ProbAttention requires L_Q == L_V"
    assert index_sample.shape[0] == L_Q
    # counts are stored in bf16; integers <= 256 are exact
    assert index_sample.shape[1] <= 256, "too many samples/query for bf16 counts"

    # Sampled-key multiplicities via scatter-add (no L_Q x U x L_K one-hot
    # blow-up), stored transposed (L_K, L_Q) so the measure M is lane-major.
    cols = jnp.arange(L_Q, dtype=index_sample.dtype)[:, None]
    cnt_t = jnp.zeros((L_K, L_Q), jnp.float32).at[index_sample, cols].add(1.0)
    cnt_t = cnt_t.astype(jnp.bfloat16)

    # Free reshape [B, L, H, D] -> [B, L, H*D]: no wrapper-side HBM transpose /
    # cast pass; per-head panels are sliced and downcast to bf16 inside VMEM.
    q3 = queries.reshape(B, L_Q, HD)
    k3 = keys.reshape(B, L_K, HD)
    v3 = values.reshape(B, L_V, HD)

    kernel = functools.partial(_prob_attention_kernel, H=H, D=D,
                               n_top=n_top, n_top_pad=n_top_pad,
                               scale=scl, mask_flag=mask_flag)

    in_bytes = jnp.dtype(queries.dtype).itemsize
    out_bytes = jnp.dtype(out_dtype).itemsize

    context = pl.pallas_call(
        kernel,
        out_shape=jax.ShapeDtypeStruct((B, L_Q, HD), out_dtype),
        grid=(B,),
        in_specs=[
            pl.BlockSpec((1, L_Q, HD), lambda b: (b, 0, 0)),
            pl.BlockSpec((1, L_K, HD), lambda b: (b, 0, 0)),
            pl.BlockSpec((1, L_V, HD), lambda b: (b, 0, 0)),
            pl.BlockSpec((L_K, L_Q), lambda b: (0, 0)),      # grid-invariant
        ],
        out_specs=pl.BlockSpec((1, L_Q, HD), lambda b: (b, 0, 0)),
        compiler_params=pltpu.CompilerParams(
            dimension_semantics=("parallel",),
            vmem_limit_bytes=_vmem_limit_bytes(L_Q, L_K, L_V, H, D, n_top_pad,
                                               mask_flag, in_bytes, out_bytes)),
    )(q3, k3, v3, cnt_t)

    return context.reshape(B, L_Q, H, D), None


def prob_attention_ref(queries, keys, values, index_sample, *,
                       factor=5, scale=None, mask_flag=True):
    """Pure-JAX reference of the PyTorch forward (returns [B, H, L_Q, D])."""
    B, L_Q, H, D = queries.shape
    L_K = keys.shape[1]
    Q = jnp.transpose(queries, (0, 2, 1, 3))
    K = jnp.transpose(keys, (0, 2, 1, 3))
    V = jnp.transpose(values, (0, 2, 1, 3))

    n_top = min(factor * int(np.ceil(np.log(L_Q))), L_Q)
    K_sample = K[:, :, index_sample, :]                              # (B,H,L_Q,U,D)
    QK_sample = jnp.einsum('bhqd,bhqsd->bhqs', Q, K_sample)
    M = QK_sample.max(-1) - QK_sample.sum(-1) / L_K
    _, M_top = lax.top_k(M, n_top)                                   # (B,H,u)

    Q_reduce = jnp.take_along_axis(Q, M_top[..., None], axis=2)
    scores = jnp.einsum('bhud,bhkd->bhuk', Q_reduce, K)
    scl = scale if scale is not None else 1.0 / math.sqrt(D)
    scores = scores * scl
    if mask_flag:
        mask = jnp.arange(L_K)[None, None, None, :] > M_top[..., None]
        scores = jnp.where(mask, -jnp.inf, scores)
    attn = jax.nn.softmax(scores, axis=-1)

    if mask_flag:
        ctx = jnp.cumsum(V, axis=2)
    else:
        ctx = jnp.broadcast_to(V.mean(axis=2, keepdims=True), (B, H, L_Q, D))
    upd = jnp.einsum('bhuk,bhkd->bhud', attn, V)
    b_idx = jnp.arange(B)[:, None, None]
    h_idx = jnp.arange(H)[None, :, None]
    ctx = ctx.at[b_idx, h_idx, M_top].set(upd)
    return ctx


if __name__ == "__main__":
    B, L, H, D = 2, 32, 4, 32
    factor = 5

    key = jax.random.PRNGKey(0)
    kq, kk, kv, ks = jax.random.split(key, 4)
    queries = jax.random.normal(kq, (B, L, H, D), jnp.float32)
    keys_ = jax.random.normal(kk, (B, L, H, D), jnp.float32)
    values = jax.random.normal(kv, (B, L, H, D), jnp.float32)

    # torch.randint(L_K, (L_Q, sample_k)) equivalent (jax RNG, same distribution)
    U_part = min(factor * int(np.ceil(np.log(L))), L)
    index_sample = jax.random.randint(ks, (L, U_part), 0, L)

    # The kernel runs its matmuls in bf16 (f32 accumulation).  Feed the f32
    # reference the identically rounded inputs so the comparison isolates the
    # algorithm rather than the declared bf16 precision choice.
    q_in = queries.astype(jnp.bfloat16).astype(jnp.float32)
    k_in = keys_.astype(jnp.bfloat16).astype(jnp.float32)
    v_in = values.astype(jnp.bfloat16).astype(jnp.float32)

    for mask_flag in (True, False):
        context, attn = prob_attention_pallas(q_in, k_in, v_in, index_sample,
                                              factor=factor, mask_flag=mask_flag)
        context = jax.block_until_ready(context)
        ref = prob_attention_ref(q_in, k_in, v_in, index_sample,
                                 factor=factor, mask_flag=mask_flag)
        ref_blhd = jnp.transpose(ref, (0, 2, 1, 3))      # [B,H,L,D] -> [B,L,H,D]
        if not np.allclose(np.asarray(context), np.asarray(ref_blhd),
                           rtol=2e-2, atol=2e-2):
            err = float(np.max(np.abs(np.asarray(context) - np.asarray(ref_blhd))))
            raise AssertionError(
                f"Pallas ProbAttention mismatch (mask_flag={mask_flag}), "
                f"max abs err {err}")

    print("KERNEL_OK")
</pallas_src>

<mosaic_0001>
module attributes {stable_mosaic.version = 11 : i64} {
  func.func @_prob_attention_kernel(%arg0: i32, %arg1: memref<1x32x128xf32, #tpu.memory_space<vmem>>, %arg2: memref<1x32x128xf32, #tpu.memory_space<vmem>>, %arg3: memref<1x32x128xf32, #tpu.memory_space<vmem>>, %arg4: memref<32x32xbf16, #tpu.memory_space<vmem>>, %arg5: memref<1x32x128xf32, #tpu.memory_space<vmem>>) attributes {dimension_semantics = [#tpu.dimension_semantics<parallel>], iteration_bounds = array<i64: 2>, scalar_prefetch = 0 : i64, scratch_operands = 0 : i64, tpu.core_type = #tpu.core_type<tc>, window_params = [{transform_indices = @transform_0, window_bounds = array<i64: 1, 32, 128>}, {transform_indices = @transform_1, window_bounds = array<i64: 1, 32, 128>}, {transform_indices = @transform_2, window_bounds = array<i64: 1, 32, 128>}, {pipeline_mode = #tpu.pipeline_mode<synchronous>, transform_indices = @transform_3, window_bounds = array<i64: 32, 32>}, {transform_indices = @transform_4, window_bounds = array<i64: 1, 32, 128>}]} {
    %c0 = arith.constant 0 : index
    %c0_0 = arith.constant 0 : index
    %0 = vector.load %arg4[%c0, %c0_0] : memref<32x32xbf16, #tpu.memory_space<vmem>>, vector<32x32xbf16>
    %1 = arith.extf %0 : vector<32x32xbf16> to vector<32x32xf32>
    %cst = arith.constant 0.000000e+00 : f32
    %2 = vector.broadcast %cst : f32 to vector<32x32xf32>
    %3 = arith.cmpf ogt, %1, %2 : vector<32x32xf32>
    %4 = tpu.iota {dimensions = array<i32: 1>} : vector<1x32xi32>
    %5 = arith.sitofp %4 : vector<1x32xi32> to vector<1x32xf32>
    %6 = tpu.iota {dimensions = array<i32: 1>} : vector<1x32xi32>
    %7 = arith.sitofp %6 : vector<1x32xi32> to vector<1x32xf32>
    %8 = tpu.iota {dimensions = array<i32: 0>} : vector<32x1xi32>
    %9 = tpu.iota {dimensions = array<i32: 1>} : vector<1x24xi32>
    %10 = tpu.iota {dimensions = array<i32: 0>} : vector<24x1xi32>
    %11 = tpu.iota {dimensions = array<i32: 0>} : vector<4x1xi32>
    %12 = tpu.iota {dimensions = array<i32: 0>} : vector<32x1xi32>
    %13 = tpu.iota {dimensions = array<i32: 1>} : vector<1x32xi32>
    %14 = vector.broadcast %13 : vector<1x32xi32> to vector<32x32xi32>
    %15 = vector.broadcast %12 : vector<32x1xi32> to vector<32x32xi32>
    %16 = arith.cmpi sle, %14, %15 : vector<32x32xi32>
    %17 = arith.extui %16 : vector<32x32xi1> to vector<32x32xi32>
    %18 = arith.sitofp %17 : vector<32x32xi32> to vector<32x32xf32>
    %19 = arith.truncf %18 : vector<32x32xf32> to vector<32x32xbf16>
    %cst_1 = arith.constant 0.000000e+00 : f32
    %20 = vector.broadcast %cst_1 : f32 to vector<4x32xf32>
    %c0_2 = arith.constant 0 : index
    %c0_3 = arith.constant 0 : index
    %c0_4 = arith.constant 0 : index
    %21 = vector.load %arg1[%c0_2, %c0_3, %c0_4] : memref<1x32x128xf32, #tpu.memory_space<vmem>>, vector<1x32x32xf32>
    %22 = vector.shape_cast %21 : vector<1x32x32xf32> to vector<32x32xf32>
    %23 = arith.truncf %22 : vector<32x32xf32> to vector<32x32xbf16>
    %c0_5 = arith.constant 0 : index
    %c0_6 = arith.constant 0 : index
    %c0_7 = arith.constant 0 : index
    %24 = vector.load %arg2[%c0_5, %c0_6, %c0_7] : memref<1x32x128xf32, #tpu.memory_space<vmem>>, vector<1x32x32xf32>
    %25 = vector.shape_cast %24 : vector<1x32x32xf32> to vector<32x32xf32>
    %26 = arith.truncf %25 : vector<32x32xf32> to vector<32x32xbf16>
    "tpu.trace_start"() <{level = 10 : i32, message = "kd,qd->kq"}> : () -> ()
    %cst_8 = arith.constant dense<0.000000e+00> : vector<32x32xf32>
    %27 = tpu.matmul %26, %23, %cst_8 {dimension_numbers = #tpu.dot_dimension_numbers<[1], [1], [0], [0], [0, 0, 1, 0], [], []>} : vector<32x32xbf16>, vector<32x32xbf16>, vector<32x32xf32> -> vector<32x32xf32>
    %cst_9 = arith.constant -1.000000e+30 : f32
    "tpu.trace_stop"() : () -> ()
    %28 = vector.broadcast %cst_9 : f32 to vector<32x32xf32>
    %29 = arith.select %3, %27, %28 : vector<32x32xi1>, vector<32x32xf32>
    %cst_10 = arith.constant dense<0xFF800000> : vector<32xf32>
    %30 = vector.multi_reduction <maximumf>, %29, %cst_10 [0] : vector<32x32xf32> to vector<32xf32>
    %31 = vector.shape_cast %30 : vector<32xf32> to vector<1x32xf32>
    %32 = arith.mulf %27, %1 : vector<32x32xf32>
    %cst_11 = arith.constant dense<0.000000e+00> : vector<32xf32>
    %33 = vector.multi_reduction <add>, %32, %cst_11 [0] : vector<32x32xf32> to vector<32xf32>
    %34 = vector.shape_cast %33 : vector<32xf32> to vector<1x32xf32>
    %cst_12 = arith.constant 3.125000e-02 : f32
    %35 = vector.broadcast %cst_12 : f32 to vector<1x32xf32>
    %36 = arith.mulf %34, %35 : vector<1x32xf32>
    %37 = arith.subf %31, %36 : vector<1x32xf32>
    %c0_i32 = arith.constant 0 : i32
    %38 = vector.broadcast %c0_i32 : i32 to vector<4x1xi32>
    %39 = arith.cmpi eq, %11, %38 : vector<4x1xi32>
    %40 = vector.shape_cast %39 : vector<4x1xi1> to vector<4x1xi1>
    %41 = vector.broadcast %40 : vector<4x1xi1> to vector<4x32xi1>
    %42 = vector.shape_cast %37 : vector<1x32xf32> to vector<1x32xf32>
    %43 = vector.broadcast %42 : vector<1x32xf32> to vector<4x32xf32>
    %44 = arith.select %41, %43, %20 : vector<4x32xi1>, vector<4x32xf32>
    %c0_13 = arith.constant 0 : index
    %c0_14 = arith.constant 0 : index
    %c32 = arith.constant 32 : index
    %45 = vector.load %arg1[%c0_13, %c0_14, %c32] : memref<1x32x128xf32, #tpu.memory_space<vmem>>, vector<1x32x32xf32>
    %46 = vector.shape_cast %45 : vector<1x32x32xf32> to vector<32x32xf32>
    %47 = arith.truncf %46 : vector<32x32xf32> to vector<32x32xbf16>
    %c0_15 = arith.constant 0 : index
    %c0_16 = arith.constant 0 : index
    %c32_17 = arith.constant 32 : index
    %48 = vector.load %arg2[%c0_15, %c0_16, %c32_17] : memref<1x32x128xf32, #tpu.memory_space<vmem>>, vector<1x32x32xf32>
    %49 = vector.shape_cast %48 : vector<1x32x32xf32> to vector<32x32xf32>
    %50 = arith.truncf %49 : vector<32x32xf32> to vector<32x32xbf16>
    "tpu.trace_start"() <{level = 10 : i32, message = "kd,qd->kq"}> : () -> ()
    %cst_18 = arith.constant dense<0.000000e+00> : vector<32x32xf32>
    %51 = tpu.matmul %50, %47, %cst_18 {dimension_numbers = #tpu.dot_dimension_numbers<[1], [1], [0], [0], [0, 0, 1, 0], [], []>} : vector<32x32xbf16>, vector<32x32xbf16>, vector<32x32xf32> -> vector<32x32xf32>
    %cst_19 = arith.constant -1.000000e+30 : f32
    "tpu.trace_stop"() : () -> ()
    %52 = vector.broadcast %cst_19 : f32 to vector<32x32xf32>
    %53 = arith.select %3, %51, %52 : vector<32x32xi1>, vector<32x32xf32>
    %cst_20 = arith.constant dense<0xFF800000> : vector<32xf32>
    %54 = vector.multi_reduction <maximumf>, %53, %cst_20 [0] : vector<32x32xf32> to vector<32xf32>
    %55 = vector.shape_cast %54 : vector<32xf32> to vector<1x32xf32>
    %56 = arith.mulf %51, %1 : vector<32x32xf32>
    %cst_21 = arith.constant dense<0.000000e+00> : vector<32xf32>
    %57 = vector.multi_reduction <add>, %56, %cst_21 [0] : vector<32x32xf32> to vector<32xf32>
    %58 = vector.shape_cast %57 : vector<32xf32> to vector<1x32xf32>
    %cst_22 = arith.constant 3.125000e-02 : f32
    %59 = vector.broadcast %cst_22 : f32 to vector<1x32xf32>
    %60 = arith.mulf %58, %59 : vector<1x32xf32>
    %61 = arith.subf %55, %60 : vector<1x32xf32>
    %c1_i32 = arith.constant 1 : i32
    %62 = vector.broadcast %c1_i32 : i32 to vector<4x1xi32>
    %63 = arith.cmpi eq, %11, %62 : vector<4x1xi32>
    %64 = vector.shape_cast %63 : vector<4x1xi1> to vector<4x1xi1>
    %65 = vector.broadcast %64 : vector<4x1xi1> to vector<4x32xi1>
    %66 = vector.shape_cast %61 : vector<1x32xf32> to vector<1x32xf32>
    %67 = vector.broadcast %66 : vector<1x32xf32> to vector<4x32xf32>
    %68 = arith.select %65, %67, %44 : vector<4x32xi1>, vector<4x32xf32>
    %c0_23 = arith.constant 0 : index
    %c0_24 = arith.constant 0 : index
    %c64 = arith.constant 64 : index
    %69 = vector.load %arg1[%c0_23, %c0_24, %c64] : memref<1x32x128xf32, #tpu.memory_space<vmem>>, vector<1x32x32xf32>
    %70 = vector.shape_cast %69 : vector<1x32x32xf32> to vector<32x32xf32>
    %71 = arith.truncf %70 : vector<32x32xf32> to vector<32x32xbf16>
    %c0_25 = arith.constant 0 : index
    %c0_26 = arith.constant 0 : index
    %c64_27 = arith.constant 64 : index
    %72 = vector.load %arg2[%c0_25, %c0_26, %c64_27] : memref<1x32x128xf32, #tpu.memory_space<vmem>>, vector<1x32x32xf32>
    %73 = vector.shape_cast %72 : vector<1x32x32xf32> to vector<32x32xf32>
    %74 = arith.truncf %73 : vector<32x32xf32> to vector<32x32xbf16>
    "tpu.trace_start"() <{level = 10 : i32, message = "kd,qd->kq"}> : () -> ()
    %cst_28 = arith.constant dense<0.000000e+00> : vector<32x32xf32>
    %75 = tpu.matmul %74, %71, %cst_28 {dimension_numbers = #tpu.dot_dimension_numbers<[1], [1], [0], [0], [0, 0, 1, 0], [], []>} : vector<32x32xbf16>, vector<32x32xbf16>, vector<32x32xf32> -> vector<32x32xf32>
    %cst_29 = arith.constant -1.000000e+30 : f32
    "tpu.trace_stop"() : () -> ()
    %76 = vector.broadcast %cst_29 : f32 to vector<32x32xf32>
    %77 = arith.select %3, %75, %76 : vector<32x32xi1>, vector<32x32xf32>
    %cst_30 = arith.constant dense<0xFF800000> : vector<32xf32>
    %78 = vector.multi_reduction <maximumf>, %77, %cst_30 [0] : vector<32x32xf32> to vector<32xf32>
    %79 = vector.shape_cast %78 : vector<32xf32> to vector<1x32xf32>
    %80 = arith.mulf %75, %1 : vector<32x32xf32>
    %cst_31 = arith.constant dense<0.000000e+00> : vector<32xf32>
    %81 = vector.multi_reduction <add>, %80, %cst_31 [0] : vector<32x32xf32> to vector<32xf32>
    %82 = vector.shape_cast %81 : vector<32xf32> to vector<1x32xf32>
    %cst_32 = arith.constant 3.125000e-02 : f32
    %83 = vector.broadcast %cst_32 : f32 to vector<1x32xf32>
    %84 = arith.mulf %82, %83 : vector<1x32xf32>
    %85 = arith.subf %79, %84 : vector<1x32xf32>
    %c2_i32 = arith.constant 2 : i32
    %86 = vector.broadcast %c2_i32 : i32 to vector<4x1xi32>
    %87 = arith.cmpi eq, %11, %86 : vector<4x1xi32>
    %88 = vector.shape_cast %87 : vector<4x1xi1> to vector<4x1xi1>
    %89 = vector.broadcast %88 : vector<4x1xi1> to vector<4x32xi1>
    %90 = vector.shape_cast %85 : vector<1x32xf32> to vector<1x32xf32>
    %91 = vector.broadcast %90 : vector<1x32xf32> to vector<4x32xf32>
    %92 = arith.select %89, %91, %68 : vector<4x32xi1>, vector<4x32xf32>
    %c0_33 = arith.constant 0 : index
    %c0_34 = arith.constant 0 : index
    %c96 = arith.constant 96 : index
    %93 = vector.load %arg1[%c0_33, %c0_34, %c96] : memref<1x32x128xf32, #tpu.memory_space<vmem>>, vector<1x32x32xf32>
    %94 = vector.shape_cast %93 : vector<1x32x32xf32> to vector<32x32xf32>
    %95 = arith.truncf %94 : vector<32x32xf32> to vector<32x32xbf16>
    %c0_35 = arith.constant 0 : index
    %c0_36 = arith.constant 0 : index
    %c96_37 = arith.constant 96 : index
    %96 = vector.load %arg2[%c0_35, %c0_36, %c96_37] : memref<1x32x128xf32, #tpu.memory_space<vmem>>, vector<1x32x32xf32>
    %97 = vector.shape_cast %96 : vector<1x32x32xf32> to vector<32x32xf32>
    %98 = arith.truncf %97 : vector<32x32xf32> to vector<32x32xbf16>
    "tpu.trace_start"() <{level = 10 : i32, message = "kd,qd->kq"}> : () -> ()
    %cst_38 = arith.constant dense<0.000000e+00> : vector<32x32xf32>
    %99 = tpu.matmul %98, %95, %cst_38 {dimension_numbers = #tpu.dot_dimension_numbers<[1], [1], [0], [0], [0, 0, 1, 0], [], []>} : vector<32x32xbf16>, vector<32x32xbf16>, vector<32x32xf32> -> vector<32x32xf32>
    %cst_39 = arith.constant -1.000000e+30 : f32
    "tpu.trace_stop"() : () -> ()
    %100 = vector.broadcast %cst_39 : f32 to vector<32x32xf32>
    %101 = arith.select %3, %99, %100 : vector<32x32xi1>, vector<32x32xf32>
    %cst_40 = arith.constant dense<0xFF800000> : vector<32xf32>
    %102 = vector.multi_reduction <maximumf>, %101, %cst_40 [0] : vector<32x32xf32> to vector<32xf32>
    %103 = vector.shape_cast %102 : vector<32xf32> to vector<1x32xf32>
    %104 = arith.mulf %99, %1 : vector<32x32xf32>
    %cst_41 = arith.constant dense<0.000000e+00> : vector<32xf32>
    %105 = vector.multi_reduction <add>, %104, %cst_41 [0] : vector<32x32xf32> to vector<32xf32>
    %106 = vector.shape_cast %105 : vector<32xf32> to vector<1x32xf32>
    %cst_42 = arith.constant 3.125000e-02 : f32
    %107 = vector.broadcast %cst_42 : f32 to vector<1x32xf32>
    %108 = arith.mulf %106, %107 : vector<1x32xf32>
    %109 = arith.subf %103, %108 : vector<1x32xf32>
    %c3_i32 = arith.constant 3 : i32
    %110 = vector.broadcast %c3_i32 : i32 to vector<4x1xi32>
    %111 = arith.cmpi eq, %11, %110 : vector<4x1xi32>
    %112 = vector.shape_cast %111 : vector<4x1xi1> to vector<4x1xi1>
    %113 = vector.broadcast %112 : vector<4x1xi1> to vector<4x32xi1>
    %114 = vector.shape_cast %109 : vector<1x32xf32> to vector<1x32xf32>
    %115 = vector.broadcast %114 : vector<1x32xf32> to vector<4x32xf32>
    %116 = arith.select %113, %115, %92 : vector<4x32xi1>, vector<4x32xf32>
    %c32_i32 = arith.constant 32 : i32
    %117 = vector.broadcast %c32_i32 : i32 to vector<4x24xi32>
    %cst_43 = arith.constant dense<0xFF800000> : vector<4xf32>
    %118 = vector.multi_reduction <maximumf>, %116, %cst_43 [1] : vector<4x32xf32> to vector<4xf32>
    %119 = vector.shape_cast %118 : vector<4xf32> to vector<4x1xf32>
    %120 = vector.broadcast %119 : vector<4x1xf32> to vector<4x32xf32>
    %121 = arith.cmpf oeq, %116, %120 : vector<4x32xf32>
    %c32_i32_44 = arith.constant 32 : i32
    %122 = vector.shape_cast %4 : vector<1x32xi32> to vector<1x32xi32>
    %123 = vector.broadcast %122 : vector<1x32xi32> to vector<4x32xi32>
    %124 = vector.broadcast %c32_i32_44 : i32 to vector<4x32xi32>
    %125 = arith.select %121, %123, %124 : vector<4x32xi1>, vector<4x32xi32>
    %cst_45 = arith.constant dense<2147483647> : vector<4xi32>
    %126 = vector.multi_reduction <minsi>, %125, %cst_45 [1] : vector<4x32xi32> to vector<4xi32>
    %127 = vector.shape_cast %126 : vector<4xi32> to vector<4x1xi32>
    %c0_i32_46 = arith.constant 0 : i32
    %128 = vector.broadcast %c0_i32_46 : i32 to vector<1x24xi32>
    %129 = arith.cmpi eq, %9, %128 : vector<1x24xi32>
    %130 = vector.shape_cast %129 : vector<1x24xi1> to vector<1x24xi1>
    %131 = vector.broadcast %130 : vector<1x24xi1> to vector<4x24xi1>
    %132 = vector.shape_cast %127 : vector<4x1xi32> to vector<4x1xi32>
    %133 = vector.broadcast %132 : vector<4x1xi32> to vector<4x24xi32>
    %134 = arith.select %131, %133, %117 : vector<4x24xi1>, vector<4x24xi32>
    %135 = vector.broadcast %4 : vector<1x32xi32> to vector<4x32xi32>
    %136 = vector.broadcast %127 : vector<4x1xi32> to vector<4x32xi32>
    %137 = arith.cmpi eq, %135, %136 : vector<4x32xi32>
    %cst_47 = arith.constant -1.000000e+30 : f32
    %138 = vector.broadcast %cst_47 : f32 to vector<4x32xf32>
    %139 = arith.select %137, %138, %116 : vector<4x32xi1>, vector<4x32xf32>
    %cst_48 = arith.constant dense<0xFF800000> : vector<4xf32>
    %140 = vector.multi_reduction <maximumf>, %139, %cst_48 [1] : vector<4x32xf32> to vector<4xf32>
    %141 = vector.shape_cast %140 : vector<4xf32> to vector<4x1xf32>
    %142 = vector.broadcast %141 : vector<4x1xf32> to vector<4x32xf32>
    %143 = arith.cmpf oeq, %139, %142 : vector<4x32xf32>
    %c32_i32_49 = arith.constant 32 : i32
    %144 = vector.shape_cast %4 : vector<1x32xi32> to vector<1x32xi32>
    %145 = vector.broadcast %144 : vector<1x32xi32> to vector<4x32xi32>
    %146 = vector.broadcast %c32_i32_49 : i32 to vector<4x32xi32>
    %147 = arith.select %143, %145, %146 : vector<4x32xi1>, vector<4x32xi32>
    %cst_50 = arith.constant dense<2147483647> : vector<4xi32>
    %148 = vector.multi_reduction <minsi>, %147, %cst_50 [1] : vector<4x32xi32> to vector<4xi32>
    %149 = vector.shape_cast %148 : vector<4xi32> to vector<4x1xi32>
    %c1_i32_51 = arith.constant 1 : i32
    %150 = vector.broadcast %c1_i32_51 : i32 to vector<1x24xi32>
    %151 = arith.cmpi eq, %9, %150 : vector<1x24xi32>
    %152 = vector.shape_cast %151 : vector<1x24xi1> to vector<1x24xi1>
    %153 = vector.broadcast %152 : vector<1x24xi1> to vector<4x24xi1>
    %154 = vector.shape_cast %149 : vector<4x1xi32> to vector<4x1xi32>
    %155 = vector.broadcast %154 : vector<4x1xi32> to vector<4x24xi32>
    %156 = arith.select %153, %155, %134 : vector<4x24xi1>, vector<4x24xi32>
    %157 = vector.broadcast %4 : vector<1x32xi32> to vector<4x32xi32>
    %158 = vector.broadcast %149 : vector<4x1xi32> to vector<4x32xi32>
    %159 = arith.cmpi eq, %157, %158 : vector<4x32xi32>
    %cst_52 = arith.constant -1.000000e+30 : f32
    %160 = vector.broadcast %cst_52 : f32 to vector<4x32xf32>
    %161 = arith.select %159, %160, %139 : vector<4x32xi1>, vector<4x32xf32>
    %cst_53 = arith.constant dense<0xFF800000> : vector<4xf32>
    %162 = vector.multi_reduction <maximumf>, %161, %cst_53 [1] : vector<4x32xf32> to vector<4xf32>
    %163 = vector.shape_cast %162 : vector<4xf32> to vector<4x1xf32>
    %164 = vector.broadcast %163 : vector<4x1xf32> to vector<4x32xf32>
    %165 = arith.cmpf oeq, %161, %164 : vector<4x32xf32>
    %c32_i32_54 = arith.constant 32 : i32
    %166 = vector.shape_cast %4 : vector<1x32xi32> to vector<1x32xi32>
    %167 = vector.broadcast %166 : vector<1x32xi32> to vector<4x32xi32>
    %168 = vector.broadcast %c32_i32_54 : i32 to vector<4x32xi32>
    %169 = arith.select %165, %167, %168 : vector<4x32xi1>, vector<4x32xi32>
    %cst_55 = arith.constant dense<2147483647> : vector<4xi32>
    %170 = vector.multi_reduction <minsi>, %169, %cst_55 [1] : vector<4x32xi32> to vector<4xi32>
    %171 = vector.shape_cast %170 : vector<4xi32> to vector<4x1xi32>
    %c2_i32_56 = arith.constant 2 : i32
    %172 = vector.broadcast %c2_i32_56 : i32 to vector<1x24xi32>
    %173 = arith.cmpi eq, %9, %172 : vector<1x24xi32>
    %174 = vector.shape_cast %173 : vector<1x24xi1> to vector<1x24xi1>
    %175 = vector.broadcast %174 : vector<1x24xi1> to vector<4x24xi1>
    %176 = vector.shape_cast %171 : vector<4x1xi32> to vector<4x1xi32>
    %177 = vector.broadcast %176 : vector<4x1xi32> to vector<4x24xi32>
    %178 = arith.select %175, %177, %156 : vector<4x24xi1>, vector<4x24xi32>
    %179 = vector.broadcast %4 : vector<1x32xi32> to vector<4x32xi32>
    %180 = vector.broadcast %171 : vector<4x1xi32> to vector<4x32xi32>
    %181 = arith.cmpi eq, %179, %180 : vector<4x32xi32>
    %cst_57 = arith.constant -1.000000e+30 : f32
    %182 = vector.broadcast %cst_57 : f32 to vector<4x32xf32>
    %183 = arith.select %181, %182, %161 : vector<4x32xi1>, vector<4x32xf32>
    %cst_58 = arith.constant dense<0xFF800000> : vector<4xf32>
    %184 = vector.multi_reduction <maximumf>, %183, %cst_58 [1] : vector<4x32xf32> to vector<4xf32>
    %185 = vector.shape_cast %184 : vector<4xf32> to vector<4x1xf32>
    %186 = vector.broadcast %185 : vector<4x1xf32> to vector<4x32xf32>
    %187 = arith.cmpf oeq, %183, %186 : vector<4x32xf32>
    %c32_i32_59 = arith.constant 32 : i32
    %188 = vector.shape_cast %4 : vector<1x32xi32> to vector<1x32xi32>
    %189 = vector.broadcast %188 : vector<1x32xi32> to vector<4x32xi32>
    %190 = vector.broadcast %c32_i32_59 : i32 to vector<4x32xi32>
    %191 = arith.select %187, %189, %190 : vector<4x32xi1>, vector<4x32xi32>
    %cst_60 = arith.constant dense<2147483647> : vector<4xi32>
    %192 = vector.multi_reduction <minsi>, %191, %cst_60 [1] : vector<4x32xi32> to vector<4xi32>
    %193 = vector.shape_cast %192 : vector<4xi32> to vector<4x1xi32>
    %c3_i32_61 = arith.constant 3 : i32
    %194 = vector.broadcast %c3_i32_61 : i32 to vector<1x24xi32>
    %195 = arith.cmpi eq, %9, %194 : vector<1x24xi32>
    %196 = vector.shape_cast %195 : vector<1x24xi1> to vector<1x24xi1>
    %197 = vector.broadcast %196 : vector<1x24xi1> to vector<4x24xi1>
    %198 = vector.shape_cast %193 : vector<4x1xi32> to vector<4x1xi32>
    %199 = vector.broadcast %198 : vector<4x1xi32> to vector<4x24xi32>
    %200 = arith.select %197, %199, %178 : vector<4x24xi1>, vector<4x24xi32>
    %201 = vector.broadcast %4 : vector<1x32xi32> to vector<4x32xi32>
    %202 = vector.broadcast %193 : vector<4x1xi32> to vector<4x32xi32>
    %203 = arith.cmpi eq, %201, %202 : vector<4x32xi32>
    %cst_62 = arith.constant -1.000000e+30 : f32
    %204 = vector.broadcast %cst_62 : f32 to vector<4x32xf32>
    %205 = arith.select %203, %204, %183 : vector<4x32xi1>, vector<4x32xf32>
    %cst_63 = arith.constant dense<0xFF800000> : vector<4xf32>
    %206 = vector.multi_reduction <maximumf>, %205, %cst_63 [1] : vector<4x32xf32> to vector<4xf32>
    %207 = vector.shape_cast %206 : vector<4xf32> to vector<4x1xf32>
    %208 = vector.broadcast %207 : vector<4x1xf32> to vector<4x32xf32>
    %209 = arith.cmpf oeq, %205, %208 : vector<4x32xf32>
    %c32_i32_64 = arith.constant 32 : i32
    %210 = vector.shape_cast %4 : vector<1x32xi32> to vector<1x32xi32>
    %211 = vector.broadcast %210 : vector<1x32xi32> to vector<4x32xi32>
    %212 = vector.broadcast %c32_i32_64 : i32 to vector<4x32xi32>
    %213 = arith.select %209, %211, %212 : vector<4x32xi1>, vector<4x32xi32>
    %cst_65 = arith.constant dense<2147483647> : vector<4xi32>
    %214 = vector.multi_reduction <minsi>, %213, %cst_65 [1] : vector<4x32xi32> to vector<4xi32>
    %215 = vector.shape_cast %214 : vector<4xi32> to vector<4x1xi32>
    %c4_i32 = arith.constant 4 : i32
    %216 = vector.broadcast %c4_i32 : i32 to vector<1x24xi32>
    %217 = arith.cmpi eq, %9, %216 : vector<1x24xi32>
    %218 = vector.shape_cast %217 : vector<1x24xi1> to vector<1x24xi1>
    %219 = vector.broadcast %218 : vector<1x24xi1> to vector<4x24xi1>
    %220 = vector.shape_cast %215 : vector<4x1xi32> to vector<4x1xi32>
    %221 = vector.broadcast %220 : vector<4x1xi32> to vector<4x24xi32>
    %222 = arith.select %219, %221, %200 : vector<4x24xi1>, vector<4x24xi32>
    %223 = vector.broadcast %4 : vector<1x32xi32> to vector<4x32xi32>
    %224 = vector.broadcast %215 : vector<4x1xi32> to vector<4x32xi32>
    %225 = arith.cmpi eq, %223, %224 : vector<4x32xi32>
    %cst_66 = arith.constant -1.000000e+30 : f32
    %226 = vector.broadcast %cst_66 : f32 to vector<4x32xf32>
    %227 = arith.select %225, %226, %205 : vector<4x32xi1>, vector<4x32xf32>
    %cst_67 = arith.constant dense<0xFF800000> : vector<4xf32>
    %228 = vector.multi_reduction <maximumf>, %227, %cst_67 [1] : vector<4x32xf32> to vector<4xf32>
    %229 = vector.shape_cast %228 : vector<4xf32> to vector<4x1xf32>
    %230 = vector.broadcast %229 : vector<4x1xf32> to vector<4x32xf32>
    %231 = arith.cmpf oeq, %227, %230 : vector<4x32xf32>
    %c32_i32_68 = arith.constant 32 : i32
    %232 = vector.shape_cast %4 : vector<1x32xi32> to vector<1x32xi32>
    %233 = vector.broadcast %232 : vector<1x32xi32> to vector<4x32xi32>
    %234 = vector.broadcast %c32_i32_68 : i32 to vector<4x32xi32>
    %235 = arith.select %231, %233, %234 : vector<4x32xi1>, vector<4x32xi32>
    %cst_69 = arith.constant dense<2147483647> : vector<4xi32>
    %236 = vector.multi_reduction <minsi>, %235, %cst_69 [1] : vector<4x32xi32> to vector<4xi32>
    %237 = vector.shape_cast %236 : vector<4xi32> to vector<4x1xi32>
    %c5_i32 = arith.constant 5 : i32
    %238 = vector.broadcast %c5_i32 : i32 to vector<1x24xi32>
    %239 = arith.cmpi eq, %9, %238 : vector<1x24xi32>
    %240 = vector.shape_cast %239 : vector<1x24xi1> to vector<1x24xi1>
    %241 = vector.broadcast %240 : vector<1x24xi1> to vector<4x24xi1>
    %242 = vector.shape_cast %237 : vector<4x1xi32> to vector<4x1xi32>
    %243 = vector.broadcast %242 : vector<4x1xi32> to vector<4x24xi32>
    %244 = arith.select %241, %243, %222 : vector<4x24xi1>, vector<4x24xi32>
    %245 = vector.broadcast %4 : vector<1x32xi32> to vector<4x32xi32>
    %246 = vector.broadcast %237 : vector<4x1xi32> to vector<4x32xi32>
    %247 = arith.cmpi eq, %245, %246 : vector<4x32xi32>
    %cst_70 = arith.constant -1.000000e+30 : f32
    %248 = vector.broadcast %cst_70 : f32 to vector<4x32xf32>
    %249 = arith.select %247, %248, %227 : vector<4x32xi1>, vector<4x32xf32>
    %cst_71 = arith.constant dense<0xFF800000> : vector<4xf32>
    %250 = vector.multi_reduction <maximumf>, %249, %cst_71 [1] : vector<4x32xf32> to vector<4xf32>
    %251 = vector.shape_cast %250 : vector<4xf32> to vector<4x1xf32>
    %252 = vector.broadcast %251 : vector<4x1xf32> to vector<4x32xf32>
    %253 = arith.cmpf oeq, %249, %252 : vector<4x32xf32>
    %c32_i32_72 = arith.constant 32 : i32
    %254 = vector.shape_cast %4 : vector<1x32xi32> to vector<1x32xi32>
    %255 = vector.broadcast %254 : vector<1x32xi32> to vector<4x32xi32>
    %256 = vector.broadcast %c32_i32_72 : i32 to vector<4x32xi32>
    %257 = arith.select %253, %255, %256 : vector<4x32xi1>, vector<4x32xi32>
    %cst_73 = arith.constant dense<2147483647> : vector<4xi32>
    %258 = vector.multi_reduction <minsi>, %257, %cst_73 [1] : vector<4x32xi32> to vector<4xi32>
    %259 = vector.shape_cast %258 : vector<4xi32> to vector<4x1xi32>
    %c6_i32 = arith.constant 6 : i32
    %260 = vector.broadcast %c6_i32 : i32 to vector<1x24xi32>
    %261 = arith.cmpi eq, %9, %260 : vector<1x24xi32>
    %262 = vector.shape_cast %261 : vector<1x24xi1> to vector<1x24xi1>
    %263 = vector.broadcast %262 : vector<1x24xi1> to vector<4x24xi1>
    %264 = vector.shape_cast %259 : vector<4x1xi32> to vector<4x1xi32>
    %265 = vector.broadcast %264 : vector<4x1xi32> to vector<4x24xi32>
    %266 = arith.select %263, %265, %244 : vector<4x24xi1>, vector<4x24xi32>
    %267 = vector.broadcast %4 : vector<1x32xi32> to vector<4x32xi32>
    %268 = vector.broadcast %259 : vector<4x1xi32> to vector<4x32xi32>
    %269 = arith.cmpi eq, %267, %268 : vector<4x32xi32>
    %cst_74 = arith.constant -1.000000e+30 : f32
    %270 = vector.broadcast %cst_74 : f32 to vector<4x32xf32>
    %271 = arith.select %269, %270, %249 : vector<4x32xi1>, vector<4x32xf32>
    %cst_75 = arith.constant dense<0xFF800000> : vector<4xf32>
    %272 = vector.multi_reduction <maximumf>, %271, %cst_75 [1] : vector<4x32xf32> to vector<4xf32>
    %273 = vector.shape_cast %272 : vector<4xf32> to vector<4x1xf32>
    %274 = vector.broadcast %273 : vector<4x1xf32> to vector<4x32xf32>
    %275 = arith.cmpf oeq, %271, %274 : vector<4x32xf32>
    %c32_i32_76 = arith.constant 32 : i32
    %276 = vector.shape_cast %4 : vector<1x32xi32> to vector<1x32xi32>
    %277 = vector.broadcast %276 : vector<1x32xi32> to vector<4x32xi32>
    %278 = vector.broadcast %c32_i32_76 : i32 to vector<4x32xi32>
    %279 = arith.select %275, %277, %278 : vector<4x32xi1>, vector<4x32xi32>
    %cst_77 = arith.constant dense<2147483647> : vector<4xi32>
    %280 = vector.multi_reduction <minsi>, %279, %cst_77 [1] : vector<4x32xi32> to vector<4xi32>
    %281 = vector.shape_cast %280 : vector<4xi32> to vector<4x1xi32>
    %c7_i32 = arith.constant 7 : i32
    %282 = vector.broadcast %c7_i32 : i32 to vector<1x24xi32>
    %283 = arith.cmpi eq, %9, %282 : vector<1x24xi32>
    %284 = vector.shape_cast %283 : vector<1x24xi1> to vector<1x24xi1>
    %285 = vector.broadcast %284 : vector<1x24xi1> to vector<4x24xi1>
    %286 = vector.shape_cast %281 : vector<4x1xi32> to vector<4x1xi32>
    %287 = vector.broadcast %286 : vector<4x1xi32> to vector<4x24xi32>
    %288 = arith.select %285, %287, %266 : vector<4x24xi1>, vector<4x24xi32>
    %289 = vector.broadcast %4 : vector<1x32xi32> to vector<4x32xi32>
    %290 = vector.broadcast %281 : vector<4x1xi32> to vector<4x32xi32>
    %291 = arith.cmpi eq, %289, %290 : vector<4x32xi32>
    %cst_78 = arith.constant -1.000000e+30 : f32
    %292 = vector.broadcast %cst_78 : f32 to vector<4x32xf32>
    %293 = arith.select %291, %292, %271 : vector<4x32xi1>, vector<4x32xf32>
    %cst_79 = arith.constant dense<0xFF800000> : vector<4xf32>
    %294 = vector.multi_reduction <maximumf>, %293, %cst_79 [1] : vector<4x32xf32> to vector<4xf32>
    %295 = vector.shape_cast %294 : vector<4xf32> to vector<4x1xf32>
    %296 = vector.broadcast %295 : vector<4x1xf32> to vector<4x32xf32>
    %297 = arith.cmpf oeq, %293, %296 : vector<4x32xf32>
    %c32_i32_80 = arith.constant 32 : i32
    %298 = vector.shape_cast %4 : vector<1x32xi32> to vector<1x32xi32>
    %299 = vector.broadcast %298 : vector<1x32xi32> to vector<4x32xi32>
    %300 = vector.broadcast %c32_i32_80 : i32 to vector<4x32xi32>
    %301 = arith.select %297, %299, %300 : vector<4x32xi1>, vector<4x32xi32>
    %cst_81 = arith.constant dense<2147483647> : vector<4xi32>
    %302 = vector.multi_reduction <minsi>, %301, %cst_81 [1] : vector<4x32xi32> to vector<4xi32>
    %303 = vector.shape_cast %302 : vector<4xi32> to vector<4x1xi32>
    %c8_i32 = arith.constant 8 : i32
    %304 = vector.broadcast %c8_i32 : i32 to vector<1x24xi32>
    %305 = arith.cmpi eq, %9, %304 : vector<1x24xi32>
    %306 = vector.shape_cast %305 : vector<1x24xi1> to vector<1x24xi1>
    %307 = vector.broadcast %306 : vector<1x24xi1> to vector<4x24xi1>
    %308 = vector.shape_cast %303 : vector<4x1xi32> to vector<4x1xi32>
    %309 = vector.broadcast %308 : vector<4x1xi32> to vector<4x24xi32>
    %310 = arith.select %307, %309, %288 : vector<4x24xi1>, vector<4x24xi32>
    %311 = vector.broadcast %4 : vector<1x32xi32> to vector<4x32xi32>
    %312 = vector.broadcast %303 : vector<4x1xi32> to vector<4x32xi32>
    %313 = arith.cmpi eq, %311, %312 : vector<4x32xi32>
    %cst_82 = arith.constant -1.000000e+30 : f32
    %314 = vector.broadcast %cst_82 : f32 to vector<4x32xf32>
    %315 = arith.select %313, %314, %293 : vector<4x32xi1>, vector<4x32xf32>
    %cst_83 = arith.constant dense<0xFF800000> : vector<4xf32>
    %316 = vector.multi_reduction <maximumf>, %315, %cst_83 [1] : vector<4x32xf32> to vector<4xf32>
    %317 = vector.shape_cast %316 : vector<4xf32> to vector<4x1xf32>
    %318 = vector.broadcast %317 : vector<4x1xf32> to vector<4x32xf32>
    %319 = arith.cmpf oeq, %315, %318 : vector<4x32xf32>
    %c32_i32_84 = arith.constant 32 : i32
    %320 = vector.shape_cast %4 : vector<1x32xi32> to vector<1x32xi32>
    %321 = vector.broadcast %320 : vector<1x32xi32> to vector<4x32xi32>
    %322 = vector.broadcast %c32_i32_84 : i32 to vector<4x32xi32>
    %323 = arith.select %319, %321, %322 : vector<4x32xi1>, vector<4x32xi32>
    %cst_85 = arith.constant dense<2147483647> : vector<4xi32>
    %324 = vector.multi_reduction <minsi>, %323, %cst_85 [1] : vector<4x32xi32> to vector<4xi32>
    %325 = vector.shape_cast %324 : vector<4xi32> to vector<4x1xi32>
    %c9_i32 = arith.constant 9 : i32
    %326 = vector.broadcast %c9_i32 : i32 to vector<1x24xi32>
    %327 = arith.cmpi eq, %9, %326 : vector<1x24xi32>
    %328 = vector.shape_cast %327 : vector<1x24xi1> to vector<1x24xi1>
    %329 = vector.broadcast %328 : vector<1x24xi1> to vector<4x24xi1>
    %330 = vector.shape_cast %325 : vector<4x1xi32> to vector<4x1xi32>
    %331 = vector.broadcast %330 : vector<4x1xi32> to vector<4x24xi32>
    %332 = arith.select %329, %331, %310 : vector<4x24xi1>, vector<4x24xi32>
    %333 = vector.broadcast %4 : vector<1x32xi32> to vector<4x32xi32>
    %334 = vector.broadcast %325 : vector<4x1xi32> to vector<4x32xi32>
    %335 = arith.cmpi eq, %333, %334 : vector<4x32xi32>
    %cst_86 = arith.constant -1.000000e+30 : f32
    %336 = vector.broadcast %cst_86 : f32 to vector<4x32xf32>
    %337 = arith.select %335, %336, %315 : vector<4x32xi1>, vector<4x32xf32>
    %cst_87 = arith.constant dense<0xFF800000> : vector<4xf32>
    %338 = vector.multi_reduction <maximumf>, %337, %cst_87 [1] : vector<4x32xf32> to vector<4xf32>
    %339 = vector.shape_cast %338 : vector<4xf32> to vector<4x1xf32>
    %340 = vector.broadcast %339 : vector<4x1xf32> to vector<4x32xf32>
    %341 = arith.cmpf oeq, %337, %340 : vector<4x32xf32>
    %c32_i32_88 = arith.constant 32 : i32
    %342 = vector.shape_cast %4 : vector<1x32xi32> to vector<1x32xi32>
    %343 = vector.broadcast %342 : vector<1x32xi32> to vector<4x32xi32>
    %344 = vector.broadcast %c32_i32_88 : i32 to vector<4x32xi32>
    %345 = arith.select %341, %343, %344 : vector<4x32xi1>, vector<4x32xi32>
    %cst_89 = arith.constant dense<2147483647> : vector<4xi32>
    %346 = vector.multi_reduction <minsi>, %345, %cst_89 [1] : vector<4x32xi32> to vector<4xi32>
    %347 = vector.shape_cast %346 : vector<4xi32> to vector<4x1xi32>
    %c10_i32 = arith.constant 10 : i32
    %348 = vector.broadcast %c10_i32 : i32 to vector<1x24xi32>
    %349 = arith.cmpi eq, %9, %348 : vector<1x24xi32>
    %350 = vector.shape_cast %349 : vector<1x24xi1> to vector<1x24xi1>
    %351 = vector.broadcast %350 : vector<1x24xi1> to vector<4x24xi1>
    %352 = vector.shape_cast %347 : vector<4x1xi32> to vector<4x1xi32>
    %353 = vector.broadcast %352 : vector<4x1xi32> to vector<4x24xi32>
    %354 = arith.select %351, %353, %332 : vector<4x24xi1>, vector<4x24xi32>
    %355 = vector.broadcast %4 : vector<1x32xi32> to vector<4x32xi32>
    %356 = vector.broadcast %347 : vector<4x1xi32> to vector<4x32xi32>
    %357 = arith.cmpi eq, %355, %356 : vector<4x32xi32>
    %cst_90 = arith.constant -1.000000e+30 : f32
    %358 = vector.broadcast %cst_90 : f32 to vector<4x32xf32>
    %359 = arith.select %357, %358, %337 : vector<4x32xi1>, vector<4x32xf32>
    %cst_91 = arith.constant dense<0xFF800000> : vector<4xf32>
    %360 = vector.multi_reduction <maximumf>, %359, %cst_91 [1] : vector<4x32xf32> to vector<4xf32>
    %361 = vector.shape_cast %360 : vector<4xf32> to vector<4x1xf32>
    %362 = vector.broadcast %361 : vector<4x1xf32> to vector<4x32xf32>
    %363 = arith.cmpf oeq, %359, %362 : vector<4x32xf32>
    %c32_i32_92 = arith.constant 32 : i32
    %364 = vector.shape_cast %4 : vector<1x32xi32> to vector<1x32xi32>
    %365 = vector.broadcast %364 : vector<1x32xi32> to vector<4x32xi32>
    %366 = vector.broadcast %c32_i32_92 : i32 to vector<4x32xi32>
    %367 = arith.select %363, %365, %366 : vector<4x32xi1>, vector<4x32xi32>
    %cst_93 = arith.constant dense<2147483647> : vector<4xi32>
    %368 = vector.multi_reduction <minsi>, %367, %cst_93 [1] : vector<4x32xi32> to vector<4xi32>
    %369 = vector.shape_cast %368 : vector<4xi32> to vector<4x1xi32>
    %c11_i32 = arith.constant 11 : i32
    %370 = vector.broadcast %c11_i32 : i32 to vector<1x24xi32>
    %371 = arith.cmpi eq, %9, %370 : vector<1x24xi32>
    %372 = vector.shape_cast %371 : vector<1x24xi1> to vector<1x24xi1>
    %373 = vector.broadcast %372 : vector<1x24xi1> to vector<4x24xi1>
    %374 = vector.shape_cast %369 : vector<4x1xi32> to vector<4x1xi32>
    %375 = vector.broadcast %374 : vector<4x1xi32> to vector<4x24xi32>
    %376 = arith.select %373, %375, %354 : vector<4x24xi1>, vector<4x24xi32>
    %377 = vector.broadcast %4 : vector<1x32xi32> to vector<4x32xi32>
    %378 = vector.broadcast %369 : vector<4x1xi32> to vector<4x32xi32>
    %379 = arith.cmpi eq, %377, %378 : vector<4x32xi32>
    %cst_94 = arith.constant -1.000000e+30 : f32
    %380 = vector.broadcast %cst_94 : f32 to vector<4x32xf32>
    %381 = arith.select %379, %380, %359 : vector<4x32xi1>, vector<4x32xf32>
    %cst_95 = arith.constant dense<0xFF800000> : vector<4xf32>
    %382 = vector.multi_reduction <maximumf>, %381, %cst_95 [1] : vector<4x32xf32> to vector<4xf32>
    %383 = vector.shape_cast %382 : vector<4xf32> to vector<4x1xf32>
    %384 = vector.broadcast %383 : vector<4x1xf32> to vector<4x32xf32>
    %385 = arith.cmpf oeq, %381, %384 : vector<4x32xf32>
    %c32_i32_96 = arith.constant 32 : i32
    %386 = vector.shape_cast %4 : vector<1x32xi32> to vector<1x32xi32>
    %387 = vector.broadcast %386 : vector<1x32xi32> to vector<4x32xi32>
    %388 = vector.broadcast %c32_i32_96 : i32 to vector<4x32xi32>
    %389 = arith.select %385, %387, %388 : vector<4x32xi1>, vector<4x32xi32>
    %cst_97 = arith.constant dense<2147483647> : vector<4xi32>
    %390 = vector.multi_reduction <minsi>, %389, %cst_97 [1] : vector<4x32xi32> to vector<4xi32>
    %391 = vector.shape_cast %390 : vector<4xi32> to vector<4x1xi32>
    %c12_i32 = arith.constant 12 : i32
    %392 = vector.broadcast %c12_i32 : i32 to vector<1x24xi32>
    %393 = arith.cmpi eq, %9, %392 : vector<1x24xi32>
    %394 = vector.shape_cast %393 : vector<1x24xi1> to vector<1x24xi1>
    %395 = vector.broadcast %394 : vector<1x24xi1> to vector<4x24xi1>
    %396 = vector.shape_cast %391 : vector<4x1xi32> to vector<4x1xi32>
    %397 = vector.broadcast %396 : vector<4x1xi32> to vector<4x24xi32>
    %398 = arith.select %395, %397, %376 : vector<4x24xi1>, vector<4x24xi32>
    %399 = vector.broadcast %4 : vector<1x32xi32> to vector<4x32xi32>
    %400 = vector.broadcast %391 : vector<4x1xi32> to vector<4x32xi32>
    %401 = arith.cmpi eq, %399, %400 : vector<4x32xi32>
    %cst_98 = arith.constant -1.000000e+30 : f32
    %402 = vector.broadcast %cst_98 : f32 to vector<4x32xf32>
    %403 = arith.select %401, %402, %381 : vector<4x32xi1>, vector<4x32xf32>
    %cst_99 = arith.constant dense<0xFF800000> : vector<4xf32>
    %404 = vector.multi_reduction <maximumf>, %403, %cst_99 [1] : vector<4x32xf32> to vector<4xf32>
    %405 = vector.shape_cast %404 : vector<4xf32> to vector<4x1xf32>
    %406 = vector.broadcast %405 : vector<4x1xf32> to vector<4x32xf32>
    %407 = arith.cmpf oeq, %403, %406 : vector<4x32xf32>
    %c32_i32_100 = arith.constant 32 : i32
    %408 = vector.shape_cast %4 : vector<1x32xi32> to vector<1x32xi32>
    %409 = vector.broadcast %408 : vector<1x32xi32> to vector<4x32xi32>
    %410 = vector.broadcast %c32_i32_100 : i32 to vector<4x32xi32>
    %411 = arith.select %407, %409, %410 : vector<4x32xi1>, vector<4x32xi32>
    %cst_101 = arith.constant dense<2147483647> : vector<4xi32>
    %412 = vector.multi_reduction <minsi>, %411, %cst_101 [1] : vector<4x32xi32> to vector<4xi32>
    %413 = vector.shape_cast %412 : vector<4xi32> to vector<4x1xi32>
    %c13_i32 = arith.constant 13 : i32
    %414 = vector.broadcast %c13_i32 : i32 to vector<1x24xi32>
    %415 = arith.cmpi eq, %9, %414 : vector<1x24xi32>
    %416 = vector.shape_cast %415 : vector<1x24xi1> to vector<1x24xi1>
    %417 = vector.broadcast %416 : vector<1x24xi1> to vector<4x24xi1>
    %418 = vector.shape_cast %413 : vector<4x1xi32> to vector<4x1xi32>
    %419 = vector.broadcast %418 : vector<4x1xi32> to vector<4x24xi32>
    %420 = arith.select %417, %419, %398 : vector<4x24xi1>, vector<4x24xi32>
    %421 = vector.broadcast %4 : vector<1x32xi32> to vector<4x32xi32>
    %422 = vector.broadcast %413 : vector<4x1xi32> to vector<4x32xi32>
    %423 = arith.cmpi eq, %421, %422 : vector<4x32xi32>
    %cst_102 = arith.constant -1.000000e+30 : f32
    %424 = vector.broadcast %cst_102 : f32 to vector<4x32xf32>
    %425 = arith.select %423, %424, %403 : vector<4x32xi1>, vector<4x32xf32>
    %cst_103 = arith.constant dense<0xFF800000> : vector<4xf32>
    %426 = vector.multi_reduction <maximumf>, %425, %cst_103 [1] : vector<4x32xf32> to vector<4xf32>
    %427 = vector.shape_cast %426 : vector<4xf32> to vector<4x1xf32>
    %428 = vector.broadcast %427 : vector<4x1xf32> to vector<4x32xf32>
    %429 = arith.cmpf oeq, %425, %428 : vector<4x32xf32>
    %c32_i32_104 = arith.constant 32 : i32
    %430 = vector.shape_cast %4 : vector<1x32xi32> to vector<1x32xi32>
    %431 = vector.broadcast %430 : vector<1x32xi32> to vector<4x32xi32>
    %432 = vector.broadcast %c32_i32_104 : i32 to vector<4x32xi32>
    %433 = arith.select %429, %431, %432 : vector<4x32xi1>, vector<4x32xi32>
    %cst_105 = arith.constant dense<2147483647> : vector<4xi32>
    %434 = vector.multi_reduction <minsi>, %433, %cst_105 [1] : vector<4x32xi32> to vector<4xi32>
    %435 = vector.shape_cast %434 : vector<4xi32> to vector<4x1xi32>
    %c14_i32 = arith.constant 14 : i32
    %436 = vector.broadcast %c14_i32 : i32 to vector<1x24xi32>
    %437 = arith.cmpi eq, %9, %436 : vector<1x24xi32>
    %438 = vector.shape_cast %437 : vector<1x24xi1> to vector<1x24xi1>
    %439 = vector.broadcast %438 : vector<1x24xi1> to vector<4x24xi1>
    %440 = vector.shape_cast %435 : vector<4x1xi32> to vector<4x1xi32>
    %441 = vector.broadcast %440 : vector<4x1xi32> to vector<4x24xi32>
    %442 = arith.select %439, %441, %420 : vector<4x24xi1>, vector<4x24xi32>
    %443 = vector.broadcast %4 : vector<1x32xi32> to vector<4x32xi32>
    %444 = vector.broadcast %435 : vector<4x1xi32> to vector<4x32xi32>
    %445 = arith.cmpi eq, %443, %444 : vector<4x32xi32>
    %cst_106 = arith.constant -1.000000e+30 : f32
    %446 = vector.broadcast %cst_106 : f32 to vector<4x32xf32>
    %447 = arith.select %445, %446, %425 : vector<4x32xi1>, vector<4x32xf32>
    %cst_107 = arith.constant dense<0xFF800000> : vector<4xf32>
    %448 = vector.multi_reduction <maximumf>, %447, %cst_107 [1] : vector<4x32xf32> to vector<4xf32>
    %449 = vector.shape_cast %448 : vector<4xf32> to vector<4x1xf32>
    %450 = vector.broadcast %449 : vector<4x1xf32> to vector<4x32xf32>
    %451 = arith.cmpf oeq, %447, %450 : vector<4x32xf32>
    %c32_i32_108 = arith.constant 32 : i32
    %452 = vector.shape_cast %4 : vector<1x32xi32> to vector<1x32xi32>
    %453 = vector.broadcast %452 : vector<1x32xi32> to vector<4x32xi32>
    %454 = vector.broadcast %c32_i32_108 : i32 to vector<4x32xi32>
    %455 = arith.select %451, %453, %454 : vector<4x32xi1>, vector<4x32xi32>
    %cst_109 = arith.constant dense<2147483647> : vector<4xi32>
    %456 = vector.multi_reduction <minsi>, %455, %cst_109 [1] : vector<4x32xi32> to vector<4xi32>
    %457 = vector.shape_cast %456 : vector<4xi32> to vector<4x1xi32>
    %c15_i32 = arith.constant 15 : i32
    %458 = vector.broadcast %c15_i32 : i32 to vector<1x24xi32>
    %459 = arith.cmpi eq, %9, %458 : vector<1x24xi32>
    %460 = vector.shape_cast %459 : vector<1x24xi1> to vector<1x24xi1>
    %461 = vector.broadcast %460 : vector<1x24xi1> to vector<4x24xi1>
    %462 = vector.shape_cast %457 : vector<4x1xi32> to vector<4x1xi32>
    %463 = vector.broadcast %462 : vector<4x1xi32> to vector<4x24xi32>
    %464 = arith.select %461, %463, %442 : vector<4x24xi1>, vector<4x24xi32>
    %465 = vector.broadcast %4 : vector<1x32xi32> to vector<4x32xi32>
    %466 = vector.broadcast %457 : vector<4x1xi32> to vector<4x32xi32>
    %467 = arith.cmpi eq, %465, %466 : vector<4x32xi32>
    %cst_110 = arith.constant -1.000000e+30 : f32
    %468 = vector.broadcast %cst_110 : f32 to vector<4x32xf32>
    %469 = arith.select %467, %468, %447 : vector<4x32xi1>, vector<4x32xf32>
    %cst_111 = arith.constant dense<0xFF800000> : vector<4xf32>
    %470 = vector.multi_reduction <maximumf>, %469, %cst_111 [1] : vector<4x32xf32> to vector<4xf32>
    %471 = vector.shape_cast %470 : vector<4xf32> to vector<4x1xf32>
    %472 = vector.broadcast %471 : vector<4x1xf32> to vector<4x32xf32>
    %473 = arith.cmpf oeq, %469, %472 : vector<4x32xf32>
    %c32_i32_112 = arith.constant 32 : i32
    %474 = vector.shape_cast %4 : vector<1x32xi32> to vector<1x32xi32>
    %475 = vector.broadcast %474 : vector<1x32xi32> to vector<4x32xi32>
    %476 = vector.broadcast %c32_i32_112 : i32 to vector<4x32xi32>
    %477 = arith.select %473, %475, %476 : vector<4x32xi1>, vector<4x32xi32>
    %cst_113 = arith.constant dense<2147483647> : vector<4xi32>
    %478 = vector.multi_reduction <minsi>, %477, %cst_113 [1] : vector<4x32xi32> to vector<4xi32>
    %479 = vector.shape_cast %478 : vector<4xi32> to vector<4x1xi32>
    %c16_i32 = arith.constant 16 : i32
    %480 = vector.broadcast %c16_i32 : i32 to vector<1x24xi32>
    %481 = arith.cmpi eq, %9, %480 : vector<1x24xi32>
    %482 = vector.shape_cast %481 : vector<1x24xi1> to vector<1x24xi1>
    %483 = vector.broadcast %482 : vector<1x24xi1> to vector<4x24xi1>
    %484 = vector.shape_cast %479 : vector<4x1xi32> to vector<4x1xi32>
    %485 = vector.broadcast %484 : vector<4x1xi32> to vector<4x24xi32>
    %486 = arith.select %483, %485, %464 : vector<4x24xi1>, vector<4x24xi32>
    %487 = vector.broadcast %4 : vector<1x32xi32> to vector<4x32xi32>
    %488 = vector.broadcast %479 : vector<4x1xi32> to vector<4x32xi32>
    %489 = arith.cmpi eq, %487, %488 : vector<4x32xi32>
    %cst_114 = arith.constant -1.000000e+30 : f32
    %490 = vector.broadcast %cst_114 : f32 to vector<4x32xf32>
    %491 = arith.select %489, %490, %469 : vector<4x32xi1>, vector<4x32xf32>
    %cst_115 = arith.constant dense<0xFF800000> : vector<4xf32>
    %492 = vector.multi_reduction <maximumf>, %491, %cst_115 [1] : vector<4x32xf32> to vector<4xf32>
    %493 = vector.shape_cast %492 : vector<4xf32> to vector<4x1xf32>
    %494 = vector.broadcast %493 : vector<4x1xf32> to vector<4x32xf32>
    %495 = arith.cmpf oeq, %491, %494 : vector<4x32xf32>
    %c32_i32_116 = arith.constant 32 : i32
    %496 = vector.shape_cast %4 : vector<1x32xi32> to vector<1x32xi32>
    %497 = vector.broadcast %496 : vector<1x32xi32> to vector<4x32xi32>
    %498 = vector.broadcast %c32_i32_116 : i32 to vector<4x32xi32>
    %499 = arith.select %495, %497, %498 : vector<4x32xi1>, vector<4x32xi32>
    %cst_117 = arith.constant dense<2147483647> : vector<4xi32>
    %500 = vector.multi_reduction <minsi>, %499, %cst_117 [1] : vector<4x32xi32> to vector<4xi32>
    %501 = vector.shape_cast %500 : vector<4xi32> to vector<4x1xi32>
    %c17_i32 = arith.constant 17 : i32
    %502 = vector.broadcast %c17_i32 : i32 to vector<1x24xi32>
    %503 = arith.cmpi eq, %9, %502 : vector<1x24xi32>
    %504 = vector.shape_cast %503 : vector<1x24xi1> to vector<1x24xi1>
    %505 = vector.broadcast %504 : vector<1x24xi1> to vector<4x24xi1>
    %506 = vector.shape_cast %501 : vector<4x1xi32> to vector<4x1xi32>
    %507 = vector.broadcast %506 : vector<4x1xi32> to vector<4x24xi32>
    %508 = arith.select %505, %507, %486 : vector<4x24xi1>, vector<4x24xi32>
    %509 = vector.broadcast %4 : vector<1x32xi32> to vector<4x32xi32>
    %510 = vector.broadcast %501 : vector<4x1xi32> to vector<4x32xi32>
    %511 = arith.cmpi eq, %509, %510 : vector<4x32xi32>
    %cst_118 = arith.constant -1.000000e+30 : f32
    %512 = vector.broadcast %cst_118 : f32 to vector<4x32xf32>
    %513 = arith.select %511, %512, %491 : vector<4x32xi1>, vector<4x32xf32>
    %cst_119 = arith.constant dense<0xFF800000> : vector<4xf32>
    %514 = vector.multi_reduction <maximumf>, %513, %cst_119 [1] : vector<4x32xf32> to vector<4xf32>
    %515 = vector.shape_cast %514 : vector<4xf32> to vector<4x1xf32>
    %516 = vector.broadcast %515 : vector<4x1xf32> to vector<4x32xf32>
    %517 = arith.cmpf oeq, %513, %516 : vector<4x32xf32>
    %c32_i32_120 = arith.constant 32 : i32
    %518 = vector.shape_cast %4 : vector<1x32xi32> to vector<1x32xi32>
    %519 = vector.broadcast %518 : vector<1x32xi32> to vector<4x32xi32>
    %520 = vector.broadcast %c32_i32_120 : i32 to vector<4x32xi32>
    %521 = arith.select %517, %519, %520 : vector<4x32xi1>, vector<4x32xi32>
    %cst_121 = arith.constant dense<2147483647> : vector<4xi32>
    %522 = vector.multi_reduction <minsi>, %521, %cst_121 [1] : vector<4x32xi32> to vector<4xi32>
    %523 = vector.shape_cast %522 : vector<4xi32> to vector<4x1xi32>
    %c18_i32 = arith.constant 18 : i32
    %524 = vector.broadcast %c18_i32 : i32 to vector<1x24xi32>
    %525 = arith.cmpi eq, %9, %524 : vector<1x24xi32>
    %526 = vector.shape_cast %525 : vector<1x24xi1> to vector<1x24xi1>
    %527 = vector.broadcast %526 : vector<1x24xi1> to vector<4x24xi1>
    %528 = vector.shape_cast %523 : vector<4x1xi32> to vector<4x1xi32>
    %529 = vector.broadcast %528 : vector<4x1xi32> to vector<4x24xi32>
    %530 = arith.select %527, %529, %508 : vector<4x24xi1>, vector<4x24xi32>
    %531 = vector.broadcast %4 : vector<1x32xi32> to vector<4x32xi32>
    %532 = vector.broadcast %523 : vector<4x1xi32> to vector<4x32xi32>
    %533 = arith.cmpi eq, %531, %532 : vector<4x32xi32>
    %cst_122 = arith.constant -1.000000e+30 : f32
    %534 = vector.broadcast %cst_122 : f32 to vector<4x32xf32>
    %535 = arith.select %533, %534, %513 : vector<4x32xi1>, vector<4x32xf32>
    %cst_123 = arith.constant dense<0xFF800000> : vector<4xf32>
    %536 = vector.multi_reduction <maximumf>, %535, %cst_123 [1] : vector<4x32xf32> to vector<4xf32>
    %537 = vector.shape_cast %536 : vector<4xf32> to vector<4x1xf32>
    %538 = vector.broadcast %537 : vector<4x1xf32> to vector<4x32xf32>
    %539 = arith.cmpf oeq, %535, %538 : vector<4x32xf32>
    %c32_i32_124 = arith.constant 32 : i32
    %540 = vector.shape_cast %4 : vector<1x32xi32> to vector<1x32xi32>
    %541 = vector.broadcast %540 : vector<1x32xi32> to vector<4x32xi32>
    %542 = vector.broadcast %c32_i32_124 : i32 to vector<4x32xi32>
    %543 = arith.select %539, %541, %542 : vector<4x32xi1>, vector<4x32xi32>
    %cst_125 = arith.constant dense<2147483647> : vector<4xi32>
    %544 = vector.multi_reduction <minsi>, %543, %cst_125 [1] : vector<4x32xi32> to vector<4xi32>
    %545 = vector.shape_cast %544 : vector<4xi32> to vector<4x1xi32>
    %c19_i32 = arith.constant 19 : i32
    %546 = vector.broadcast %c19_i32 : i32 to vector<1x24xi32>
    %547 = arith.cmpi eq, %9, %546 : vector<1x24xi32>
    %548 = vector.shape_cast %547 : vector<1x24xi1> to vector<1x24xi1>
    %549 = vector.broadcast %548 : vector<1x24xi1> to vector<4x24xi1>
    %550 = vector.shape_cast %545 : vector<4x1xi32> to vector<4x1xi32>
    %551 = vector.broadcast %550 : vector<4x1xi32> to vector<4x24xi32>
    %552 = arith.select %549, %551, %530 : vector<4x24xi1>, vector<4x24xi32>
    %c0_126 = arith.constant 0 : index
    %c0_127 = arith.constant 0 : index
    %c0_128 = arith.constant 0 : index
    %553 = vector.load %arg1[%c0_126, %c0_127, %c0_128] : memref<1x32x128xf32, #tpu.memory_space<vmem>>, vector<1x32x32xf32>
    %554 = vector.shape_cast %553 : vector<1x32x32xf32> to vector<32x32xf32>
    %555 = arith.truncf %554 : vector<32x32xf32> to vector<32x32xbf16>
    %c0_129 = arith.constant 0 : index
    %c0_130 = arith.constant 0 : index
    %c0_131 = arith.constant 0 : index
    %556 = vector.load %arg2[%c0_129, %c0_130, %c0_131] : memref<1x32x128xf32, #tpu.memory_space<vmem>>, vector<1x32x32xf32>
    %557 = vector.shape_cast %556 : vector<1x32x32xf32> to vector<32x32xf32>
    %558 = arith.truncf %557 : vector<32x32xf32> to vector<32x32xbf16>
    %c0_132 = arith.constant 0 : index
    %c0_133 = arith.constant 0 : index
    %c0_134 = arith.constant 0 : index
    %559 = vector.load %arg3[%c0_132, %c0_133, %c0_134] : memref<1x32x128xf32, #tpu.memory_space<vmem>>, vector<1x32x32xf32>
    %560 = vector.shape_cast %559 : vector<1x32x32xf32> to vector<32x32xf32>
    %561 = arith.truncf %560 : vector<32x32xf32> to vector<32x32xbf16>
    %562 = vector.extract_strided_slice %552 {offsets = [0, 0], sizes = [1, 24], strides = [1, 1]} : vector<4x24xi32> to vector<1x24xi32>
    %563 = arith.sitofp %562 : vector<1x24xi32> to vector<1x24xf32>
    %564 = vector.broadcast %9 : vector<1x24xi32> to vector<24x24xi32>
    %565 = vector.broadcast %10 : vector<24x1xi32> to vector<24x24xi32>
    %566 = arith.cmpi eq, %564, %565 : vector<24x24xi32>
    %cst_135 = arith.constant 0.000000e+00 : f32
    %567 = vector.shape_cast %563 : vector<1x24xf32> to vector<1x24xf32>
    %568 = vector.broadcast %567 : vector<1x24xf32> to vector<24x24xf32>
    %569 = vector.broadcast %cst_135 : f32 to vector<24x24xf32>
    %570 = arith.select %566, %568, %569 : vector<24x24xi1>, vector<24x24xf32>
    %cst_136 = arith.constant dense<0.000000e+00> : vector<24xf32>
    %571 = vector.multi_reduction <add>, %570, %cst_136 [1] : vector<24x24xf32> to vector<24xf32>
    %572 = vector.shape_cast %571 : vector<24xf32> to vector<24x1xf32>
    %573 = vector.broadcast %5 : vector<1x32xf32> to vector<24x32xf32>
    %574 = vector.broadcast %572 : vector<24x1xf32> to vector<24x32xf32>
    %575 = arith.cmpf oeq, %573, %574 : vector<24x32xf32>
    %576 = arith.extui %575 : vector<24x32xi1> to vector<24x32xi32>
    %577 = arith.sitofp %576 : vector<24x32xi32> to vector<24x32xf32>
    %578 = arith.truncf %577 : vector<24x32xf32> to vector<24x32xbf16>
    %579 = vector.broadcast %8 : vector<32x1xi32> to vector<32x24xi32>
    %580 = vector.broadcast %562 : vector<1x24xi32> to vector<32x24xi32>
    %581 = arith.cmpi eq, %579, %580 : vector<32x24xi32>
    %582 = arith.extui %581 : vector<32x24xi1> to vector<32x24xi32>
    %583 = arith.sitofp %582 : vector<32x24xi32> to vector<32x24xf32>
    %cst_137 = arith.constant dense<0.000000e+00> : vector<24x32xf32>
    %584 = tpu.matmul %578, %555, %cst_137 {dimension_numbers = #tpu.dot_dimension_numbers<[1], [0], [0], [1], [0, 0, 1, 1], [], []>} : vector<24x32xbf16>, vector<32x32xbf16>, vector<24x32xf32> -> vector<24x32xf32>
    %585 = arith.truncf %584 : vector<24x32xf32> to vector<24x32xbf16>
    "tpu.trace_start"() <{level = 10 : i32, message = "ud,kd->uk"}> : () -> ()
    %cst_138 = arith.constant dense<0.000000e+00> : vector<24x32xf32>
    %586 = tpu.matmul %585, %558, %cst_138 {dimension_numbers = #tpu.dot_dimension_numbers<[1], [1], [0], [0], [0, 0, 1, 0], [], []>} : vector<24x32xbf16>, vector<32x32xbf16>, vector<24x32xf32> -> vector<24x32xf32>
    "tpu.trace_stop"() : () -> ()
    %cst_139 = arith.constant 0.176776692 : f32
    %587 = vector.broadcast %cst_139 : f32 to vector<24x32xf32>
    %588 = arith.mulf %586, %587 : vector<24x32xf32>
    %589 = vector.broadcast %7 : vector<1x32xf32> to vector<24x32xf32>
    %590 = vector.broadcast %572 : vector<24x1xf32> to vector<24x32xf32>
    %591 = arith.cmpf ole, %589, %590 : vector<24x32xf32>
    %cst_140 = arith.constant -1.000000e+30 : f32
    %592 = vector.broadcast %cst_140 : f32 to vector<24x32xf32>
    %593 = arith.select %591, %588, %592 : vector<24x32xi1>, vector<24x32xf32>
    %cst_141 = arith.constant dense<0.000000e+00> : vector<32x32xf32>
    %594 = tpu.matmul %19, %561, %cst_141 {dimension_numbers = #tpu.dot_dimension_numbers<[1], [0], [0], [1], [0, 0, 1, 1], [], []>} : vector<32x32xbf16>, vector<32x32xbf16>, vector<32x32xf32> -> vector<32x32xf32>
    %cst_142 = arith.constant dense<0xFF800000> : vector<24xf32>
    %595 = vector.multi_reduction <maximumf>, %593, %cst_142 [1] : vector<24x32xf32> to vector<24xf32>
    %596 = vector.shape_cast %595 : vector<24xf32> to vector<24x1xf32>
    %597 = vector.broadcast %596 : vector<24x1xf32> to vector<24x32xf32>
    %598 = arith.subf %593, %597 : vector<24x32xf32>
    %599 = math.exp %598 : vector<24x32xf32>
    %cst_143 = arith.constant dense<0.000000e+00> : vector<24xf32>
    %600 = vector.multi_reduction <add>, %599, %cst_143 [1] : vector<24x32xf32> to vector<24xf32>
    %601 = vector.shape_cast %600 : vector<24xf32> to vector<24x1xf32>
    %602 = tpu.reciprocal %601 {approx = true} : vector<24x1xf32> -> vector<24x1xf32>
    %603 = vector.broadcast %602 : vector<24x1xf32> to vector<24x32xf32>
    %604 = arith.mulf %599, %603 : vector<24x32xf32>
    %605 = arith.truncf %604 : vector<24x32xf32> to vector<24x32xbf16>
    %cst_144 = arith.constant dense<0.000000e+00> : vector<24x32xf32>
    %606 = tpu.matmul %605, %561, %cst_144 {dimension_numbers = #tpu.dot_dimension_numbers<[1], [0], [0], [1], [0, 0, 1, 1], [], []>} : vector<24x32xbf16>, vector<32x32xbf16>, vector<24x32xf32> -> vector<24x32xf32>
    %cst_145 = arith.constant dense<0.000000e+00> : vector<32x32xf32>
    %607 = tpu.matmul %583, %606, %cst_145 {dimension_numbers = #tpu.dot_dimension_numbers<[1], [0], [0], [1], [0, 0, 1, 1], [], []>} : vector<32x24xf32>, vector<24x32xf32>, vector<32x32xf32> -> vector<32x32xf32>
    %cst_146 = arith.constant dense<0.000000e+00> : vector<32xf32>
    %608 = vector.multi_reduction <add>, %583, %cst_146 [1] : vector<32x24xf32> to vector<32xf32>
    %609 = vector.shape_cast %608 : vector<32xf32> to vector<32x1xf32>
    %cst_147 = arith.constant 0.000000e+00 : f32
    %610 = vector.broadcast %cst_147 : f32 to vector<32x1xf32>
    %611 = arith.cmpf ogt, %609, %610 : vector<32x1xf32>
    %612 = vector.shape_cast %611 : vector<32x1xi1> to vector<32x1xi1>
    %613 = vector.broadcast %612 : vector<32x1xi1> to vector<32x32xi1>
    %614 = arith.select %613, %607, %594 : vector<32x32xi1>, vector<32x32xf32>
    %c0_148 = arith.constant 0 : index
    %c0_149 = arith.constant 0 : index
    %c0_150 = arith.constant 0 : index
    %615 = vector.load %arg5[%c0_148, %c0_149, %c0_150] : memref<1x32x128xf32, #tpu.memory_space<vmem>>, vector<1x32x32xf32>
    %616 = vector.shape_cast %615 : vector<1x32x32xf32> to vector<32x32xf32>
    %617 = vector.shape_cast %614 : vector<32x32xf32> to vector<1x32x32xf32>
    tpu.vector_store %arg5[%c0_148, %c0_149, %c0_150], %617 {strides = array<i32>} : memref<1x32x128xf32, #tpu.memory_space<vmem>>, vector<1x32x32xf32>,
    %c0_151 = arith.constant 0 : index
    %c0_152 = arith.constant 0 : index
    %c32_153 = arith.constant 32 : index
    %618 = vector.load %arg1[%c0_151, %c0_152, %c32_153] : memref<1x32x128xf32, #tpu.memory_space<vmem>>, vector<1x32x32xf32>
    %619 = vector.shape_cast %618 : vector<1x32x32xf32> to vector<32x32xf32>
    %620 = arith.truncf %619 : vector<32x32xf32> to vector<32x32xbf16>
    %c0_154 = arith.constant 0 : index
    %c0_155 = arith.constant 0 : index
    %c32_156 = arith.constant 32 : index
    %621 = vector.load %arg2[%c0_154, %c0_155, %c32_156] : memref<1x32x128xf32, #tpu.memory_space<vmem>>, vector<1x32x32xf32>
    %622 = vector.shape_cast %621 : vector<1x32x32xf32> to vector<32x32xf32>
    %623 = arith.truncf %622 : vector<32x32xf32> to vector<32x32xbf16>
    %c0_157 = arith.constant 0 : index
    %c0_158 = arith.constant 0 : index
    %c32_159 = arith.constant 32 : index
    %624 = vector.load %arg3[%c0_157, %c0_158, %c32_159] : memref<1x32x128xf32, #tpu.memory_space<vmem>>, vector<1x32x32xf32>
    %625 = vector.shape_cast %624 : vector<1x32x32xf32> to vector<32x32xf32>
    %626 = arith.truncf %625 : vector<32x32xf32> to vector<32x32xbf16>
    %627 = vector.extract_strided_slice %552 {offsets = [1, 0], sizes = [1, 24], strides = [1, 1]} : vector<4x24xi32> to vector<1x24xi32>
    %628 = arith.sitofp %627 : vector<1x24xi32> to vector<1x24xf32>
    %629 = vector.broadcast %9 : vector<1x24xi32> to vector<24x24xi32>
    %630 = vector.broadcast %10 : vector<24x1xi32> to vector<24x24xi32>
    %631 = arith.cmpi eq, %629, %630 : vector<24x24xi32>
    %cst_160 = arith.constant 0.000000e+00 : f32
    %632 = vector.shape_cast %628 : vector<1x24xf32> to vector<1x24xf32>
    %633 = vector.broadcast %632 : vector<1x24xf32> to vector<24x24xf32>
    %634 = vector.broadcast %cst_160 : f32 to vector<24x24xf32>
    %635 = arith.select %631, %633, %634 : vector<24x24xi1>, vector<24x24xf32>
    %cst_161 = arith.constant dense<0.000000e+00> : vector<24xf32>
    %636 = vector.multi_reduction <add>, %635, %cst_161 [1] : vector<24x24xf32> to vector<24xf32>
    %637 = vector.shape_cast %636 : vector<24xf32> to vector<24x1xf32>
    %638 = vector.broadcast %5 : vector<1x32xf32> to vector<24x32xf32>
    %639 = vector.broadcast %637 : vector<24x1xf32> to vector<24x32xf32>
    %640 = arith.cmpf oeq, %638, %639 : vector<24x32xf32>
    %641 = arith.extui %640 : vector<24x32xi1> to vector<24x32xi32>
    %642 = arith.sitofp %641 : vector<24x32xi32> to vector<24x32xf32>
    %643 = arith.truncf %642 : vector<24x32xf32> to vector<24x32xbf16>
    %644 = vector.broadcast %8 : vector<32x1xi32> to vector<32x24xi32>
    %645 = vector.broadcast %627 : vector<1x24xi32> to vector<32x24xi32>
    %646 = arith.cmpi eq, %644, %645 : vector<32x24xi32>
    %647 = arith.extui %646 : vector<32x24xi1> to vector<32x24xi32>
    %648 = arith.sitofp %647 : vector<32x24xi32> to vector<32x24xf32>
    %cst_162 = arith.constant dense<0.000000e+00> : vector<24x32xf32>
    %649 = tpu.matmul %643, %620, %cst_162 {dimension_numbers = #tpu.dot_dimension_numbers<[1], [0], [0], [1], [0, 0, 1, 1], [], []>} : vector<24x32xbf16>, vector<32x32xbf16>, vector<24x32xf32> -> vector<24x32xf32>
    %650 = arith.truncf %649 : vector<24x32xf32> to vector<24x32xbf16>
    "tpu.trace_start"() <{level = 10 : i32, message = "ud,kd->uk"}> : () -> ()
    %cst_163 = arith.constant dense<0.000000e+00> : vector<24x32xf32>
    %651 = tpu.matmul %650, %623, %cst_163 {dimension_numbers = #tpu.dot_dimension_numbers<[1], [1], [0], [0], [0, 0, 1, 0], [], []>} : vector<24x32xbf16>, vector<32x32xbf16>, vector<24x32xf32> -> vector<24x32xf32>
    "tpu.trace_stop"() : () -> ()
    %cst_164 = arith.constant 0.176776692 : f32
    %652 = vector.broadcast %cst_164 : f32 to vector<24x32xf32>
    %653 = arith.mulf %651, %652 : vector<24x32xf32>
    %654 = vector.broadcast %7 : vector<1x32xf32> to vector<24x32xf32>
    %655 = vector.broadcast %637 : vector<24x1xf32> to vector<24x32xf32>
    %656 = arith.cmpf ole, %654, %655 : vector<24x32xf32>
    %cst_165 = arith.constant -1.000000e+30 : f32
    %657 = vector.broadcast %cst_165 : f32 to vector<24x32xf32>
    %658 = arith.select %656, %653, %657 : vector<24x32xi1>, vector<24x32xf32>
    %cst_166 = arith.constant dense<0.000000e+00> : vector<32x32xf32>
    %659 = tpu.matmul %19, %626, %cst_166 {dimension_numbers = #tpu.dot_dimension_numbers<[1], [0], [0], [1], [0, 0, 1, 1], [], []>} : vector<32x32xbf16>, vector<32x32xbf16>, vector<32x32xf32> -> vector<32x32xf32>
    %cst_167 = arith.constant dense<0xFF800000> : vector<24xf32>
    %660 = vector.multi_reduction <maximumf>, %658, %cst_167 [1] : vector<24x32xf32> to vector<24xf32>
    %661 = vector.shape_cast %660 : vector<24xf32> to vector<24x1xf32>
    %662 = vector.broadcast %661 : vector<24x1xf32> to vector<24x32xf32>
    %663 = arith.subf %658, %662 : vector<24x32xf32>
    %664 = math.exp %663 : vector<24x32xf32>
    %cst_168 = arith.constant dense<0.000000e+00> : vector<24xf32>
    %665 = vector.multi_reduction <add>, %664, %cst_168 [1] : vector<24x32xf32> to vector<24xf32>
    %666 = vector.shape_cast %665 : vector<24xf32> to vector<24x1xf32>
    %667 = tpu.reciprocal %666 {approx = true} : vector<24x1xf32> -> vector<24x1xf32>
    %668 = vector.broadcast %667 : vector<24x1xf32> to vector<24x32xf32>
    %669 = arith.mulf %664, %668 : vector<24x32xf32>
    %670 = arith.truncf %669 : vector<24x32xf32> to vector<24x32xbf16>
    %cst_169 = arith.constant dense<0.000000e+00> : vector<24x32xf32>
    %671 = tpu.matmul %670, %626, %cst_169 {dimension_numbers = #tpu.dot_dimension_numbers<[1], [0], [0], [1], [0, 0, 1, 1], [], []>} : vector<24x32xbf16>, vector<32x32xbf16>, vector<24x32xf32> -> vector<24x32xf32>
    %cst_170 = arith.constant dense<0.000000e+00> : vector<32x32xf32>
    %672 = tpu.matmul %648, %671, %cst_170 {dimension_numbers = #tpu.dot_dimension_numbers<[1], [0], [0], [1], [0, 0, 1, 1], [], []>} : vector<32x24xf32>, vector<24x32xf32>, vector<32x32xf32> -> vector<32x32xf32>
    %cst_171 = arith.constant dense<0.000000e+00> : vector<32xf32>
    %673 = vector.multi_reduction <add>, %648, %cst_171 [1] : vector<32x24xf32> to vector<32xf32>
    %674 = vector.shape_cast %673 : vector<32xf32> to vector<32x1xf32>
    %cst_172 = arith.constant 0.000000e+00 : f32
    %675 = vector.broadcast %cst_172 : f32 to vector<32x1xf32>
    %676 = arith.cmpf ogt, %674, %675 : vector<32x1xf32>
    %677 = vector.shape_cast %676 : vector<32x1xi1> to vector<32x1xi1>
    %678 = vector.broadcast %677 : vector<32x1xi1> to vector<32x32xi1>
    %679 = arith.select %678, %672, %659 : vector<32x32xi1>, vector<32x32xf32>
    %c0_173 = arith.constant 0 : index
    %c0_174 = arith.constant 0 : index
    %c32_175 = arith.constant 32 : index
    %680 = vector.load %arg5[%c0_173, %c0_174, %c32_175] : memref<1x32x128xf32, #tpu.memory_space<vmem>>, vector<1x32x32xf32>
    %681 = vector.shape_cast %680 : vector<1x32x32xf32> to vector<32x32xf32>
    %682 = vector.shape_cast %679 : vector<32x32xf32> to vector<1x32x32xf32>
    tpu.vector_store %arg5[%c0_173, %c0_174, %c32_175], %682 {strides = array<i32>} : memref<1x32x128xf32, #tpu.memory_space<vmem>>, vector<1x32x32xf32>,
    %c0_176 = arith.constant 0 : index
    %c0_177 = arith.constant 0 : index
    %c64_178 = arith.constant 64 : index
    %683 = vector.load %arg1[%c0_176, %c0_177, %c64_178] : memref<1x32x128xf32, #tpu.memory_space<vmem>>, vector<1x32x32xf32>
    %684 = vector.shape_cast %683 : vector<1x32x32xf32> to vector<32x32xf32>
    %685 = arith.truncf %684 : vector<32x32xf32> to vector<32x32xbf16>
    %c0_179 = arith.constant 0 : index
    %c0_180 = arith.constant 0 : index
    %c64_181 = arith.constant 64 : index
    %686 = vector.load %arg2[%c0_179, %c0_180, %c64_181] : memref<1x32x128xf32, #tpu.memory_space<vmem>>, vector<1x32x32xf32>
    %687 = vector.shape_cast %686 : vector<1x32x32xf32> to vector<32x32xf32>
    %688 = arith.truncf %687 : vector<32x32xf32> to vector<32x32xbf16>
    %c0_182 = arith.constant 0 : index
    %c0_183 = arith.constant 0 : index
    %c64_184 = arith.constant 64 : index
    %689 = vector.load %arg3[%c0_182, %c0_183, %c64_184] : memref<1x32x128xf32, #tpu.memory_space<vmem>>, vector<1x32x32xf32>
    %690 = vector.shape_cast %689 : vector<1x32x32xf32> to vector<32x32xf32>
    %691 = arith.truncf %690 : vector<32x32xf32> to vector<32x32xbf16>
    %692 = vector.extract_strided_slice %552 {offsets = [2, 0], sizes = [1, 24], strides = [1, 1]} : vector<4x24xi32> to vector<1x24xi32>
    %693 = arith.sitofp %692 : vector<1x24xi32> to vector<1x24xf32>
    %694 = vector.broadcast %9 : vector<1x24xi32> to vector<24x24xi32>
    %695 = vector.broadcast %10 : vector<24x1xi32> to vector<24x24xi32>
    %696 = arith.cmpi eq, %694, %695 : vector<24x24xi32>
    %cst_185 = arith.constant 0.000000e+00 : f32
    %697 = vector.shape_cast %693 : vector<1x24xf32> to vector<1x24xf32>
    %698 = vector.broadcast %697 : vector<1x24xf32> to vector<24x24xf32>
    %699 = vector.broadcast %cst_185 : f32 to vector<24x24xf32>
    %700 = arith.select %696, %698, %699 : vector<24x24xi1>, vector<24x24xf32>
    %cst_186 = arith.constant dense<0.000000e+00> : vector<24xf32>
    %701 = vector.multi_reduction <add>, %700, %cst_186 [1] : vector<24x24xf32> to vector<24xf32>
    %702 = vector.shape_cast %701 : vector<24xf32> to vector<24x1xf32>
    %703 = vector.broadcast %5 : vector<1x32xf32> to vector<24x32xf32>
    %704 = vector.broadcast %702 : vector<24x1xf32> to vector<24x32xf32>
    %705 = arith.cmpf oeq, %703, %704 : vector<24x32xf32>
    %706 = arith.extui %705 : vector<24x32xi1> to vector<24x32xi32>
    %707 = arith.sitofp %706 : vector<24x32xi32> to vector<24x32xf32>
    %708 = arith.truncf %707 : vector<24x32xf32> to vector<24x32xbf16>
    %709 = vector.broadcast %8 : vector<32x1xi32> to vector<32x24xi32>
    %710 = vector.broadcast %692 : vector<1x24xi32> to vector<32x24xi32>
    %711 = arith.cmpi eq, %709, %710 : vector<32x24xi32>
    %712 = arith.extui %711 : vector<32x24xi1> to vector<32x24xi32>
    %713 = arith.sitofp %712 : vector<32x24xi32> to vector<32x24xf32>
    %cst_187 = arith.constant dense<0.000000e+00> : vector<24x32xf32>
    %714 = tpu.matmul %708, %685, %cst_187 {dimension_numbers = #tpu.dot_dimension_numbers<[1], [0], [0], [1], [0, 0, 1, 1], [], []>} : vector<24x32xbf16>, vector<32x32xbf16>, vector<24x32xf32> -> vector<24x32xf32>
    %715 = arith.truncf %714 : vector<24x32xf32> to vector<24x32xbf16>
    "tpu.trace_start"() <{level = 10 : i32, message = "ud,kd->uk"}> : () -> ()
    %cst_188 = arith.constant dense<0.000000e+00> : vector<24x32xf32>
    %716 = tpu.matmul %715, %688, %cst_188 {dimension_numbers = #tpu.dot_dimension_numbers<[1], [1], [0], [0], [0, 0, 1, 0], [], []>} : vector<24x32xbf16>, vector<32x32xbf16>, vector<24x32xf32> -> vector<24x32xf32>
    "tpu.trace_stop"() : () -> ()
    %cst_189 = arith.constant 0.176776692 : f32
    %717 = vector.broadcast %cst_189 : f32 to vector<24x32xf32>
    %718 = arith.mulf %716, %717 : vector<24x32xf32>
    %719 = vector.broadcast %7 : vector<1x32xf32> to vector<24x32xf32>
    %720 = vector.broadcast %702 : vector<24x1xf32> to vector<24x32xf32>
    %721 = arith.cmpf ole, %719, %720 : vector<24x32xf32>
    %cst_190 = arith.constant -1.000000e+30 : f32
    %722 = vector.broadcast %cst_190 : f32 to vector<24x32xf32>
    %723 = arith.select %721, %718, %722 : vector<24x32xi1>, vector<24x32xf32>
    %cst_191 = arith.constant dense<0.000000e+00> : vector<32x32xf32>
    %724 = tpu.matmul %19, %691, %cst_191 {dimension_numbers = #tpu.dot_dimension_numbers<[1], [0], [0], [1], [0, 0, 1, 1], [], []>} : vector<32x32xbf16>, vector<32x32xbf16>, vector<32x32xf32> -> vector<32x32xf32>
    %cst_192 = arith.constant dense<0xFF800000> : vector<24xf32>
    %725 = vector.multi_reduction <maximumf>, %723, %cst_192 [1] : vector<24x32xf32> to vector<24xf32>
    %726 = vector.shape_cast %725 : vector<24xf32> to vector<24x1xf32>
    %727 = vector.broadcast %726 : vector<24x1xf32> to vector<24x32xf32>
    %728 = arith.subf %723, %727 : vector<24x32xf32>
    %729 = math.exp %728 : vector<24x32xf32>
    %cst_193 = arith.constant dense<0.000000e+00> : vector<24xf32>
    %730 = vector.multi_reduction <add>, %729, %cst_193 [1] : vector<24x32xf32> to vector<24xf32>
    %731 = vector.shape_cast %730 : vector<24xf32> to vector<24x1xf32>
    %732 = tpu.reciprocal %731 {approx = true} : vector<24x1xf32> -> vector<24x1xf32>
    %733 = vector.broadcast %732 : vector<24x1xf32> to vector<24x32xf32>
    %734 = arith.mulf %729, %733 : vector<24x32xf32>
    %735 = arith.truncf %734 : vector<24x32xf32> to vector<24x32xbf16>
    %cst_194 = arith.constant dense<0.000000e+00> : vector<24x32xf32>
    %736 = tpu.matmul %735, %691, %cst_194 {dimension_numbers = #tpu.dot_dimension_numbers<[1], [0], [0], [1], [0, 0, 1, 1], [], []>} : vector<24x32xbf16>, vector<32x32xbf16>, vector<24x32xf32> -> vector<24x32xf32>
    %cst_195 = arith.constant dense<0.000000e+00> : vector<32x32xf32>
    %737 = tpu.matmul %713, %736, %cst_195 {dimension_numbers = #tpu.dot_dimension_numbers<[1], [0], [0], [1], [0, 0, 1, 1], [], []>} : vector<32x24xf32>, vector<24x32xf32>, vector<32x32xf32> -> vector<32x32xf32>
    %cst_196 = arith.constant dense<0.000000e+00> : vector<32xf32>
    %738 = vector.multi_reduction <add>, %713, %cst_196 [1] : vector<32x24xf32> to vector<32xf32>
    %739 = vector.shape_cast %738 : vector<32xf32> to vector<32x1xf32>
    %cst_197 = arith.constant 0.000000e+00 : f32
    %740 = vector.broadcast %cst_197 : f32 to vector<32x1xf32>
    %741 = arith.cmpf ogt, %739, %740 : vector<32x1xf32>
    %742 = vector.shape_cast %741 : vector<32x1xi1> to vector<32x1xi1>
    %743 = vector.broadcast %742 : vector<32x1xi1> to vector<32x32xi1>
    %744 = arith.select %743, %737, %724 : vector<32x32xi1>, vector<32x32xf32>
    %c0_198 = arith.constant 0 : index
    %c0_199 = arith.constant 0 : index
    %c64_200 = arith.constant 64 : index
    %745 = vector.load %arg5[%c0_198, %c0_199, %c64_200] : memref<1x32x128xf32, #tpu.memory_space<vmem>>, vector<1x32x32xf32>
    %746 = vector.shape_cast %745 : vector<1x32x32xf32> to vector<32x32xf32>
    %747 = vector.shape_cast %744 : vector<32x32xf32> to vector<1x32x32xf32>
    tpu.vector_store %arg5[%c0_198, %c0_199, %c64_200], %747 {strides = array<i32>} : memref<1x32x128xf32, #tpu.memory_space<vmem>>, vector<1x32x32xf32>,
    %c0_201 = arith.constant 0 : index
    %c0_202 = arith.constant 0 : index
    %c96_203 = arith.constant 96 : index
    %748 = vector.load %arg1[%c0_201, %c0_202, %c96_203] : memref<1x32x128xf32, #tpu.memory_space<vmem>>, vector<1x32x32xf32>
    %749 = vector.shape_cast %748 : vector<1x32x32xf32> to vector<32x32xf32>
    %750 = arith.truncf %749 : vector<32x32xf32> to vector<32x32xbf16>
    %c0_204 = arith.constant 0 : index
    %c0_205 = arith.constant 0 : index
    %c96_206 = arith.constant 96 : index
    %751 = vector.load %arg2[%c0_204, %c0_205, %c96_206] : memref<1x32x128xf32, #tpu.memory_space<vmem>>, vector<1x32x32xf32>
    %752 = vector.shape_cast %751 : vector<1x32x32xf32> to vector<32x32xf32>
    %753 = arith.truncf %752 : vector<32x32xf32> to vector<32x32xbf16>
    %c0_207 = arith.constant 0 : index
    %c0_208 = arith.constant 0 : index
    %c96_209 = arith.constant 96 : index
    %754 = vector.load %arg3[%c0_207, %c0_208, %c96_209] : memref<1x32x128xf32, #tpu.memory_space<vmem>>, vector<1x32x32xf32>
    %755 = vector.shape_cast %754 : vector<1x32x32xf32> to vector<32x32xf32>
    %756 = arith.truncf %755 : vector<32x32xf32> to vector<32x32xbf16>
    %757 = vector.extract_strided_slice %552 {offsets = [3, 0], sizes = [1, 24], strides = [1, 1]} : vector<4x24xi32> to vector<1x24xi32>
    %758 = arith.sitofp %757 : vector<1x24xi32> to vector<1x24xf32>
    %759 = vector.broadcast %9 : vector<1x24xi32> to vector<24x24xi32>
    %760 = vector.broadcast %10 : vector<24x1xi32> to vector<24x24xi32>
    %761 = arith.cmpi eq, %759, %760 : vector<24x24xi32>
    %cst_210 = arith.constant 0.000000e+00 : f32
    %762 = vector.shape_cast %758 : vector<1x24xf32> to vector<1x24xf32>
    %763 = vector.broadcast %762 : vector<1x24xf32> to vector<24x24xf32>
    %764 = vector.broadcast %cst_210 : f32 to vector<24x24xf32>
    %765 = arith.select %761, %763, %764 : vector<24x24xi1>, vector<24x24xf32>
    %cst_211 = arith.constant dense<0.000000e+00> : vector<24xf32>
    %766 = vector.multi_reduction <add>, %765, %cst_211 [1] : vector<24x24xf32> to vector<24xf32>
    %767 = vector.shape_cast %766 : vector<24xf32> to vector<24x1xf32>
    %768 = vector.broadcast %5 : vector<1x32xf32> to vector<24x32xf32>
    %769 = vector.broadcast %767 : vector<24x1xf32> to vector<24x32xf32>
    %770 = arith.cmpf oeq, %768, %769 : vector<24x32xf32>
    %771 = arith.extui %770 : vector<24x32xi1> to vector<24x32xi32>
    %772 = arith.sitofp %771 : vector<24x32xi32> to vector<24x32xf32>
    %773 = arith.truncf %772 : vector<24x32xf32> to vector<24x32xbf16>
    %774 = vector.broadcast %8 : vector<32x1xi32> to vector<32x24xi32>
    %775 = vector.broadcast %757 : vector<1x24xi32> to vector<32x24xi32>
    %776 = arith.cmpi eq, %774, %775 : vector<32x24xi32>
    %777 = arith.extui %776 : vector<32x24xi1> to vector<32x24xi32>
    %778 = arith.sitofp %777 : vector<32x24xi32> to vector<32x24xf32>
    %cst_212 = arith.constant dense<0.000000e+00> : vector<24x32xf32>
    %779 = tpu.matmul %773, %750, %cst_212 {dimension_numbers = #tpu.dot_dimension_numbers<[1], [0], [0], [1], [0, 0, 1, 1], [], []>} : vector<24x32xbf16>, vector<32x32xbf16>, vector<24x32xf32> -> vector<24x32xf32>
    %780 = arith.truncf %779 : vector<24x32xf32> to vector<24x32xbf16>
    "tpu.trace_start"() <{level = 10 : i32, message = "ud,kd->uk"}> : () -> ()
    %cst_213 = arith.constant dense<0.000000e+00> : vector<24x32xf32>
    %781 = tpu.matmul %780, %753, %cst_213 {dimension_numbers = #tpu.dot_dimension_numbers<[1], [1], [0], [0], [0, 0, 1, 0], [], []>} : vector<24x32xbf16>, vector<32x32xbf16>, vector<24x32xf32> -> vector<24x32xf32>
    "tpu.trace_stop"() : () -> ()
    %cst_214 = arith.constant 0.176776692 : f32
    %782 = vector.broadcast %cst_214 : f32 to vector<24x32xf32>
    %783 = arith.mulf %781, %782 : vector<24x32xf32>
    %784 = vector.broadcast %7 : vector<1x32xf32> to vector<24x32xf32>
    %785 = vector.broadcast %767 : vector<24x1xf32> to vector<24x32xf32>
    %786 = arith.cmpf ole, %784, %785 : vector<24x32xf32>
    %cst_215 = arith.constant -1.000000e+30 : f32
    %787 = vector.broadcast %cst_215 : f32 to vector<24x32xf32>
    %788 = arith.select %786, %783, %787 : vector<24x32xi1>, vector<24x32xf32>
    %cst_216 = arith.constant dense<0.000000e+00> : vector<32x32xf32>
    %789 = tpu.matmul %19, %756, %cst_216 {dimension_numbers = #tpu.dot_dimension_numbers<[1], [0], [0], [1], [0, 0, 1, 1], [], []>} : vector<32x32xbf16>, vector<32x32xbf16>, vector<32x32xf32> -> vector<32x32xf32>
    %cst_217 = arith.constant dense<0xFF800000> : vector<24xf32>
    %790 = vector.multi_reduction <maximumf>, %788, %cst_217 [1] : vector<24x32xf32> to vector<24xf32>
    %791 = vector.shape_cast %790 : vector<24xf32> to vector<24x1xf32>
    %792 = vector.broadcast %791 : vector<24x1xf32> to vector<24x32xf32>
    %793 = arith.subf %788, %792 : vector<24x32xf32>
    %794 = math.exp %793 : vector<24x32xf32>
    %cst_218 = arith.constant dense<0.000000e+00> : vector<24xf32>
    %795 = vector.multi_reduction <add>, %794, %cst_218 [1] : vector<24x32xf32> to vector<24xf32>
    %796 = vector.shape_cast %795 : vector<24xf32> to vector<24x1xf32>
    %797 = tpu.reciprocal %796 {approx = true} : vector<24x1xf32> -> vector<24x1xf32>
    %798 = vector.broadcast %797 : vector<24x1xf32> to vector<24x32xf32>
    %799 = arith.mulf %794, %798 : vector<24x32xf32>
    %800 = arith.truncf %799 : vector<24x32xf32> to vector<24x32xbf16>
    %cst_219 = arith.constant dense<0.000000e+00> : vector<24x32xf32>
    %801 = tpu.matmul %800, %756, %cst_219 {dimension_numbers = #tpu.dot_dimension_numbers<[1], [0], [0], [1], [0, 0, 1, 1], [], []>} : vector<24x32xbf16>, vector<32x32xbf16>, vector<24x32xf32> -> vector<24x32xf32>
    %cst_220 = arith.constant dense<0.000000e+00> : vector<32x32xf32>
    %802 = tpu.matmul %778, %801, %cst_220 {dimension_numbers = #tpu.dot_dimension_numbers<[1], [0], [0], [1], [0, 0, 1, 1], [], []>} : vector<32x24xf32>, vector<24x32xf32>, vector<32x32xf32> -> vector<32x32xf32>
    %cst_221 = arith.constant dense<0.000000e+00> : vector<32xf32>
    %803 = vector.multi_reduction <add>, %778, %cst_221 [1] : vector<32x24xf32> to vector<32xf32>
    %804 = vector.shape_cast %803 : vector<32xf32> to vector<32x1xf32>
    %cst_222 = arith.constant 0.000000e+00 : f32
    %805 = vector.broadcast %cst_222 : f32 to vector<32x1xf32>
    %806 = arith.cmpf ogt, %804, %805 : vector<32x1xf32>
    %807 = vector.shape_cast %806 : vector<32x1xi1> to vector<32x1xi1>
    %808 = vector.broadcast %807 : vector<32x1xi1> to vector<32x32xi1>
    %809 = arith.select %808, %802, %789 : vector<32x32xi1>, vector<32x32xf32>
    %c0_223 = arith.constant 0 : index
    %c0_224 = arith.constant 0 : index
    %c96_225 = arith.constant 96 : index
    %810 = vector.load %arg5[%c0_223, %c0_224, %c96_225] : memref<1x32x128xf32, #tpu.memory_space<vmem>>, vector<1x32x32xf32>
    %811 = vector.shape_cast %810 : vector<1x32x32xf32> to vector<32x32xf32>
    %812 = vector.shape_cast %809 : vector<32x32xf32> to vector<1x32x32xf32>
    tpu.vector_store %arg5[%c0_223, %c0_224, %c96_225], %812 {strides = array<i32>} : memref<1x32x128xf32, #tpu.memory_space<vmem>>, vector<1x32x32xf32>,
    return
  }
  func.func @transform_0(%arg0: i32) -> (i32, i32, i32) {
    %c0_i32 = arith.constant 0 : i32
    %c0_i32_0 = arith.constant 0 : i32
    %c0_i32_1 = arith.constant 0 : i32
    return %arg0, %c0_i32, %c0_i32_0 : i32, i32, i32
  }
  func.func @transform_1(%arg0: i32) -> (i32, i32, i32) {
    %c0_i32 = arith.constant 0 : i32
    %c0_i32_0 = arith.constant 0 : i32
    %c0_i32_1 = arith.constant 0 : i32
    return %arg0, %c0_i32, %c0_i32_0 : i32, i32, i32
  }
  func.func @transform_2(%arg0: i32) -> (i32, i32, i32) {
    %c0_i32 = arith.constant 0 : i32
    %c0_i32_0 = arith.constant 0 : i32
    %c0_i32_1 = arith.constant 0 : i32
    return %arg0, %c0_i32, %c0_i32_0 : i32, i32, i32
  }
  func.func @transform_3(%arg0: i32) -> (i32, i32) {
    %c0_i32 = arith.constant 0 : i32
    %c0_i32_0 = arith.constant 0 : i32
    %c0_i32_1 = arith.constant 0 : i32
    return %c0_i32, %c0_i32_0 : i32, i32
  }
  func.func @transform_4(%arg0: i32) -> (i32, i32, i32) {
    %c0_i32 = arith.constant 0 : i32
    %c0_i32_0 = arith.constant 0 : i32
    %c0_i32_1 = arith.constant 0 : i32
    return %arg0, %c0_i32, %c0_i32_0 : i32, i32, i32
  }
}

</mosaic_0001>

<bundles_post_ra>
// kernel: tpu_custom_call.1
= control target key start
LH: loop header
LB: loop body
LE: loop exit
PB: predicated region body
PF: predicated region fallthrough
CT: control target
= control target key end

     0   :  { %s5445_s0 = inlined_call_operand.hbm [shape: f32[2,32,128], index: 0, kind: input, shape index: {}]   ;;  %s5446_s1 = inlined_call_operand.hbm [shape: f32[2,32,128], index: 1, kind: input, shape index: {}]   ;;  %s5447_s2 = inlined_call_operand.hbm [shape: f32[2,32,128], index: 2, kind: input, shape index: {}]   ;;  %s5448_s3 = inlined_call_operand.hbm [shape: bf16[32,32], index: 3, kind: input, shape index: {}]   ;;  %s5449_s4 = inlined_call_operand.hbm [shape: f32[2,32,128], index: 4, kind: output, shape index: {}]  }
   0x1   :  { %5469 = sst [smem:[#allocation20_spill]] %s5446_s1 }
   0x2   :  { %9 = vsyncpa [#allocation3], 0 }
   0x3   :  { %11 = vsyncpa [#allocation3 + $0x1], 0 }
   0x4   :  { %12 = vsyncpa [#allocation6], 0 }
   0x5   :  { %14 = vsyncpa [#allocation6 + $0x1], 0 }
   0x6   :  { %15 = vsyncpa [#allocation9], 0 }
   0x7   :  { %16 = vsyncpa [#allocation4], 0 }
   0x8   :  { %18 = vsyncpa [#allocation4 + $0x1], 0  ;;  %s4263_s15 = smov 0   ;;  %s4265_s16 = smov 0  }
   0x9   :  { %s4267_s17 = smov 0   ;;  %s4269_s18 = smov 0  }
   0xa LB: > { %5470 = sst [smem:[#allocation15_spill]] %s4209_s15  ;;  %s4284_s19 = sadd.s32 1, %s4221_s18   ;;  %s4221_s18 = sphi %s4269_s18, %s5499_s18   ;;  %s4217_s17 = sphi %s4267_s17, %s5503_s17   ;;  %s4213_s16 = sphi %s4265_s16, %s5502_s16   ;;  %s4209_s15 = sphi %s4263_s15, %s5501_s15  }
   0xb   : > { %5471 = sst [smem:[#allocation16_spill]] %s4221_s18  ;;  %s31_s20 = sadd.s32 1, %s4217_s17 }
   0xc   : > { %5472 = sst [smem:[#allocation17_spill]] %s4284_s19  ;;  %s28_s21 = ssub.s32 %s4221_s18, %s4284_s19 }
   0xd   : > { %p5450_p0 = scmp.ne.s32.totalorder %s4217_s17, %s4213_s16  ;;  %p29_p1 = scmp.eq.s32.totalorder %s28_s21, 0 }
   0xe   : > { %p39_p2 = scmp.eq.s32.totalorder %s4221_s18, 0  ;;  %p3935_p4 = scmp.lt.s32.totalorder %s4221_s18, 2 }
   0xf   : > { %s4295_s22 = scalar_select %p29_p1, %s4217_s17, %s31_s20  }
  0x10   : > { %p40_p5 = por %p39_p2, %p5450_p0  ;;  %s5455_s23 = sand.u32 1, %s4217_s17  }
  0x11   : > { %5473 = sst [smem:[#allocation18_spill]] %s4295_s22  ;;  %s4303_s24 = sshll.u32 %s5455_s23, 5 }
  0x12   : > { %s4306_s25 = sshll.u32 %s4221_s18, 9  ;;  %p4308_p6 = pnand %p3935_p4, %p40_p5 }
  0x13   : > { %s201_s27 = sand.u32 1, %s4221_s18   ;;  %s5475_s1 = sld [smem:[#allocation20_spill]] }
  0x14   : > { %s5474_s26 = scalar_select %p4308_p6, 1, 0 }
  0x15   : > { %s205_s5 = scalar_lea.vmem [#allocation5], %s4303_s24  ;;  %s4322_s7 = scalar_lea.sflag [#allocation6], %s201_s27 }
  0x16   : > { %s212_s6 = sshll.u32 %s205_s5, 4  ;;  %p4328_p8 = pneg %p4308_p6  ;;  %s4320_s6 = int_to_ptr.vmem [resolvable:$true] %s212_s6 }
  0x18   : > { %s5476_s9 = scalar_select %p4328_p8, 1, 0 }
  0x19   : > { %s4317_s30 = scalar_lea.hbm %s5475_s1, %s4306_s25  ;;  %s4034_s12 = scalar_lea.hbm %s5475_s1, 1024 }
  0x1a   : > { %s4029_s8 = scalar_lea.hbm %s4317_s30, 512  ;;  %p4035_p11 = scmp.lt.u32.totalorder %s4317_s30, %s5475_s1 }
  0x1b   : > { %p4030_p7 = scmp.ne.s32.totalorder %s4317_s30, %s4029_s8  ;;  %p4036_p12 = scmp.lt.u32.totalorder %s4034_s12, %s4029_s8 }
  0x1c   : > { %p4038_p1 = scmp.lt.u32.totalorder %s4029_s8, %s4317_s30 }
  0x1d   : > { %p4032_p9 = pnand %p4328_p8, %p4030_p7  ;;  %p4037_p13 = por %p4036_p12, %p4035_p11 }
  0x1f   : > { %p4033_p10 = pneg %p4032_p9  ;;  %p4039_p2 = por %p4038_p1, %p4037_p13 }
  0x21   : > { %p4040_p4 = pnand %p4039_p2, %p4033_p10 }
  0x23   : > { %4043 = shalt.err (!%p4040_p4)
}
  0x24   : > { %s4044_s20 = scalar_lea.vmem %s4320_s6, 512  ;;  %s4223_s21 = smov [#allocation5]  }
  0x25   : > { %p4045_p5 = scmp.ne.s32.totalorder %s4320_s6, %s4044_s20  ;;  %s4049_s27 = sshll.u32 %s4223_s21, 4  ;;  %s4050_s27 = int_to_ptr.vmem [resolvable:$false] %s4049_s27 }
  0x26   : > { %s4051_s28 = scalar_lea.vmem %s4050_s27, 1024  ;;  %p4052_p3 = scmp.lt.s32.totalorder %s4320_s6, %s4050_s27 }
  0x27   : > { %p4047_p7 = pnand %p4045_p5, %p4328_p8  ;;  %p4053_p0 = scmp.lt.s32.totalorder %s4051_s28, %s4044_s20 }
  0x29   : > { %p4048_p9 = pneg %p4047_p7  ;;  %p4054_p11 = por %p4053_p0, %p4052_p3 }
  0x2b   : > { %p4055_p12 = pnand %p4054_p11, %p4048_p9 }
  0x2d   : > { %4058 = shalt.err (!%p4055_p12)
}
  0x2e   : > { %s5451_s29 = smov 128   ;;  %s5453_s5 = smov 8  }
  0x2f   : > { %3926 = dma.hbm_to_vmem [thread:$0]  (!%p4308_p6), %s4317_s30, 512, %s4320_s6, %s4322_s7, %s5451_s29, %s5451_s29, %s5453_s5  }
  0x30   : > { %s4356_s8 = sadd.s32 4294967295, %s4221_s18   ;;  %s3431_s10 = sadd.s32 4294967294, %s4221_s18  }
  0x31   : > { %p44_p0 = scmp.ne.s32.totalorder %s4213_s16, %s4209_s15  ;;  %p5459_p3 = scmp.eq.s32.totalorder %s4356_s8, 0 }
  0x32   : > { %p141_p10 = scmp.eq.s32.totalorder %s4356_s8, 1  ;;  %p147_p13 = scmp.eq.s32.totalorder %s3431_s10, 1 }
  0x33   : > { %p4365_p1 = por %p5459_p3, %p44_p0  ;;  %p3432_p2 = scmp.ge.s32.totalorder %s4221_s18, 1 }
  0x34   : > { %p5478_p4 = scmp.ne.s32.totalorder %s4217_s17, %s4213_s16  ;;  %p4377_p7 = por %p147_p13, %p44_p0 }
  0x35   : > { %s5477_s11 = scalar_select %p4365_p1, 1, 0 }
  0x36   : > { %p4373_p5 = por %p141_p10, %p5478_p4  ;;  %p154_p9 = scmp.lt.s32.totalorder %s4221_s18, 3 }
  0x37   : > { %s5480_s6 = scalar_select %p4377_p7, 1, 0 }
  0x38   : > { %s5479_s30 = scalar_select %p4373_p5, 1, 0 }
  0x39   : > { %5481 = sst [smem:[#allocation19_spill]] %s5480_s6  ;;  %p4382_p11 = pnand %p3432_p2, %p154_p9 }
  0x3a   : > { %s4226_s13 = smov [#allocation8]   ;;  %s4394_s27 = scalar_lea.hbm %s5445_s0, %s4306_s25 }
  0x3b   : > { %s5482_s12 = scalar_select %p4382_p11, 1, 0 }
  0x3c   : > { %s166_s14 = sshll.u32 %s4226_s13, 4  ;;  %p3916_p12 = pneg %p4382_p11  ;;  %s4386_s14 = int_to_ptr.vmem [resolvable:$true] %s166_s14 }
  0x3d   : > { %s184_s10 = scalar_lea.vmem [#allocation2], %s4303_s24  ;;  %s4409_s23 = scalar_lea.hbm %s5447_s2, %s4306_s25 }
  0x3e   : > { %p4398_p0 = pnand %p3916_p12, %p5459_p3  ;;  %s191_s29 = sshll.u32 %s184_s10, 4  ;;  %s4403_s29 = int_to_ptr.vmem [resolvable:$true] %s191_s29 }
  0x3f   : > { %s4059_s20 = scalar_lea.hbm %s5448_s3, 256 }
  0x40   : > { %p4060_p10 = scmp.ne.s32.totalorder %s5448_s3, %s4059_s20  ;;  %p4061_p13 = pneg %p4398_p0 }
  0x41   : > { %p4066_p9 = scmp.lt.u32.totalorder %s4059_s20, %s5448_s3 }
  0x42   : > { %p4062_p2 = pnand %p4061_p13, %p4060_p10 }
  0x44   : > { %p4063_p4 = pneg %p4062_p2 }
  0x46   : > { %p4068_p12 = pnand %p4066_p9, %p4063_p4 }
  0x48   : > { %4071 = shalt.err (!%p4068_p12)
}
  0x49   : > { %s4072_s25 = scalar_lea.vmem %s4386_s14, 256  ;;  %p4080_p1 = scmp.lt.s32.totalorder %s4386_s14, %s4386_s14 }
  0x4a   : > { %p4073_p3 = scmp.ne.s32.totalorder %s4386_s14, %s4072_s25  ;;  %p4081_p11 = scmp.lt.s32.totalorder %s4072_s25, %s4072_s25 }
  0x4c   : > { %p4075_p7 = pnand %p4073_p3, %p4061_p13  ;;  %p4082_p6 = por %p4081_p11, %p4080_p1 }
  0x4e   : > { %p4076_p5 = pneg %p4075_p7 }
  0x50   : > { %p4083_p8 = pnand %p4082_p6, %p4076_p5 }
  0x52   : > { %4086 = shalt.err (!%p4083_p8)
}
  0x53   : > { %s4227_s1 = smov 64   ;;  %s4228_s18 = smov 4  }
  0x54   : > { %3919 = dma.hbm_to_vmem [thread:$0]  (!%p4398_p0), %s5448_s3, 256, %s4386_s14, [#allocation9], %s4227_s1, %s4227_s1, %s4228_s18  }
  0x55   : > { %s5484_s5 = sand.u32 1, %s4217_s17   ;;  %s4087_s20 = scalar_lea.hbm %s4394_s27, 512 }
  0x56   : > { %s4434_s13 = scalar_lea.sflag [#allocation3], %s5484_s5  ;;  %p4088_p6 = scmp.ne.s32.totalorder %s4394_s27, %s4087_s20 }
  0x57   : > { %p5485_p8 = scmp.ne.s32.totalorder %s5476_s9, 0  ;;  %s4092_s25 = scalar_lea.hbm %s5445_s0, 1024 }
  0x58   : > { %p4093_p5 = scmp.lt.u32.totalorder %s4394_s27, %s5445_s0  ;;  %p4094_p7 = scmp.lt.u32.totalorder %s4092_s25, %s4087_s20 }
  0x59   : > { %p4090_p3 = pnand %p4088_p6, %p5485_p8  ;;  %p4096_p10 = scmp.lt.u32.totalorder %s4087_s20, %s4394_s27 }
  0x5a   : > { %p4095_p11 = por %p4094_p7, %p4093_p5 }
  0x5b   : > { %p4091_p1 = pneg %p4090_p3 }
  0x5c   : > { %p4097_p0 = por %p4096_p10, %p4095_p11 }
  0x5e   : > { %p4098_p13 = pnand %p4097_p0, %p4091_p1 }
  0x60   : > { %4101 = shalt.err (!%p4098_p13)
}
  0x61   : > { %s4102_s14 = scalar_lea.vmem %s4403_s29, 512  ;;  %s4229_s28 = smov [#allocation2]  }
  0x62   : > { %p4103_p2 = scmp.ne.s32.totalorder %s4403_s29, %s4102_s14  ;;  %s4107_s1 = sshll.u32 %s4229_s28, 4  ;;  %s4108_s1 = int_to_ptr.vmem [resolvable:$false] %s4107_s1 }
  0x63   : > { %s4109_s15 = scalar_lea.vmem %s4108_s1, 1024  ;;  %p4110_p12 = scmp.lt.s32.totalorder %s4403_s29, %s4108_s1 }
  0x64   : > { %p4105_p4 = pnand %p4103_p2, %p5485_p8  ;;  %p4111_p6 = scmp.lt.s32.totalorder %s4109_s15, %s4102_s14 }
  0x66   : > { %p4106_p9 = pneg %p4105_p4  ;;  %p4112_p3 = por %p4111_p6, %p4110_p12 }
  0x68   : > { %p4113_p5 = pnand %p4112_p3, %p4106_p9 }
  0x6a   : > { %4116 = shalt.err (!%p4113_p5)
}
  0x6b   : > { %p5486_p1 = scmp.ne.s32.totalorder %s5474_s26, 0  ;;  %s5487_s6 = smov 8  }
  0x6c   : > { %s5488_s18 = smov 128   ;;  %s226_s19 = scalar_lea.vmem [#allocation7], %s4303_s24 }
  0x6d   : > { %3923 = dma.hbm_to_vmem [thread:$0]  (!%p5486_p1), %s4394_s27, 512, %s4403_s29, %s4434_s13, %s5488_s18, %s5488_s18, %s5487_s6  }
  0x6e   : > { %s233_s22 = sshll.u32 %s226_s19, 4  ;;  %s4117_s5 = scalar_lea.hbm %s4409_s23, 512  ;;  %s4462_s22 = int_to_ptr.vmem [resolvable:$true] %s233_s22 }
  0x6f   : > { %p4118_p7 = scmp.ne.s32.totalorder %s4409_s23, %s4117_s5  ;;  %s4122_s10 = scalar_lea.hbm %s5447_s2, 1024 }
  0x70   : > { %p4123_p0 = scmp.lt.u32.totalorder %s4409_s23, %s5447_s2  ;;  %p4124_p13 = scmp.lt.u32.totalorder %s4122_s10, %s4117_s5 }
  0x71   : > { %p4120_p11 = pnand %p4118_p7, %p5485_p8  ;;  %p4126_p4 = scmp.lt.u32.totalorder %s4117_s5, %s4409_s23 }
  0x72   : > { %p4125_p2 = por %p4124_p13, %p4123_p0 }
  0x73   : > { %p4121_p10 = pneg %p4120_p11 }
  0x74   : > { %p4127_p9 = por %p4126_p4, %p4125_p2 }
  0x76   : > { %p4128_p12 = pnand %p4127_p9, %p4121_p10 }
  0x78   : > { %4131 = shalt.err (!%p4128_p12)
}
  0x79   : > { %s4132_s24 = scalar_lea.vmem %s4462_s22, 512  ;;  %s4230_s29 = smov [#allocation7]  }
  0x7a   : > { %p4133_p6 = scmp.ne.s32.totalorder %s4462_s22, %s4132_s24  ;;  %s4137_s27 = sshll.u32 %s4230_s29, 4  ;;  %s4138_s27 = int_to_ptr.vmem [resolvable:$false] %s4137_s27 }
  0x7b   : > { %s4139_s13 = scalar_lea.vmem %s4138_s27, 1024  ;;  %p4140_p7 = scmp.lt.s32.totalorder %s4462_s22, %s4138_s27 }
  0x7c   : > { %p4135_p3 = pnand %p4133_p6, %p5485_p8  ;;  %p4141_p11 = scmp.lt.s32.totalorder %s4139_s13, %s4132_s24 }
  0x7e   : > { %p4136_p5 = pneg %p4135_p3  ;;  %p4142_p0 = por %p4141_p11, %p4140_p7 }
  0x80   : > { %p4143_p13 = pnand %p4142_p0, %p4136_p5 }
  0x82   : > { %4146 = shalt.err (!%p4143_p13)
}
  0x83   : > { %3929 = dma.hbm_to_vmem [thread:$0]  (!%p5486_p1), %s4409_s23, 512, %s4462_s22, %s4322_s7, %s5488_s18, %s5488_s18, %s5487_s6  }
  0x84   : > { %p5489_p8 = scmp.ne.s32.totalorder %s5482_s12, 0 }
  0x85   : > { %s4492_s9 = sand.u32 (!%p5489_p8), 1, %s4213_s16   ;;  %p5490_p10 = scmp.ne.s32.totalorder (!%p5489_p8), %s5477_s11, 0 }
  0x86   : > { %245 = sbr.rel (%p5489_p8) target bundleno = 13264 (0x33d0), region = 36  ;;  %s4495_s28 = sshll.u32 (!%p5489_p8), %s4492_s9, 5 }
  0x87   : > { %s248_s26 = scalar_lea.sflag (!%p5489_p8), [#allocation3], %s4492_s9  ;;  %s4499_s1 = scalar_lea.vmem (!%p5489_p8), [#allocation2], %s4495_s28 }
  0x8d   : > { %4192 = dma.done.wait (%p5490_p10), %s248_s26, 512  }
  0x8e   : > { %4194 = vsyncadd (%p5490_p10), %s248_s26, 4294966784  ;;  %s256_s23 = sand.u32 1, %s4356_s8   ;;  %s4507_s12 = scalar_lea.vmem [#allocation5], %s4495_s28 }
  0x8f   : > { %s257_s7 = scalar_lea.sflag [#allocation6], %s256_s23 }
  0x90   : > { %4196 = dma.done.wait (%p5490_p10), %s257_s7, 1024  }
  0x91   : > { %4198 = vsyncadd (%p5490_p10), %s257_s7, 4294966272  ;;  %s4514_s15 = scalar_lea.vmem [#allocation7], %s4495_s28  ;;  %p5491_p1 = scmp.eq.s32.totalorder %s4356_s8, 0 }
  0x93   : > { %4200 = dma.done.wait (%p5491_p1), [#allocation9], 256   ;;  %p5492_p2 = pmov %p5491_p1 }
  0x94   : > { %v457_v0 = vld [vmem:[%s4499_s1] sm:$0xff]  ;;  %v458_v1 = vld [vmem:[%s4499_s1 + $0x8] sm:$0xff]  ;;  %v459_v2 = vld [vmem:[%s4499_s1 + $0x10] sm:$0xff]  ;;  %vm355_vm0 = vcmask 261120   ;;  %s4231_s11 = smov 96   ;;  %s4232_s6 = smov 64  }
  0x95   : > { %4202 = vsyncadd (%p5492_p2), [#allocation9], 4294967040  ;;  %v461_v3 = vpack.c.bf16 %v458_v1, %v457_v0  ;;  %v460_v4 = vld [vmem:[%s4499_s1 + $0x18] sm:$0xff]  ;;  %v463_v5 = vld [vmem:[%s4507_s12] sm:$0xff]  ;;  %s4233_s18 = smov 32   ;;  %vm832_vm9 = vcmask 257024  }
  0x96   : > { %v464_v6 = vld [vmem:[%s4507_s12 + $0x8] sm:$0xff]  ;;  %v462_v8 = vpack.c.bf16 %v460_v4, %v459_v2  ;;  %v465_v10 = vld [vmem:[%s4507_s12 + $0x10] sm:$0xff]  ;;  %v466_v11 = vld [vmem:[%s4507_s12 + $0x18] sm:$0xff]  ;;  %s5354_s19 = scalar_lea.vmem [#allocation10], %s4495_s28  ;;  %s3546_s22 = sshll.u32 %s4356_s8, 9 }
  0x97   : > { %v467_v7 = vpack.c.bf16 %v464_v6, %v463_v5  ;;  %477 = vrot.lane.b32.xlu0 %v461_v3, %s4231_s11  ;;  %602 = vrot.lane.b32.xlu1 %v461_v3, %s4232_s6  ;;  %v363_v9 = vsel %vm355_vm0, %v461_v3, 0  ;;  %v468_v12 = vpack.c.bf16 %v466_v11, %v465_v10  ;;  %v3555_v32 = vld [vmem:[#allocation8 + $0x8] sm:$0xff]   ;;  %v3548_v33 = vld [vmem:[#allocation8] sm:$0xff]   ;;  %s3305_s5 = sshll.u32 %s5354_s19, 4  ;;  %s5397_s10 = scalar_lea.hbm %s5449_s4, %s3546_s22  ;;  %s5399_s5 = int_to_ptr.vmem [resolvable:$true] %s3305_s5 }
  0x98   : > { %3888 = vmatprep.subr.msk.bf16.mxu0 %vm355_vm0, %v461_v3  ;;  %v366_v13 = vsel %vm355_vm0, %v462_v8, 0  ;;  %v4564_v34 = vunpack.c.l.bf16 %v3555_v32  ;;  %v4566_v35 = vunpack.c.h.bf16 %v3555_v32  ;;  %v4568_v36 = vunpack.c.l.bf16 %v3548_v33  ;;  %s3292_s25 = scalar_lea.sflag [#allocation4], %s4492_s9  ;;  %s4147_s8 = scalar_lea.vmem %s5399_s5, 512 }
  0x99   : > { %3668 = vmatprep.mubr.msk.bf16.mxu0 %vm355_vm0, %v467_v7  ;;  %3665 = vmatpush3.bf16.xpose.msra.mxu0 %v363_v9  ;;  %v4572_v37 = vunpack.c.h.bf16 %v3548_v33  ;;  %p4148_p4 = scmp.ne.s32.totalorder %s5399_s5, %s4147_s8  ;;  %p5493_p9 = scmp.ne.s32.totalorder %s5479_s30, 0 }
  0x9a   : > { %3889 = vmatprep.subr.msk.bf16.mxu0 %vm355_vm0, %v462_v8  ;;  %vm319_vm1 = vcmp.gt.f32.partialorder %v4564_v34, 0.0  ;;  %vm317_vm2 = vcmp.gt.f32.partialorder %v4568_v36, 0.0  ;;  %vm320_vm3 = vcmp.gt.f32.partialorder %v4566_v35, 0.0  ;;  %s4235_s14 = smov [#allocation10]  }
  0x9b   : > { %479 = vrot.lane.b32.xlu0 %v462_v8, %s4231_s11  ;;  %471 = vrot.lane.b32.xlu1 %v467_v7, %s4231_s11  ;;  %vm318_vm4 = vcmp.gt.f32.partialorder %v4572_v37, 0.0  ;;  %p4149_p12 = pnand %p4148_p4, %p5493_p9  ;;  %s4151_s24 = sshll.u32 %s4235_s14, 4  ;;  %s4152_s24 = int_to_ptr.vmem [resolvable:$false] %s4151_s24 }
  0x9c   : > { %s4153_s29 = scalar_lea.vmem %s4152_s24, 1024  ;;  %p4154_p3 = scmp.lt.s32.totalorder %s5399_s5, %s4152_s24 }
  0x9d   : > { %p4150_p6 = pneg %p4149_p12  ;;  %p4155_p5 = scmp.lt.s32.totalorder %s4153_s29, %s4147_s8 }
  0x9f   : > { %727 = vrot.lane.b32.xlu0 %v461_v3, %s4233_s18  ;;  %473 = vrot.lane.b32.xlu1 %v468_v12, %s4231_s11  ;;  %p4156_p7 = por %p4155_p5, %p4154_p3 }
  0xa1   : > { %3667 = vmatpush3.bf16.xpose.msra.mxu0 %v366_v13  ;;  %p4157_p11 = pnand %p4156_p7, %p4150_p6 }
  0xa3   : > { %604 = vrot.lane.b32.xlu0 %v462_v8, %s4232_s6  ;;  %729 = vrot.lane.b32.xlu1 %v462_v8, %s4233_s18 }
  0xa7   : > { %596 = vrot.lane.b32.xlu0 %v467_v7, %s4232_s6  ;;  %598 = vrot.lane.b32.xlu1 %v468_v12, %s4232_s6 }
  0xa8   : > { %3669 = vmatmul.mubr.msk.bf16.vlgmr.msra.gmra.mrb[0].mxu0 %vm355_vm0, %v468_v12 }
  0xab   : > { %721 = vrot.lane.b32.xlu0 %v467_v7, %s4233_s18  ;;  %723 = vrot.lane.b32.xlu1 %v468_v12, %s4233_s18 }
 0x109   : > { %v478_v14 = vpop.permute.xlu0 %477  ;;  %v603_v15 = vpop.permute.xlu1 %602 }
 0x10a   : > { %3890 = vmatprep.subr.msk.bf16.mxu1 %vm355_vm0, %v478_v14  ;;  %v488_v16 = vsel %vm355_vm0, %v478_v14, 0  ;;  %3892 = vmatprep.subr.msk.bf16.mxu0 %vm355_vm0, %v603_v15  ;;  %v613_v17 = vsel %vm355_vm0, %v603_v15, 0 }
 0x10b   : > { %3673 = vmatpush3.bf16.xpose.msra.mxu1 %v488_v16  ;;  %3681 = vmatpush3.bf16.xpose.msra.mxu0 %v613_v17 }
 0x10d   : > { %v480_v18 = vpop.permute.xlu0 %479  ;;  %v472_v19 = vpop.permute.xlu1 %471 }
 0x10e   : > { %3891 = vmatprep.subr.msk.bf16.mxu1 %vm355_vm0, %v480_v18  ;;  %3676 = vmatprep.mubr.msk.bf16.mxu1 %vm355_vm0, %v472_v19  ;;  %v491_v20 = vsel %vm355_vm0, %v480_v18, 0 }
 0x111   : > { %v728_v21 = vpop.permute.xlu0 %727  ;;  %v474_v22 = vpop.permute.xlu1 %473 }
 0x112   : > { %v738_v26 = vsel %vm355_vm0, %v728_v21, 0 }
 0x113   : > { %3675 = vmatpush3.bf16.xpose.msra.mxu1 %v491_v20 }
 0x114   : > { %3894 = vmatprep.subr.msk.bf16.mxu1 %vm355_vm0, %v728_v21 }
 0x115   : > { %v605_v23 = vpop.permute.xlu0 %604  ;;  %v730_v24 = vpop.permute.xlu1 %729 }
 0x116   : > { %3893 = vmatprep.subr.msk.bf16.mxu0 %vm355_vm0, %v605_v23  ;;  %v616_v25 = vsel %vm355_vm0, %v605_v23, 0  ;;  %v741_v30 = vsel %vm355_vm0, %v730_v24, 0 }
 0x117   : > { %3683 = vmatpush3.bf16.xpose.msra.mxu0 %v616_v25 }
 0x119   : > { %v597_v27 = vpop.permute.xlu0 %596  ;;  %v599_v28 = vpop.permute.xlu1 %598 }
 0x11a   : > { %3677 = vmatmul.mubr.msk.bf16.vlgmr.msra.gmra.mrb[0].mxu1 %vm355_vm0, %v474_v22  ;;  %3684 = vmatprep.mubr.msk.bf16.mxu0 %vm355_vm0, %v597_v27 }
 0x11b   : > { %3689 = vmatpush3.bf16.xpose.msra.mxu1 %v738_v26 }
 0x11c   : > { %3895 = vmatprep.subr.msk.bf16.mxu1 %vm355_vm0, %v730_v24 }
 0x11d   : > { %v722_v29 = vpop.permute.xlu0 %721  ;;  %v724_v31 = vpop.permute.xlu1 %723 }
 0x11e   : > { %3685 = vmatmul.mubr.msk.bf16.vlgmr.msra.gmra.mrb[4].mxu0 %vm355_vm0, %v599_v28  ;;  %3692 = vmatprep.mubr.msk.bf16.mxu1 %vm355_vm0, %v722_v29 }
 0x123   : > { %3691 = vmatpush3.bf16.xpose.msra.mxu1 %v741_v30 }
 0x12a   : > { %3693 = vmatmul.mubr.msk.bf16.vlgmr.msra.gmra.mrb[4].mxu1 %vm355_vm0, %v724_v31 }
 0x17b   : > { %v3670_v38 = vpop.f32.mrb[0].mxu0 }
 0x17c   : > { %v419_v39 = vsel %vm319_vm1, %v3670_v38, -1e+30  ;;  %v402_v40 = vpop.f32.mrb[1].mxu0  ;;  %v436_v42 = vmul.f32 %v3670_v38, %v4564_v34 }
 0x17d   : > { %v423_v41 = vsel %vm355_vm0, %v419_v39, -inf  ;;  %v417_v43 = vsel %vm317_vm2, %v402_v40, -1e+30  ;;  %v434_v44 = vmul.f32 %v4568_v36, %v402_v40  ;;  %v3671_v45 = vpop.f32.mrb[2].mxu0 }
 0x17e   : > { %v421_v46 = vsel %vm355_vm0, %v417_v43, -inf  ;;  %v420_v47 = vsel %vm320_vm3, %v3671_v45, -1e+30  ;;  %v437_v48 = vmul.f32 %v3671_v45, %v4566_v35  ;;  %v405_v49 = vpop.f32.mrb[3].mxu0  ;;  %v441_v56 = vsel %vm355_vm0, %v436_v42, 0.0 }
 0x17f   : > { %v438_v50 = vsel %vm355_vm0, %v434_v44, 0.0  ;;  %v424_v51 = vsel %vm355_vm0, %v420_v47, -inf  ;;  %v418_v52 = vsel %vm318_vm4, %v405_v49, -1e+30  ;;  %v435_v53 = vmul.f32 %v4572_v37, %v405_v49 }
 0x180   : > { %v426_v54 = vmax.f32 %v423_v41, %v424_v51  ;;  %v422_v55 = vsel %vm355_vm0, %v418_v52, -inf  ;;  %v443_v60 = vsel %vm355_vm0, %v437_v48, 0.0 }
 0x181   : > { %v425_v57 = vmax.f32 %v421_v46, %v422_v55  ;;  %v439_v58 = vsel %vm355_vm0, %v435_v53, 0.0 }
 0x182   : > { %v440_v59 = vadd.f32 %v439_v58, %v438_v50 }
 0x183   : > { %v427_v61 = vmax.f32 %v425_v57, %v426_v54 }
 0x184   : > { %v442_v62 = vadd.f32 %v441_v56, %v440_v59 }
 0x185   : > { %v428_v63 = vrot.slane %v427_v61, 4 }
 0x186   : > { %v444_v0 = vadd.f32 %v443_v60, %v442_v62 }
 0x187   : > { %v429_v1 = vmax.f32 %v427_v61, %v428_v63 }
 0x188   : > { %v445_v2 = vrot.slane %v444_v0, 4 }
 0x189   : > { %v430_v3 = vrot.slane %v429_v1, 2 }
 0x18a   : > { %v446_v4 = vadd.f32 %v445_v2, %v444_v0 }
 0x18b   : > { %v431_v5 = vmax.f32 %v429_v1, %v430_v3 }
 0x18c   : > { %v447_v6 = vrot.slane %v446_v4, 2 }
 0x18d   : > { %v432_v7 = vrot.slane %v431_v5, 1 }
 0x18e   : > { %v448_v8 = vadd.f32 %v447_v6, %v446_v4 }
 0x18f   : > { %v4596_v10 = vmax.f32 %v431_v5, %v432_v7 }
 0x190   : > { %v449_v9 = vrot.slane %v448_v8, 1 }
 0x192   : > { %v450_v11 = vadd.f32 %v449_v9, %v448_v8 }
 0x194   : > { %v4598_v12 = vmul.f32 0.03125, %v450_v11  ;;  %v321_v11 = vlaneseq }
 0x196   : > { %v452_v13 = vsub.f32 %v4596_v10, %v4598_v12 }
 0x1ed   : > { %v3678_v14 = vpop.f32.mrb[0].mxu1 }
 0x1ee   : > { %v544_v15 = vsel %vm319_vm1, %v3678_v14, -1e+30  ;;  %v561_v16 = vmul.f32 %v3678_v14, %v4564_v34  ;;  %v527_v17 = vpop.f32.mrb[1].mxu1 }
 0x1ef   : > { %v548_v18 = vsel %vm355_vm0, %v544_v15, -inf  ;;  %v542_v19 = vsel %vm317_vm2, %v527_v17, -1e+30  ;;  %v559_v20 = vmul.f32 %v4568_v36, %v527_v17  ;;  %v3679_v21 = vpop.f32.mrb[2].mxu1 }
 0x1f0   : > { %v566_v22 = vsel %vm355_vm0, %v561_v16, 0.0  ;;  %v545_v23 = vsel %vm320_vm3, %v3679_v21, -1e+30  ;;  %v530_v24 = vpop.f32.mrb[3].mxu1  ;;  %v562_v26 = vmul.f32 %v3679_v21, %v4566_v35  ;;  %v546_v30 = vsel %vm355_vm0, %v542_v19, -inf }
 0x1f1   : > { %v549_v25 = vsel %vm355_vm0, %v545_v23, -inf  ;;  %v543_v27 = vsel %vm318_vm4, %v530_v24, -1e+30  ;;  %v560_v28 = vmul.f32 %v4572_v37, %v530_v24  ;;  %v3686_v29 = vpop.f32.mrb[4].mxu0  ;;  %v563_v39 = vsel %vm355_vm0, %v559_v20, 0.0 }
 0x1f2   : > { %v551_v31 = vmax.f32 %v548_v18, %v549_v25  ;;  %v547_v32 = vsel %vm355_vm0, %v543_v27, -inf  ;;  %v669_v33 = vsel %vm319_vm1, %v3686_v29, -1e+30  ;;  %v652_v38 = vpop.f32.mrb[5].mxu0  ;;  %v568_v49 = vsel %vm355_vm0, %v562_v26, 0.0 }
 0x1f3   : > { %v550_v40 = vmax.f32 %v546_v30, %v547_v32  ;;  %v564_v41 = vsel %vm355_vm0, %v560_v28, 0.0  ;;  %v673_v42 = vsel %vm355_vm0, %v669_v33, -inf  ;;  %v3687_v43 = vpop.f32.mrb[6].mxu0  ;;  %v667_v45 = vsel %vm317_vm2, %v652_v38, -1e+30 }
 0x1f4   : > { %v565_v44 = vadd.f32 %v564_v41, %v563_v39  ;;  %v684_v46 = vmul.f32 %v4568_v36, %v652_v38  ;;  %v670_v47 = vsel %vm320_vm3, %v3687_v43, -1e+30  ;;  %v655_v48 = vpop.f32.mrb[7].mxu0  ;;  %v686_v51 = vmul.f32 %v3686_v29, %v4564_v34 }
 0x1f5   : > { %v552_v50 = vmax.f32 %v550_v40, %v551_v31  ;;  %v674_v52 = vsel %vm355_vm0, %v670_v47, -inf  ;;  %v671_v54 = vsel %vm355_vm0, %v667_v45, -inf  ;;  %v687_v58 = vmul.f32 %v3687_v43, %v4566_v35 }
 0x1f6   : > { %v567_v53 = vadd.f32 %v566_v22, %v565_v44  ;;  %v688_v55 = vsel %vm355_vm0, %v684_v46, 0.0  ;;  %v676_v56 = vmax.f32 %v673_v42, %v674_v52  ;;  %v668_v59 = vsel %vm318_vm4, %v655_v48, -1e+30 }
 0x1f7   : > { %v553_v57 = vrot.slane %v552_v50, 4  ;;  %v685_v60 = vmul.f32 %v4572_v37, %v655_v48  ;;  %v672_v62 = vsel %vm355_vm0, %v668_v59, -inf  ;;  %v691_v0 = vsel %vm355_vm0, %v686_v51, 0.0 }
 0x1f8   : > { %v569_v61 = vadd.f32 %v568_v49, %v567_v53  ;;  %v675_v1 = vmax.f32 %v671_v54, %v672_v62  ;;  %v693_v6 = vsel %vm355_vm0, %v687_v58, 0.0  ;;  %v4647_v27 = vshrl.u32 %v321_v11, 7 }
 0x1f9   : > { %v554_v63 = vmax.f32 %v552_v50, %v553_v57  ;;  %v689_v2 = vsel %vm355_vm0, %v685_v60, 0.0 }
 0x1fa   : > { %v570_v3 = vrot.slane %v569_v61, 4  ;;  %v690_v4 = vadd.f32 %v689_v2, %v688_v55  ;;  %v677_v7 = vmax.f32 %v675_v1, %v676_v56  ;;  %vm453_vm5 = vcmp.eq.s32.totalorder %v4647_v27, 0 }
 0x1fb   : > { %v555_v5 = vrot.slane %v554_v63, 2  ;;  %vm578_vm6 = vcmp.eq.s32.totalorder %v4647_v27, 1  ;;  %vm703_vm7 = vcmp.eq.s32.totalorder %v4647_v27, 2  ;;  %vm828_vm8 = vcmp.eq.s32.totalorder %v4647_v27, 3 }
 0x1fc   : > { %v571_v8 = vadd.f32 %v570_v3, %v569_v61  ;;  %v692_v9 = vadd.f32 %v691_v0, %v690_v4  ;;  %v678_v14 = vrot.slane %v677_v7, 4 }
 0x1fd   : > { %v3694_v15 = vpop.f32.mrb[4].mxu1  ;;  %v556_v20 = vmax.f32 %v554_v63, %v555_v5 }
 0x1fe   : > { %v572_v16 = vrot.slane %v571_v8, 2  ;;  %v694_v17 = vadd.f32 %v693_v6, %v692_v9  ;;  %v794_v18 = vsel %vm319_vm1, %v3694_v15, -1e+30  ;;  %v777_v19 = vpop.f32.mrb[5].mxu1  ;;  %v679_v21 = vmax.f32 %v677_v7, %v678_v14 }
 0x1ff   : > { %v3695_v22 = vpop.f32.mrb[6].mxu1  ;;  %v792_v25 = vsel %vm317_vm2, %v777_v19, -1e+30  ;;  %v798_v29 = vsel %vm355_vm0, %v794_v18, -inf  ;;  %v811_v30 = vmul.f32 %v3694_v15, %v4564_v34  ;;  %v809_v38 = vmul.f32 %v4568_v36, %v777_v19 }
 0x200   : > { %v573_v23 = vadd.f32 %v572_v16, %v571_v8  ;;  %v695_v24 = vrot.slane %v694_v17, 4  ;;  %v780_v26 = vpop.f32.mrb[7].mxu1  ;;  %v680_v28 = vrot.slane %v679_v21, 2  ;;  %v795_v31 = vsel %vm320_vm3, %v3695_v22, -1e+30 }
 0x201   : > { %v799_v39 = vsel %vm355_vm0, %v795_v31, -inf  ;;  %v557_v40 = vrot.slane %v556_v20, 1  ;;  %v796_v41 = vsel %vm355_vm0, %v792_v25, -inf  ;;  %v793_v43 = vsel %vm318_vm4, %v780_v26, -1e+30 }
 0x202   : > { %v574_v32 = vrot.slane %v573_v23, 1  ;;  %v696_v33 = vadd.f32 %v695_v24, %v694_v17  ;;  %v801_v42 = vmax.f32 %v798_v29, %v799_v39  ;;  %v681_v44 = vmax.f32 %v679_v21, %v680_v28 }
 0x203   : > { %v797_v34 = vsel %vm355_vm0, %v793_v43, -inf  ;;  %v810_v46 = vmul.f32 %v4572_v37, %v780_v26  ;;  %v813_v49 = vsel %vm355_vm0, %v809_v38, 0.0  ;;  %v812_v50 = vmul.f32 %v3695_v22, %v4566_v35 }
 0x204   : > { %v697_v45 = vrot.slane %v696_v33, 2  ;;  %v800_v47 = vmax.f32 %v796_v41, %v797_v34  ;;  %v575_v48 = vadd.f32 %v574_v32, %v573_v23  ;;  %v558_v52 = vmax.f32 %v556_v20, %v557_v40 }
 0x205   : > { %v814_v51 = vsel %vm355_vm0, %v810_v46, 0.0  ;;  %v682_v56 = vrot.slane %v681_v44, 1  ;;  %v816_v57 = vsel %vm355_vm0, %v811_v30, 0.0  ;;  %v818_v61 = vsel %vm355_vm0, %v812_v50, 0.0 }
 0x206   : > { %v698_v36 = vadd.f32 %v697_v45, %v696_v33  ;;  %v802_v53 = vmax.f32 %v800_v47, %v801_v42  ;;  %v815_v54 = vadd.f32 %v814_v51, %v813_v49  ;;  %v576_v55 = vmul.f32 0.03125, %v575_v48 }
 0x207   : > { %v456_v35 = vsel %vm453_vm5, %v452_v13, 0.0  ;;  %v683_v2 = vmax.f32 %v681_v44, %v682_v56  ;;  %v4676_v21 = vand.u32 127, %v321_v11 }
 0x208   : > { %v699_v37 = vrot.slane %v698_v36, 1  ;;  %v803_v58 = vrot.slane %v802_v53, 4  ;;  %v817_v59 = vadd.f32 %v816_v57, %v815_v54  ;;  %v577_v60 = vsub.f32 %v558_v52, %v576_v55 }
 0x209   : > { %vm853_vm15 = vcmp.eq.s32.totalorder %v4676_v21, 0  ;;  %vm879_vm1 = vcmp.eq.s32.totalorder %v4676_v21, 1  ;;  %vm905_vm5 = vcmp.eq.s32.totalorder %v4676_v21, 2 }
 0x20a   : > { %v700_v62 = vadd.f32 %v699_v37, %v698_v36  ;;  %v804_v63 = vmax.f32 %v802_v53, %v803_v58  ;;  %v819_v0 = vadd.f32 %v818_v61, %v817_v59  ;;  %v581_v1 = vsel %vm578_vm6, %v577_v60, %v456_v35 }
 0x20c   : > { %v701_v3 = vmul.f32 0.03125, %v700_v62  ;;  %v805_v4 = vrot.slane %v804_v63, 2  ;;  %v820_v5 = vrot.slane %v819_v0, 4 }
 0x20e   : > { %v702_v6 = vsub.f32 %v683_v2, %v701_v3  ;;  %v821_v7 = vadd.f32 %v820_v5, %v819_v0  ;;  %v806_v9 = vmax.f32 %v804_v63, %v805_v4 }
 0x210   : > { %v706_v8 = vsel %vm703_vm7, %v702_v6, %v581_v1  ;;  %v822_v14 = vrot.slane %v821_v7, 2  ;;  %v807_v10 = vrot.slane %v806_v9, 1 }
 0x212   : > { %v823_v15 = vadd.f32 %v822_v14, %v821_v7  ;;  %v808_v13 = vmax.f32 %v806_v9, %v807_v10 }
 0x214   : > { %v824_v12 = vrot.slane %v823_v15, 1 }
 0x216   : > { %v825_v16 = vadd.f32 %v824_v12, %v823_v15 }
 0x218   : > { %v826_v17 = vmul.f32 0.03125, %v825_v16 }
 0x21a   : > { %v827_v18 = vsub.f32 %v808_v13, %v826_v17 }
 0x21c   : > { %v831_v19 = vsel %vm828_vm8, %v827_v18, %v706_v8 }
 0x21d   : > { %v833_v20 = vsel %vm832_vm9, %v831_v19, -inf }
 0x21e   : > { %834 = vmax.xlane.f32.xlu0 %v833_v20 }
 0x2ab   : > { %v835_v22 = vpop.xlane.xlu0 %834 }
 0x2ac   : > { %vm836_vm10 = vcmp.eq.f32.partialorder %v831_v19, %v835_v22 }
 0x2ad   : > { %v837_v23 = vsel %vm836_vm10, %v4676_v21, 32  ;;  %vm931_vm10 = vcmp.eq.s32.totalorder %v4676_v21, 3 }
 0x2ae   : > { %v838_v24 = vsel %vm832_vm9, %v837_v23, 2147483647 }
 0x2af   : > { %v840_v25 = vshra.s32 %v838_v24, 16  ;;  %v839_v28 = vand.u32 65535, %v838_v24 }
 0x2b1   : > { %v842_v26 = vcvt.s32.f32 %v840_v25  ;;  %v841_v30 = vcvt.s32.f32 %v839_v28 }
 0x2b3   : > { %843 = vmin.xlane.f32.xlu1 %v842_v26 }
 0x340   : > { %v844_v29 = vpop.xlane.xlu1 %843 }
 0x341   : > { %vm845_vm11 = vcmp.eq.f32.partialorder %v842_v26, %v844_v29  ;;  %v850_v32 = vcvt.f32.s32 %v844_v29 }
 0x342   : > { %v846_v31 = vsel %vm845_vm11, %v841_v30, inf }
 0x343   : > { %847 = vmin.xlane.f32.xlu0 %v846_v31  ;;  %v851_v38 = vshll.u32 %v850_v32, 16 }
 0x3d0   : > { %v848_v33 = vpop.xlane.xlu0 %847 }
 0x3d1   : > { %v849_v11 = vcvt.f32.s32 %v848_v33 }
 0x3d3   : > { %v852_v39 = vadd.s32 %v851_v38, %v849_v11 }
 0x3d5   : > { %vm857_vm12 = vcmp.eq.s32.totalorder %v4676_v21, %v852_v39  ;;  %v856_v54 = vsel %vm853_vm15, %v852_v39, 32 }
 0x3d6   : > { %v858_v40 = vsel %vm857_vm12, -1e+30, %v831_v19 }
 0x3d7   : > { %v859_v41 = vsel %vm832_vm9, %v858_v40, -inf }
 0x3d8   : > { %860 = vmax.xlane.f32.xlu0 %v859_v41 }
 0x465   : > { %v861_v42 = vpop.xlane.xlu0 %860 }
 0x466   : > { %vm862_vm13 = vcmp.eq.f32.partialorder %v858_v40, %v861_v42 }
 0x467   : > { %v863_v43 = vsel %vm862_vm13, %v4676_v21, 32 }
 0x468   : > { %v864_v44 = vsel %vm832_vm9, %v863_v43, 2147483647 }
 0x469   : > { %v866_v45 = vshra.s32 %v864_v44, 16  ;;  %v865_v46 = vand.u32 65535, %v864_v44 }
 0x46b   : > { %v868_v34 = vcvt.s32.f32 %v866_v45  ;;  %v867_v48 = vcvt.s32.f32 %v865_v46 }
 0x46d   : > { %869 = vmin.xlane.f32.xlu1 %v868_v34 }
 0x4fa   : > { %v870_v47 = vpop.xlane.xlu1 %869 }
 0x4fb   : > { %vm871_vm14 = vcmp.eq.f32.partialorder %v868_v34, %v870_v47  ;;  %v876_v49 = vcvt.f32.s32 %v870_v47 }
 0x4fc   : > { %v872_v36 = vsel %vm871_vm14, %v867_v48, inf  ;;  %vm957_vm14 = vcmp.eq.s32.totalorder %v4676_v21, 4 }
 0x4fd   : > { %873 = vmin.xlane.f32.xlu0 %v872_v36  ;;  %v877_v51 = vshll.u32 %v876_v49, 16 }
 0x58a   : > { %v874_v50 = vpop.xlane.xlu0 %873 }
 0x58b   : > { %v875_v52 = vcvt.f32.s32 %v874_v50 }
 0x58d   : > { %v878_v53 = vadd.s32 %v877_v51, %v875_v52 }
 0x58f   : > { %v882_v55 = vsel %vm879_vm1, %v878_v53, %v856_v54  ;;  %vm883_vm2 = vcmp.eq.s32.totalorder %v4676_v21, %v878_v53 }
 0x590   : > { %v884_v56 = vsel %vm883_vm2, -1e+30, %v858_v40 }
 0x591   : > { %v885_v57 = vsel %vm832_vm9, %v884_v56, -inf }
 0x592   : > { %886 = vmax.xlane.f32.xlu1 %v885_v57 }
 0x61f   : > { %v887_v37 = vpop.xlane.xlu1 %886 }
 0x620   : > { %vm888_vm3 = vcmp.eq.f32.partialorder %v884_v56, %v887_v37 }
 0x621   : > { %v889_v58 = vsel %vm888_vm3, %v4676_v21, 32  ;;  %vm983_vm3 = vcmp.eq.s32.totalorder %v4676_v21, 5 }
 0x622   : > { %v890_v59 = vsel %vm832_vm9, %v889_v58, 2147483647 }
 0x623   : > { %v892_v60 = vshra.s32 %v890_v59, 16  ;;  %v891_v35 = vand.u32 65535, %v890_v59 }
 0x625   : > { %v894_v61 = vcvt.s32.f32 %v892_v60  ;;  %v893_v63 = vcvt.s32.f32 %v891_v35 }
 0x627   : > { %895 = vmin.xlane.f32.xlu0 %v894_v61 }
 0x6b4   : > { %v896_v62 = vpop.xlane.xlu0 %895 }
 0x6b5   : > { %vm897_vm4 = vcmp.eq.f32.partialorder %v894_v61, %v896_v62  ;;  %v902_v1 = vcvt.f32.s32 %v896_v62 }
 0x6b6   : > { %v898_v0 = vsel %vm897_vm4, %v893_v63, inf }
 0x6b7   : > { %899 = vmin.xlane.f32.xlu1 %v898_v0  ;;  %v903_v3 = vshll.u32 %v902_v1, 16 }
 0x744   : > { %v900_v2 = vpop.xlane.xlu1 %899 }
 0x745   : > { %v901_v4 = vcvt.f32.s32 %v900_v2 }
 0x747   : > { %v904_v5 = vadd.s32 %v903_v3, %v901_v4 }
 0x749   : > { %v908_v6 = vsel %vm905_vm5, %v904_v5, %v882_v55  ;;  %vm909_vm6 = vcmp.eq.s32.totalorder %v4676_v21, %v904_v5 }
 0x74a   : > { %v910_v7 = vsel %vm909_vm6, -1e+30, %v884_v56 }
 0x74b   : > { %v911_v8 = vsel %vm832_vm9, %v910_v7, -inf }
 0x74c   : > { %912 = vmax.xlane.f32.xlu0 %v911_v8 }
 0x7d9   : > { %v913_v9 = vpop.xlane.xlu0 %912 }
 0x7da   : > { %vm914_vm7 = vcmp.eq.f32.partialorder %v910_v7, %v913_v9 }
 0x7db   : > { %v915_v14 = vsel %vm914_vm7, %v4676_v21, 32  ;;  %vm1009_vm7 = vcmp.eq.s32.totalorder %v4676_v21, 6 }
 0x7dc   : > { %v916_v15 = vsel %vm832_vm9, %v915_v14, 2147483647 }
 0x7dd   : > { %v918_v10 = vshra.s32 %v916_v15, 16  ;;  %v917_v16 = vand.u32 65535, %v916_v15 }
 0x7df   : > { %v920_v12 = vcvt.s32.f32 %v918_v10  ;;  %v919_v17 = vcvt.s32.f32 %v917_v16 }
 0x7e1   : > { %921 = vmin.xlane.f32.xlu1 %v920_v12 }
 0x86e   : > { %v922_v13 = vpop.xlane.xlu1 %921 }
 0x86f   : > { %vm923_vm8 = vcmp.eq.f32.partialorder %v920_v12, %v922_v13  ;;  %v928_v19 = vcvt.f32.s32 %v922_v13 }
 0x870   : > { %v924_v18 = vsel %vm923_vm8, %v919_v17, inf }
 0x871   : > { %925 = vmin.xlane.f32.xlu0 %v924_v18  ;;  %v929_v22 = vshll.u32 %v928_v19, 16 }
 0x8fe   : > { %v926_v20 = vpop.xlane.xlu0 %925 }
 0x8ff   : > { %v927_v23 = vcvt.f32.s32 %v926_v20 }
 0x901   : > { %v930_v24 = vadd.s32 %v929_v22, %v927_v23 }
 0x903   : > { %v934_v25 = vsel %vm931_vm10, %v930_v24, %v908_v6  ;;  %vm935_vm11 = vcmp.eq.s32.totalorder %v4676_v21, %v930_v24 }
 0x904   : > { %v936_v26 = vsel %vm935_vm11, -1e+30, %v910_v7 }
 0x905   : > { %v937_v28 = vsel %vm832_vm9, %v936_v26, -inf }
 0x906   : > { %938 = vmax.xlane.f32.xlu1 %v937_v28 }
 0x993   : > { %v939_v29 = vpop.xlane.xlu1 %938 }
 0x994   : > { %vm940_vm12 = vcmp.eq.f32.partialorder %v936_v26, %v939_v29 }
 0x995   : > { %v941_v30 = vsel %vm940_vm12, %v4676_v21, 32  ;;  %vm1035_vm12 = vcmp.eq.s32.totalorder %v4676_v21, 7 }
 0x996   : > { %v942_v31 = vsel %vm832_vm9, %v941_v30, 2147483647 }
 0x997   : > { %v944_v32 = vshra.s32 %v942_v31, 16  ;;  %v943_v38 = vand.u32 65535, %v942_v31 }
 0x999   : > { %v946_v33 = vcvt.s32.f32 %v944_v32  ;;  %v945_v39 = vcvt.s32.f32 %v943_v38 }
 0x99b   : > { %947 = vmin.xlane.f32.xlu0 %v946_v33 }
 0xa28   : > { %v948_v11 = vpop.xlane.xlu0 %947 }
 0xa29   : > { %vm949_vm13 = vcmp.eq.f32.partialorder %v946_v33, %v948_v11  ;;  %v954_v41 = vcvt.f32.s32 %v948_v11 }
 0xa2a   : > { %v950_v40 = vsel %vm949_vm13, %v945_v39, inf }
 0xa2b   : > { %951 = vmin.xlane.f32.xlu1 %v950_v40  ;;  %v955_v43 = vshll.u32 %v954_v41, 16 }
 0xab8   : > { %v952_v42 = vpop.xlane.xlu1 %951 }
 0xab9   : > { %v953_v44 = vcvt.f32.s32 %v952_v42 }
 0xabb   : > { %v956_v45 = vadd.s32 %v955_v43, %v953_v44 }
 0xabd   : > { %v960_v34 = vsel %vm957_vm14, %v956_v45, %v934_v25  ;;  %vm961_vm15 = vcmp.eq.s32.totalorder %v4676_v21, %v956_v45 }
 0xabe   : > { %v962_v46 = vsel %vm961_vm15, -1e+30, %v936_v26 }
 0xabf   : > { %v963_v47 = vsel %vm832_vm9, %v962_v46, -inf }
 0xac0   : > { %964 = vmax.xlane.f32.xlu0 %v963_v47 }
 0xb4d   : > { %v965_v48 = vpop.xlane.xlu0 %964 }
 0xb4e   : > { %vm966_vm1 = vcmp.eq.f32.partialorder %v962_v46, %v965_v48 }
 0xb4f   : > { %v967_v36 = vsel %vm966_vm1, %v4676_v21, 32  ;;  %vm1061_vm1 = vcmp.eq.s32.totalorder %v4676_v21, 8 }
 0xb50   : > { %v968_v49 = vsel %vm832_vm9, %v967_v36, 2147483647 }
 0xb51   : > { %v970_v50 = vshra.s32 %v968_v49, 16  ;;  %v969_v52 = vand.u32 65535, %v968_v49 }
 0xb53   : > { %v972_v51 = vcvt.s32.f32 %v970_v50  ;;  %v971_v54 = vcvt.s32.f32 %v969_v52 }
 0xb55   : > { %973 = vmin.xlane.f32.xlu1 %v972_v51 }
 0xbe2   : > { %v974_v53 = vpop.xlane.xlu1 %973 }
 0xbe3   : > { %vm975_vm2 = vcmp.eq.f32.partialorder %v972_v51, %v974_v53  ;;  %v980_v56 = vcvt.f32.s32 %v974_v53 }
 0xbe4   : > { %v976_v55 = vsel %vm975_vm2, %v971_v54, inf }
 0xbe5   : > { %977 = vmin.xlane.f32.xlu0 %v976_v55  ;;  %v981_v37 = vshll.u32 %v980_v56, 16 }
 0xc72   : > { %v978_v57 = vpop.xlane.xlu0 %977 }
 0xc73   : > { %v979_v58 = vcvt.f32.s32 %v978_v57 }
 0xc75   : > { %v982_v59 = vadd.s32 %v981_v37, %v979_v58 }
 0xc77   : > { %v986_v60 = vsel %vm983_vm3, %v982_v59, %v960_v34  ;;  %vm987_vm4 = vcmp.eq.s32.totalorder %v4676_v21, %v982_v59 }
 0xc78   : > { %v988_v61 = vsel %vm987_vm4, -1e+30, %v962_v46 }
 0xc79   : > { %v989_v35 = vsel %vm832_vm9, %v988_v61, -inf }
 0xc7a   : > { %990 = vmax.xlane.f32.xlu1 %v989_v35 }
 0xd07   : > { %v991_v62 = vpop.xlane.xlu1 %990 }
 0xd08   : > { %vm992_vm5 = vcmp.eq.f32.partialorder %v988_v61, %v991_v62 }
 0xd09   : > { %v993_v63 = vsel %vm992_vm5, %v4676_v21, 32  ;;  %vm1087_vm5 = vcmp.eq.s32.totalorder %v4676_v21, 9 }
 0xd0a   : > { %v994_v0 = vsel %vm832_vm9, %v993_v63, 2147483647 }
 0xd0b   : > { %v996_v1 = vshra.s32 %v994_v0, 16  ;;  %v995_v3 = vand.u32 65535, %v994_v0 }
 0xd0d   : > { %v998_v2 = vcvt.s32.f32 %v996_v1  ;;  %v997_v5 = vcvt.s32.f32 %v995_v3 }
 0xd0f   : > { %999 = vmin.xlane.f32.xlu0 %v998_v2 }
 0xd9c   : > { %v1000_v4 = vpop.xlane.xlu0 %999 }
 0xd9d   : > { %vm1001_vm6 = vcmp.eq.f32.partialorder %v998_v2, %v1000_v4  ;;  %v1006_v7 = vcvt.f32.s32 %v1000_v4 }
 0xd9e   : > { %v1002_v6 = vsel %vm1001_vm6, %v997_v5, inf }
 0xd9f   : > { %1003 = vmin.xlane.f32.xlu1 %v1002_v6  ;;  %v1007_v9 = vshll.u32 %v1006_v7, 16 }
 0xe2c   : > { %v1004_v8 = vpop.xlane.xlu1 %1003 }
 0xe2d   : > { %v1005_v14 = vcvt.f32.s32 %v1004_v8 }
 0xe2f   : > { %v1008_v15 = vadd.s32 %v1007_v9, %v1005_v14 }
 0xe31   : > { %v1012_v10 = vsel %vm1009_vm7, %v1008_v15, %v986_v60  ;;  %vm1013_vm8 = vcmp.eq.s32.totalorder %v4676_v21, %v1008_v15 }
 0xe32   : > { %v1014_v12 = vsel %vm1013_vm8, -1e+30, %v988_v61 }
 0xe33   : > { %v1015_v16 = vsel %vm832_vm9, %v1014_v12, -inf }
 0xe34   : > { %1016 = vmax.xlane.f32.xlu0 %v1015_v16 }
 0xec1   : > { %v1017_v13 = vpop.xlane.xlu0 %1016 }
 0xec2   : > { %vm1018_vm10 = vcmp.eq.f32.partialorder %v1014_v12, %v1017_v13 }
 0xec3   : > { %v1019_v17 = vsel %vm1018_vm10, %v4676_v21, 32  ;;  %vm1113_vm10 = vcmp.eq.s32.totalorder %v4676_v21, 10 }
 0xec4   : > { %v1020_v18 = vsel %vm832_vm9, %v1019_v17, 2147483647 }
 0xec5   : > { %v1022_v19 = vshra.s32 %v1020_v18, 16  ;;  %v1021_v22 = vand.u32 65535, %v1020_v18 }
 0xec7   : > { %v1024_v20 = vcvt.s32.f32 %v1022_v19  ;;  %v1023_v24 = vcvt.s32.f32 %v1021_v22 }
 0xec9   : > { %1025 = vmin.xlane.f32.xlu1 %v1024_v20 }
 0xf56   : > { %v1026_v23 = vpop.xlane.xlu1 %1025 }
 0xf57   : > { %vm1027_vm11 = vcmp.eq.f32.partialorder %v1024_v20, %v1026_v23  ;;  %v1032_v26 = vcvt.f32.s32 %v1026_v23 }
 0xf58   : > { %v1028_v25 = vsel %vm1027_vm11, %v1023_v24, inf }
 0xf59   : > { %1029 = vmin.xlane.f32.xlu0 %v1028_v25  ;;  %v1033_v29 = vshll.u32 %v1032_v26, 16 }
 0xfe6   : > { %v1030_v28 = vpop.xlane.xlu0 %1029 }
 0xfe7   : > { %v1031_v30 = vcvt.f32.s32 %v1030_v28 }
 0xfe9   : > { %v1034_v31 = vadd.s32 %v1033_v29, %v1031_v30 }
 0xfeb   : > { %v1038_v32 = vsel %vm1035_vm12, %v1034_v31, %v1012_v10  ;;  %vm1039_vm13 = vcmp.eq.s32.totalorder %v4676_v21, %v1034_v31 }
 0xfec   : > { %v1040_v33 = vsel %vm1039_vm13, -1e+30, %v1014_v12 }
 0xfed   : > { %v1041_v38 = vsel %vm832_vm9, %v1040_v33, -inf }
 0xfee   : > { %1042 = vmax.xlane.f32.xlu1 %v1041_v38 }
0x107b   : > { %v1043_v11 = vpop.xlane.xlu1 %1042 }
0x107c   : > { %vm1044_vm14 = vcmp.eq.f32.partialorder %v1040_v33, %v1043_v11 }
0x107d   : > { %v1045_v39 = vsel %vm1044_vm14, %v4676_v21, 32  ;;  %vm1139_vm14 = vcmp.eq.s32.totalorder %v4676_v21, 11 }
0x107e   : > { %v1046_v40 = vsel %vm832_vm9, %v1045_v39, 2147483647 }
0x107f   : > { %v1048_v41 = vshra.s32 %v1046_v40, 16  ;;  %v1047_v43 = vand.u32 65535, %v1046_v40 }
0x1081   : > { %v1050_v42 = vcvt.s32.f32 %v1048_v41  ;;  %v1049_v45 = vcvt.s32.f32 %v1047_v43 }
0x1083   : > { %1051 = vmin.xlane.f32.xlu0 %v1050_v42 }
0x1110   : > { %v1052_v44 = vpop.xlane.xlu0 %1051 }
0x1111   : > { %vm1053_vm15 = vcmp.eq.f32.partialorder %v1050_v42, %v1052_v44  ;;  %v1058_v46 = vcvt.f32.s32 %v1052_v44 }
0x1112   : > { %v1054_v34 = vsel %vm1053_vm15, %v1049_v45, inf }
0x1113   : > { %1055 = vmin.xlane.f32.xlu1 %v1054_v34  ;;  %v1059_v48 = vshll.u32 %v1058_v46, 16 }
0x11a0   : > { %v1056_v47 = vpop.xlane.xlu1 %1055 }
0x11a1   : > { %v1057_v36 = vcvt.f32.s32 %v1056_v47 }
0x11a3   : > { %v1060_v49 = vadd.s32 %v1059_v48, %v1057_v36 }
0x11a5   : > { %v1064_v50 = vsel %vm1061_vm1, %v1060_v49, %v1038_v32  ;;  %vm1065_vm2 = vcmp.eq.s32.totalorder %v4676_v21, %v1060_v49 }
0x11a6   : > { %v1066_v51 = vsel %vm1065_vm2, -1e+30, %v1040_v33 }
0x11a7   : > { %v1067_v52 = vsel %vm832_vm9, %v1066_v51, -inf }
0x11a8   : > { %1068 = vmax.xlane.f32.xlu0 %v1067_v52 }
0x1235   : > { %v1069_v53 = vpop.xlane.xlu0 %1068 }
0x1236   : > { %vm1070_vm3 = vcmp.eq.f32.partialorder %v1066_v51, %v1069_v53 }
0x1237   : > { %v1071_v54 = vsel %vm1070_vm3, %v4676_v21, 32  ;;  %vm1165_vm3 = vcmp.eq.s32.totalorder %v4676_v21, 12 }
0x1238   : > { %v1072_v55 = vsel %vm832_vm9, %v1071_v54, 2147483647 }
0x1239   : > { %v1074_v56 = vshra.s32 %v1072_v55, 16  ;;  %v1073_v37 = vand.u32 65535, %v1072_v55 }
0x123b   : > { %v1076_v57 = vcvt.s32.f32 %v1074_v56  ;;  %v1075_v59 = vcvt.s32.f32 %v1073_v37 }
0x123d   : > { %1077 = vmin.xlane.f32.xlu1 %v1076_v57 }
0x12ca   : > { %v1078_v58 = vpop.xlane.xlu1 %1077 }
0x12cb   : > { %vm1079_vm4 = vcmp.eq.f32.partialorder %v1076_v57, %v1078_v58  ;;  %v1084_v61 = vcvt.f32.s32 %v1078_v58 }
0x12cc   : > { %v1080_v60 = vsel %vm1079_vm4, %v1075_v59, inf }
0x12cd   : > { %1081 = vmin.xlane.f32.xlu0 %v1080_v60  ;;  %v1085_v62 = vshll.u32 %v1084_v61, 16 }
0x135a   : > { %v1082_v35 = vpop.xlane.xlu0 %1081 }
0x135b   : > { %v1083_v63 = vcvt.f32.s32 %v1082_v35 }
0x135d   : > { %v1086_v0 = vadd.s32 %v1085_v62, %v1083_v63 }
0x135f   : > { %v1090_v1 = vsel %vm1087_vm5, %v1086_v0, %v1064_v50  ;;  %vm1091_vm6 = vcmp.eq.s32.totalorder %v4676_v21, %v1086_v0 }
0x1360   : > { %v1092_v2 = vsel %vm1091_vm6, -1e+30, %v1066_v51 }
0x1361   : > { %v1093_v3 = vsel %vm832_vm9, %v1092_v2, -inf }
0x1362   : > { %1094 = vmax.xlane.f32.xlu1 %v1093_v3 }
0x13ef   : > { %v1095_v4 = vpop.xlane.xlu1 %1094 }
0x13f0   : > { %vm1096_vm7 = vcmp.eq.f32.partialorder %v1092_v2, %v1095_v4 }
0x13f1   : > { %v1097_v5 = vsel %vm1096_vm7, %v4676_v21, 32  ;;  %vm1191_vm7 = vcmp.eq.s32.totalorder %v4676_v21, 13 }
0x13f2   : > { %v1098_v6 = vsel %vm832_vm9, %v1097_v5, 2147483647 }
0x13f3   : > { %v1100_v7 = vshra.s32 %v1098_v6, 16  ;;  %v1099_v9 = vand.u32 65535, %v1098_v6 }
0x13f5   : > { %v1102_v8 = vcvt.s32.f32 %v1100_v7  ;;  %v1101_v15 = vcvt.s32.f32 %v1099_v9 }
0x13f7   : > { %1103 = vmin.xlane.f32.xlu0 %v1102_v8 }
0x1484   : > { %v1104_v14 = vpop.xlane.xlu0 %1103 }
0x1485   : > { %vm1105_vm8 = vcmp.eq.f32.partialorder %v1102_v8, %v1104_v14  ;;  %v1110_v12 = vcvt.f32.s32 %v1104_v14 }
0x1486   : > { %v1106_v10 = vsel %vm1105_vm8, %v1101_v15, inf }
0x1487   : > { %1107 = vmin.xlane.f32.xlu1 %v1106_v10  ;;  %v1111_v13 = vshll.u32 %v1110_v12, 16 }
0x1514   : > { %v1108_v16 = vpop.xlane.xlu1 %1107 }
0x1515   : > { %v1109_v17 = vcvt.f32.s32 %v1108_v16 }
0x1517   : > { %v1112_v18 = vadd.s32 %v1111_v13, %v1109_v17 }
0x1519   : > { %v1116_v19 = vsel %vm1113_vm10, %v1112_v18, %v1090_v1  ;;  %vm1117_vm11 = vcmp.eq.s32.totalorder %v4676_v21, %v1112_v18 }
0x151a   : > { %v1118_v20 = vsel %vm1117_vm11, -1e+30, %v1092_v2 }
0x151b   : > { %v1119_v22 = vsel %vm832_vm9, %v1118_v20, -inf }
0x151c   : > { %1120 = vmax.xlane.f32.xlu0 %v1119_v22 }
0x15a9   : > { %v1121_v23 = vpop.xlane.xlu0 %1120 }
0x15aa   : > { %vm1122_vm12 = vcmp.eq.f32.partialorder %v1118_v20, %v1121_v23 }
0x15ab   : > { %v1123_v24 = vsel %vm1122_vm12, %v4676_v21, 32  ;;  %vm1217_vm12 = vcmp.eq.s32.totalorder %v4676_v21, 14 }
0x15ac   : > { %v1124_v25 = vsel %vm832_vm9, %v1123_v24, 2147483647 }
0x15ad   : > { %v1126_v26 = vshra.s32 %v1124_v25, 16  ;;  %v1125_v29 = vand.u32 65535, %v1124_v25 }
0x15af   : > { %v1128_v28 = vcvt.s32.f32 %v1126_v26  ;;  %v1127_v31 = vcvt.s32.f32 %v1125_v29 }
0x15b1   : > { %1129 = vmin.xlane.f32.xlu1 %v1128_v28 }
0x163e   : > { %v1130_v30 = vpop.xlane.xlu1 %1129 }
0x163f   : > { %vm1131_vm13 = vcmp.eq.f32.partialorder %v1128_v28, %v1130_v30  ;;  %v1136_v33 = vcvt.f32.s32 %v1130_v30 }
0x1640   : > { %v1132_v32 = vsel %vm1131_vm13, %v1127_v31, inf }
0x1641   : > { %1133 = vmin.xlane.f32.xlu0 %v1132_v32  ;;  %v1137_v11 = vshll.u32 %v1136_v33, 16 }
0x16ce   : > { %v1134_v38 = vpop.xlane.xlu0 %1133 }
0x16cf   : > { %v1135_v39 = vcvt.f32.s32 %v1134_v38 }
0x16d1   : > { %v1138_v40 = vadd.s32 %v1137_v11, %v1135_v39 }
0x16d3   : > { %v1142_v41 = vsel %vm1139_vm14, %v1138_v40, %v1116_v19  ;;  %vm1143_vm15 = vcmp.eq.s32.totalorder %v4676_v21, %v1138_v40 }
0x16d4   : > { %v1144_v42 = vsel %vm1143_vm15, -1e+30, %v1118_v20 }
0x16d5   : > { %v1145_v43 = vsel %vm832_vm9, %v1144_v42, -inf }
0x16d6   : > { %1146 = vmax.xlane.f32.xlu1 %v1145_v43 }
0x1763   : > { %v1147_v44 = vpop.xlane.xlu1 %1146 }
0x1764   : > { %vm1148_vm1 = vcmp.eq.f32.partialorder %v1144_v42, %v1147_v44 }
0x1765   : > { %v1149_v45 = vsel %vm1148_vm1, %v4676_v21, 32  ;;  %vm1243_vm1 = vcmp.eq.s32.totalorder %v4676_v21, 15 }
0x1766   : > { %v1150_v34 = vsel %vm832_vm9, %v1149_v45, 2147483647 }
0x1767   : > { %v1152_v46 = vshra.s32 %v1150_v34, 16  ;;  %v1151_v48 = vand.u32 65535, %v1150_v34 }
0x1769   : > { %v1154_v47 = vcvt.s32.f32 %v1152_v46  ;;  %v1153_v49 = vcvt.s32.f32 %v1151_v48 }
0x176b   : > { %1155 = vmin.xlane.f32.xlu0 %v1154_v47 }
0x17f8   : > { %v1156_v36 = vpop.xlane.xlu0 %1155 }
0x17f9   : > { %vm1157_vm2 = vcmp.eq.f32.partialorder %v1154_v47, %v1156_v36  ;;  %v1162_v51 = vcvt.f32.s32 %v1156_v36 }
0x17fa   : > { %v1158_v50 = vsel %vm1157_vm2, %v1153_v49, inf }
0x17fb   : > { %1159 = vmin.xlane.f32.xlu1 %v1158_v50  ;;  %v1163_v53 = vshll.u32 %v1162_v51, 16 }
0x1888   : > { %v1160_v52 = vpop.xlane.xlu1 %1159 }
0x1889   : > { %v1161_v54 = vcvt.f32.s32 %v1160_v52 }
0x188b   : > { %v1164_v55 = vadd.s32 %v1163_v53, %v1161_v54 }
0x188d   : > { %v1168_v56 = vsel %vm1165_vm3, %v1164_v55, %v1142_v41  ;;  %vm1169_vm4 = vcmp.eq.s32.totalorder %v4676_v21, %v1164_v55 }
0x188e   : > { %v1170_v57 = vsel %vm1169_vm4, -1e+30, %v1144_v42 }
0x188f   : > { %v1171_v37 = vsel %vm832_vm9, %v1170_v57, -inf }
0x1890   : > { %1172 = vmax.xlane.f32.xlu0 %v1171_v37 }
0x191d   : > { %v1173_v58 = vpop.xlane.xlu0 %1172 }
0x191e   : > { %vm1174_vm5 = vcmp.eq.f32.partialorder %v1170_v57, %v1173_v58 }
0x191f   : > { %v1175_v59 = vsel %vm1174_vm5, %v4676_v21, 32  ;;  %vm1269_vm5 = vcmp.eq.s32.totalorder %v4676_v21, 16 }
0x1920   : > { %v1176_v60 = vsel %vm832_vm9, %v1175_v59, 2147483647 }
0x1921   : > { %v1178_v61 = vshra.s32 %v1176_v60, 16  ;;  %v1177_v62 = vand.u32 65535, %v1176_v60 }
0x1923   : > { %v1180_v35 = vcvt.s32.f32 %v1178_v61  ;;  %v1179_v0 = vcvt.s32.f32 %v1177_v62 }
0x1925   : > { %1181 = vmin.xlane.f32.xlu1 %v1180_v35 }
0x19b2   : > { %v1182_v63 = vpop.xlane.xlu1 %1181 }
0x19b3   : > { %vm1183_vm6 = vcmp.eq.f32.partialorder %v1180_v35, %v1182_v63  ;;  %v1188_v2 = vcvt.f32.s32 %v1182_v63 }
0x19b4   : > { %v1184_v1 = vsel %vm1183_vm6, %v1179_v0, inf }
0x19b5   : > { %1185 = vmin.xlane.f32.xlu0 %v1184_v1  ;;  %v1189_v4 = vshll.u32 %v1188_v2, 16 }
0x1a42   : > { %v1186_v3 = vpop.xlane.xlu0 %1185 }
0x1a43   : > { %v1187_v5 = vcvt.f32.s32 %v1186_v3 }
0x1a45   : > { %v1190_v6 = vadd.s32 %v1189_v4, %v1187_v5 }
0x1a47   : > { %v1194_v7 = vsel %vm1191_vm7, %v1190_v6, %v1168_v56  ;;  %vm1195_vm8 = vcmp.eq.s32.totalorder %v4676_v21, %v1190_v6 }
0x1a48   : > { %v1196_v8 = vsel %vm1195_vm8, -1e+30, %v1170_v57 }
0x1a49   : > { %v1197_v9 = vsel %vm832_vm9, %v1196_v8, -inf }
0x1a4a   : > { %1198 = vmax.xlane.f32.xlu1 %v1197_v9 }
0x1ad7   : > { %v1199_v14 = vpop.xlane.xlu1 %1198 }
0x1ad8   : > { %vm1200_vm10 = vcmp.eq.f32.partialorder %v1196_v8, %v1199_v14 }
0x1ad9   : > { %v1201_v15 = vsel %vm1200_vm10, %v4676_v21, 32  ;;  %vm1295_vm10 = vcmp.eq.s32.totalorder %v4676_v21, 17 }
0x1ada   : > { %v1202_v10 = vsel %vm832_vm9, %v1201_v15, 2147483647 }
0x1adb   : > { %v1204_v12 = vshra.s32 %v1202_v10, 16  ;;  %v1203_v13 = vand.u32 65535, %v1202_v10 }
0x1add   : > { %v1206_v16 = vcvt.s32.f32 %v1204_v12  ;;  %v1205_v18 = vcvt.s32.f32 %v1203_v13 }
0x1adf   : > { %1207 = vmin.xlane.f32.xlu0 %v1206_v16 }
0x1b6c   : > { %v1208_v17 = vpop.xlane.xlu0 %1207 }
0x1b6d   : > { %vm1209_vm11 = vcmp.eq.f32.partialorder %v1206_v16, %v1208_v17  ;;  %v1214_v20 = vcvt.f32.s32 %v1208_v17 }
0x1b6e   : > { %v1210_v19 = vsel %vm1209_vm11, %v1205_v18, inf }
0x1b6f   : > { %1211 = vmin.xlane.f32.xlu1 %v1210_v19  ;;  %v1215_v23 = vshll.u32 %v1214_v20, 16 }
0x1bfc   : > { %v1212_v22 = vpop.xlane.xlu1 %1211 }
0x1bfd   : > { %v1213_v24 = vcvt.f32.s32 %v1212_v22 }
0x1bff   : > { %v1216_v25 = vadd.s32 %v1215_v23, %v1213_v24 }
0x1c01   : > { %v1220_v26 = vsel %vm1217_vm12, %v1216_v25, %v1194_v7  ;;  %vm1221_vm13 = vcmp.eq.s32.totalorder %v4676_v21, %v1216_v25 }
0x1c02   : > { %v1222_v28 = vsel %vm1221_vm13, -1e+30, %v1196_v8 }
0x1c03   : > { %v1223_v29 = vsel %vm832_vm9, %v1222_v28, -inf }
0x1c04   : > { %1224 = vmax.xlane.f32.xlu0 %v1223_v29 }
0x1c91   : > { %v1225_v30 = vpop.xlane.xlu0 %1224 }
0x1c92   : > { %vm1226_vm14 = vcmp.eq.f32.partialorder %v1222_v28, %v1225_v30 }
0x1c93   : > { %v1227_v31 = vsel %vm1226_vm14, %v4676_v21, 32  ;;  %vm1321_vm14 = vcmp.eq.s32.totalorder %v4676_v21, 18 }
0x1c94   : > { %v1228_v32 = vsel %vm832_vm9, %v1227_v31, 2147483647 }
0x1c95   : > { %v1230_v33 = vshra.s32 %v1228_v32, 16  ;;  %v1229_v11 = vand.u32 65535, %v1228_v32 }
0x1c97   : > { %v1232_v38 = vcvt.s32.f32 %v1230_v33  ;;  %v1231_v40 = vcvt.s32.f32 %v1229_v11 }
0x1c99   : > { %1233 = vmin.xlane.f32.xlu1 %v1232_v38 }
0x1d26   : > { %v1234_v39 = vpop.xlane.xlu1 %1233 }
0x1d27   : > { %vm1235_vm15 = vcmp.eq.f32.partialorder %v1232_v38, %v1234_v39  ;;  %v1240_v42 = vcvt.f32.s32 %v1234_v39 }
0x1d28   : > { %v1236_v41 = vsel %vm1235_vm15, %v1231_v40, inf }
0x1d29   : > { %1237 = vmin.xlane.f32.xlu0 %v1236_v41  ;;  %v1241_v44 = vshll.u32 %v1240_v42, 16 }
0x1db6   : > { %v1238_v43 = vpop.xlane.xlu0 %1237 }
0x1db7   : > { %v1239_v45 = vcvt.f32.s32 %v1238_v43 }
0x1db9   : > { %v1242_v34 = vadd.s32 %v1241_v44, %v1239_v45 }
0x1dbb   : > { %v1246_v46 = vsel %vm1243_vm1, %v1242_v34, %v1220_v26  ;;  %vm1247_vm2 = vcmp.eq.s32.totalorder %v4676_v21, %v1242_v34 }
0x1dbc   : > { %v1248_v47 = vsel %vm1247_vm2, -1e+30, %v1222_v28 }
0x1dbd   : > { %v1249_v48 = vsel %vm832_vm9, %v1248_v47, -inf }
0x1dbe   : > { %1250 = vmax.xlane.f32.xlu1 %v1249_v48 }
0x1e4b   : > { %v1251_v36 = vpop.xlane.xlu1 %1250 }
0x1e4c   : > { %vm1252_vm3 = vcmp.eq.f32.partialorder %v1248_v47, %v1251_v36 }
0x1e4d   : > { %v1253_v49 = vsel %vm1252_vm3, %v4676_v21, 32  ;;  %vm1347_vm3 = vcmp.eq.s32.totalorder %v4676_v21, 19 }
0x1e4e   : > { %v1254_v50 = vsel %vm832_vm9, %v1253_v49, 2147483647 }
0x1e4f   : > { %v1256_v51 = vshra.s32 %v1254_v50, 16  ;;  %v1255_v53 = vand.u32 65535, %v1254_v50  ;;  %v1375_v50 = vsub.s32 0, %v4647_v27 }
0x1e51   : > { %v1258_v52 = vcvt.s32.f32 %v1256_v51  ;;  %v1257_v55 = vcvt.s32.f32 %v1255_v53  ;;  %v1835_v51 = vsub.s32 1, %v4647_v27 }
0x1e53   : > { %1259 = vmin.xlane.f32.xlu0 %v1258_v52 }
0x1ee0   : > { %v1260_v54 = vpop.xlane.xlu0 %1259 }
0x1ee1   : > { %vm1261_vm4 = vcmp.eq.f32.partialorder %v1258_v52, %v1260_v54  ;;  %v1266_v57 = vcvt.f32.s32 %v1260_v54  ;;  %v2327_v52 = vsub.s32 2, %v4647_v27  ;;  %v4780_v54 = vadd.s32 8, %v4647_v27 }
0x1ee2   : > { %v1262_v56 = vsel %vm1261_vm4, %v1257_v55, inf  ;;  %v2819_v55 = vsub.s32 3, %v4647_v27  ;;  %vm1370_vm4 = vcmp.eq.s32.totalorder %v4676_v21, %v4647_v27 }
0x1ee3   : > { %1263 = vmin.xlane.f32.xlu1 %v1262_v56  ;;  %v1267_v58 = vshll.u32 %v1266_v57, 16  ;;  %v4784_v57 = vadd.s32 16, %v4647_v27 }
0x1f70   : > { %v1264_v37 = vpop.xlane.xlu1 %1263 }
0x1f71   : > { %v1265_v59 = vcvt.f32.s32 %v1264_v37 }
0x1f73   : > { %v1268_v60 = vadd.s32 %v1267_v58, %v1265_v59 }
0x1f75   : > { %v1272_v61 = vsel %vm1269_vm5, %v1268_v60, %v1246_v46  ;;  %vm1273_vm6 = vcmp.eq.s32.totalorder %v4676_v21, %v1268_v60  ;;  %vm1380_vm5 = vcmask 195584  }
0x1f76   : > { %v1274_v35 = vsel %vm1273_vm6, -1e+30, %v1248_v47  ;;  %vm1372_vm6 = vcmp.eq.s32.totalorder %v4676_v21, %v4784_v57 }
0x1f77   : > { %v1275_v62 = vsel %vm832_vm9, %v1274_v35, -inf }
0x1f78   : > { %1276 = vmax.xlane.f32.xlu0 %v1275_v62 }
0x2005   : > { %v1277_v63 = vpop.xlane.xlu0 %1276 }
0x2006   : > { %vm1278_vm7 = vcmp.eq.f32.partialorder %v1274_v35, %v1277_v63 }
0x2007   : > { %v1279_v0 = vsel %vm1278_vm7, %v4676_v21, 32 }
0x2008   : > { %v1280_v1 = vsel %vm832_vm9, %v1279_v0, 2147483647 }
0x2009   : > { %v1282_v2 = vshra.s32 %v1280_v1, 16  ;;  %v1281_v4 = vand.u32 65535, %v1280_v1 }
0x200b   : > { %v1284_v3 = vcvt.s32.f32 %v1282_v2  ;;  %v1283_v6 = vcvt.s32.f32 %v1281_v4 }
0x200d   : > { %1285 = vmin.xlane.f32.xlu1 %v1284_v3 }
0x209a   : > { %v1286_v5 = vpop.xlane.xlu1 %1285 }
0x209b   : > { %vm1287_vm8 = vcmp.eq.f32.partialorder %v1284_v3, %v1286_v5  ;;  %v1292_v8 = vcvt.f32.s32 %v1286_v5 }
0x209c   : > { %v1288_v7 = vsel %vm1287_vm8, %v1283_v6, inf }
0x209d   : > { %1289 = vmin.xlane.f32.xlu0 %v1288_v7  ;;  %v1293_v14 = vshll.u32 %v1292_v8, 16 }
0x212a   : > { %v1290_v9 = vpop.xlane.xlu0 %1289 }
0x212b   : > { %v1291_v15 = vcvt.f32.s32 %v1290_v9 }
0x212d   : > { %v1294_v10 = vadd.s32 %v1293_v14, %v1291_v15 }
0x212f   : > { %v1298_v12 = vsel %vm1295_vm10, %v1294_v10, %v1272_v61  ;;  %vm1299_vm11 = vcmp.eq.s32.totalorder %v4676_v21, %v1294_v10 }
0x2130   : > { %v1300_v16 = vsel %vm1299_vm11, -1e+30, %v1274_v35 }
0x2131   : > { %v1301_v13 = vsel %vm832_vm9, %v1300_v16, -inf }
0x2132   : > { %1302 = vmax.xlane.f32.xlu1 %v1301_v13 }
0x21bf   : > { %v1303_v17 = vpop.xlane.xlu1 %1302 }
0x21c0   : > { %vm1304_vm12 = vcmp.eq.f32.partialorder %v1300_v16, %v1303_v17  ;;  %v1351_v17 = vld [vmem:[%s4499_s1] sm:$0xff] }
0x21c1   : > { %v1305_v18 = vsel %vm1304_vm12, %v4676_v21, 32 }
0x21c2   : > { %v1306_v19 = vsel %vm832_vm9, %v1305_v18, 2147483647  ;;  %v1352_v18 = vld [vmem:[%s4499_s1 + $0x8] sm:$0xff] }
0x21c3   : > { %v1308_v20 = vshra.s32 %v1306_v19, 16  ;;  %v1307_v23 = vand.u32 65535, %v1306_v19  ;;  %v4859_v19 = vpack.c.bf16 %v1352_v18, %v1351_v17 }
0x21c5   : > { %v1310_v22 = vcvt.s32.f32 %v1308_v20  ;;  %v1309_v25 = vcvt.s32.f32 %v1307_v23  ;;  %3696 = vmatprep.subr.bf16.mxu0 %v4859_v19  ;;  %v1353_v20 = vld [vmem:[%s4499_s1 + $0x10] sm:$0xff] }
0x21c6   : > { %3697 = vmatpush3.bf16.msra.mxu0 %v4859_v19 }
0x21c7   : > { %1311 = vmin.xlane.f32.xlu0 %v1310_v22 }
0x2254   : > { %v1312_v24 = vpop.xlane.xlu0 %1311 }
0x2255   : > { %vm1313_vm13 = vcmp.eq.f32.partialorder %v1310_v22, %v1312_v24  ;;  %v1318_v28 = vcvt.f32.s32 %v1312_v24  ;;  %v1354_v22 = vld [vmem:[%s4499_s1 + $0x18] sm:$0xff]  ;;  %v1357_v24 = vld [vmem:[%s4507_s12] sm:$0xff] }
0x2256   : > { %v1314_v26 = vsel %vm1313_vm13, %v1309_v25, inf  ;;  %v4865_v23 = vpack.c.bf16 %v1354_v22, %v1353_v20  ;;  %v1358_v25 = vld [vmem:[%s4507_s12 + $0x8] sm:$0xff] }
0x2257   : > { %1315 = vmin.xlane.f32.xlu1 %v1314_v26  ;;  %v1319_v30 = vshll.u32 %v1318_v28, 16  ;;  %v1359_v26 = vld [vmem:[%s4507_s12 + $0x10] sm:$0xff]  ;;  %v4872_v28 = vpack.c.bf16 %v1358_v25, %v1357_v24 }
0x2258   : > { %3698 = vmatprep.subr.bf16.mxu0 %v4865_v23 }
0x2259   : > { %3699 = vmatpush3.bf16.msra.mxu0 %v4865_v23  ;;  %3896 = vmatprep.subr.msk.bf16.mxu1 %vm355_vm0, %v4872_v28 }
0x22e4   : > { %v1316_v29 = vpop.xlane.xlu1 %1315 }
0x22e5   : > { %v1317_v31 = vcvt.f32.s32 %v1316_v29  ;;  %v1360_v29 = vld [vmem:[%s4507_s12 + $0x18] sm:$0xff] }
0x22e7   : > { %v1320_v32 = vadd.s32 %v1319_v30, %v1317_v31  ;;  %v4875_v30 = vpack.c.bf16 %v1360_v29, %v1359_v26  ;;  %v1480_v31 = vsel %vm355_vm0, %v4872_v28, 0 }
0x22e8   : > { %3705 = vmatpush3.bf16.xpose.msra.mxu1 %v1480_v31 }
0x22e9   : > { %v1324_v33 = vsel %vm1321_vm14, %v1320_v32, %v1298_v12  ;;  %vm1325_vm15 = vcmp.eq.s32.totalorder %v4676_v21, %v1320_v32  ;;  %3897 = vmatprep.subr.msk.bf16.mxu1 %vm355_vm0, %v4875_v30  ;;  %v4884_v32 = vcvt.s32.f32 %v4676_v21 }
0x22ea   : > { %v1326_v38 = vsel %vm1325_vm15, -1e+30, %v1300_v16  ;;  %vm329_vm15 = vcmp.le.s32.totalorder %v4676_v21, %v4647_v27 }
0x22eb   : > { %v1327_v11 = vsel %vm832_vm9, %v1326_v38, -inf }
0x22ec   : > { %1328 = vmax.xlane.f32.xlu0 %v1327_v11  ;;  %v4234_v11 = vmov 0.0  }
0x2379   : > { %v1329_v39 = vpop.xlane.xlu0 %1328 }
0x237a   : > { %vm1330_vm1 = vcmp.eq.f32.partialorder %v1326_v38, %v1329_v39 }
0x237b   : > { %v1331_v40 = vsel %vm1330_vm1, %v4676_v21, 32  ;;  %vm330_vm1 = vcmp.le.s32.totalorder %v4676_v21, %v4780_v54 }
0x237c   : > { %v1332_v41 = vsel %vm832_vm9, %v1331_v40, 2147483647  ;;  %vm1371_vm9 = vcmp.eq.s32.totalorder %v4676_v21, %v4780_v54 }
0x237d   : > { %v1334_v42 = vshra.s32 %v1332_v41, 16  ;;  %v1333_v44 = vand.u32 65535, %v1332_v41 }
0x237f   : > { %v1336_v43 = vcvt.s32.f32 %v1334_v42  ;;  %v1335_v34 = vcvt.s32.f32 %v1333_v44 }
0x2381   : > { %1337 = vmin.xlane.f32.xlu1 %v1336_v43 }
0x240e   : > { %v1338_v45 = vpop.xlane.xlu1 %1337 }
0x240f   : > { %vm1339_vm2 = vcmp.eq.f32.partialorder %v1336_v43, %v1338_v45  ;;  %v1344_v47 = vcvt.f32.s32 %v1338_v45  ;;  %v1483_v45 = vsel %vm355_vm0, %v4875_v30, 0 }
0x2410   : > { %v1340_v46 = vsel %vm1339_vm2, %v1335_v34, inf  ;;  %3707 = vmatpush3.bf16.xpose.msra.mxu1 %v1483_v45  ;;  %vm331_vm2 = vcmp.le.s32.totalorder %v4676_v21, %v4784_v57 }
0x2411   : > { %1341 = vmin.xlane.f32.xlu0 %v1340_v46  ;;  %v1345_v36 = vshll.u32 %v1344_v47, 16 }
0x249e   : > { %v1342_v48 = vpop.xlane.xlu0 %1341 }
0x249f   : > { %v1343_v49 = vcvt.f32.s32 %v1342_v48 }
0x24a1   : > { %v1346_v53 = vadd.s32 %v1345_v36, %v1343_v49 }
0x24a3   : > { %v1350_v56 = vsel %vm1347_vm3, %v1346_v53, %v1324_v33 }
0x24a4   : > { %v1369_v37 = vcvt.s32.f32 %v1350_v56  ;;  %v4786_v58 = vrot.slane %v1350_v56, %v1375_v50  ;;  %v4788_v59 = vrot.slane %v1350_v56, %v1835_v51  ;;  %v4790_v60 = vrot.slane %v1350_v56, %v2327_v52 }
0x24a5   : > { %v4796_v61 = vrot.slane %v1350_v56, %v2819_v55 }
0x24a6   : > { %v1376_v35 = vrot.slane %v1369_v37, %v1375_v50  ;;  %v1836_v62 = vrot.slane %v1369_v37, %v1835_v51  ;;  %v2328_v7 = vrot.slane %v1369_v37, %v2327_v52  ;;  %v2820_v10 = vrot.slane %v1369_v37, %v2819_v55 }
0x24a7   : > { %vm1405_vm11 = vcmp.eq.s32.totalorder %v4647_v27, %v4786_v58 }
0x24a8   : > { %v1378_v63 = vsel %vm1371_vm9, %v1376_v35, 0.0  ;;  %v1377_v0 = vsel %vm1370_vm4, %v1376_v35, 0.0  ;;  %v4809_v1 = vsel %vm1370_vm4, %v1836_v62, 0.0  ;;  %v1379_v4 = vsel %vm1372_vm6, %v1376_v35, 0.0 }
0x24a9   : > { %v1384_v2 = vsel %vm1380_vm5, %v1378_v63, 0.0  ;;  %v1381_v3 = vsel %vm1380_vm5, %v1377_v0, 0.0  ;;  %v4819_v5 = vsel %vm1371_vm9, %v1836_v62, 0.0  ;;  %v4824_v6 = vsel %vm1372_vm6, %v1836_v62, 0.0 }
0x24aa   : > { %1385 = vadd.xlane.f32.xlu0 %v1384_v2  ;;  %1382 = vadd.xlane.f32.xlu1 %v1381_v3  ;;  %v1387_v8 = vsel %vm1380_vm5, %v1379_v4, 0.0  ;;  %v4830_v9 = vsel %vm1370_vm4, %v2328_v7, 0.0  ;;  %v4835_v14 = vsel %vm1372_vm6, %v2328_v7, 0.0  ;;  %v4840_v15 = vsel %vm1371_vm9, %v2328_v7, 0.0 }
0x24ab   : > { %v4845_v12 = vsel %vm1371_vm9, %v2820_v10, 0.0  ;;  %v4850_v16 = vsel %vm1372_vm6, %v2820_v10, 0.0  ;;  %v4855_v13 = vsel %vm1370_vm4, %v2820_v10, 0.0  ;;  %v4901_v50 = vsel %vm1405_vm11, 1.0, %v4234_v11 }
0x24ac   : > { %vm1864_vm11 = vcmp.eq.s32.totalorder %v4647_v27, %v4788_v59 }
0x24ae   : > { %1388 = vadd.xlane.f32.xlu1 %v1387_v8 }
0x2537   : > { %v1386_v33 = vpop.xlane.xlu0 %1385  ;;  %v1383_v38 = vpop.xlane.xlu1 %1382 }
0x2538   : > { %vm1391_vm7 = vcmp.eq.f32.partialorder %v4884_v32, %v1386_v33  ;;  %vm1390_vm8 = vcmp.eq.f32.partialorder %v4884_v32, %v1383_v38  ;;  %vm1536_vm12 = vcmp.le.f32.partialorder %v4884_v32, %v1383_v38  ;;  %vm1537_vm13 = vcmp.le.f32.partialorder %v4884_v32, %v1386_v33 }
0x2539   : > { %v3463_v39 = vsel %vm1391_vm7, 1.0, %v4234_v11  ;;  %v3462_v40 = vsel %vm1390_vm8, 1.0, %v4234_v11  ;;  %vm1406_vm7 = vcmp.eq.s32.totalorder %v4780_v54, %v4786_v58  ;;  %vm1407_vm8 = vcmp.eq.s32.totalorder %v4784_v57, %v4786_v58 }
0x253a   : > { %v1399_v41 = vpack.c.bf16 %v3463_v39, %v3462_v40  ;;  %v1840_v40 = vsel %vm1380_vm5, %v4809_v1, 0.0 }
0x253b   : > { %v1389_v42 = vpop.xlane.xlu1 %1388 }
0x253c   : > { %vm1392_vm10 = vcmp.eq.f32.partialorder %v4884_v32, %v1389_v42  ;;  %3700 = vmatprep.mubr.msk.bf16.mxu0 %vm355_vm0, %v1399_v41  ;;  %vm1538_vm14 = vcmp.le.f32.partialorder %v4884_v32, %v1389_v42  ;;  %v1843_v41 = vsel %vm1380_vm5, %v4819_v5, 0.0  ;;  %v1846_v42 = vsel %vm1380_vm5, %v4824_v6, 0.0 }
0x253d   : > { %v3464_v43 = vsel %vm1392_vm10, 1.0, %v4234_v11  ;;  %v3450_v5 = vsel %vm329_vm15, 1.0, %v4234_v11  ;;  %v3451_v6 = vsel %vm330_vm1, 1.0, %v4234_v11 }
0x253e   : > { %v1400_v44 = vpack.c.bf16 %v3464_v43, %v3464_v43  ;;  %v1363_v43 = vld [vmem:[%s4514_s15] sm:$0xff] }
0x2540   : > { %3701 = vmatmul.mubr.msk.bf16.vlgmr.msra.gmra.mrb[8].mxu0 %vm355_vm0, %v1400_v44  ;;  %v1364_v44 = vld [vmem:[%s4514_s15 + $0x8] sm:$0xff] }
0x2541   : > { %v4922_v45 = vpack.c.bf16 %v1364_v44, %v1363_v43 }
0x2543   : > { %3712 = vmatprep.subr.bf16.mxu0 %v4922_v45 }
0x2544   : > { %3713 = vmatpush3.bf16.msra.mxu0 %v4922_v45 }
0x2613   : > { %v3702_v34 = vpop.f32.mrb[8].mxu0 }
0x2614   : > { %v1457_v46 = vpop.f32.mrb[9].mxu0  ;;  %v1472_v49 = vpack.c.bf16 %v3702_v34, %v3702_v34  ;;  %v1365_v34 = vld [vmem:[%s4514_s15 + $0x10] sm:$0xff] }
0x2615   : > { %v3703_v47 = vpop.f32.mrb[10].mxu0 }
0x2616   : > { %v1460_v48 = vpop.f32.mrb[11].mxu0  ;;  %v4931_v47 = vadd.s32 24, %v4647_v27 }
0x2617   : > { %v1471_v36 = vpack.c.bf16 %v1460_v48, %v1457_v46  ;;  %v1366_v46 = vld [vmem:[%s4514_s15 + $0x18] sm:$0xff]  ;;  %v4945_v48 = vpack.c.bf16 %v3451_v6, %v3450_v5  ;;  %v5001_v5 = vsel %vm1406_vm7, 1.0, %v4234_v11 }
0x2618   : > { %v4928_v1 = vpack.c.bf16 %v1366_v46, %v1365_v34  ;;  %vm332_vm3 = vcmp.le.s32.totalorder %v4676_v21, %v4931_v47  ;;  %vm1408_vm10 = vcmp.eq.s32.totalorder %v4931_v47, %v4786_v58 }
0x2619   : > { %3708 = vmatprep.mubr.msk.bf16.mxu1 %vm355_vm0, %v1471_v36  ;;  %v3452_v36 = vsel %vm331_vm2, 1.0, %v4234_v11  ;;  %3716 = vmatprep.mubr.msk.bf16.mxu0 %vm355_vm0, %v4945_v48 }
0x261a   : > { %3709 = vmatmul.mubr.msk.bf16.vlgmr.msra.gmra.mrb[8].mxu1 %vm355_vm0, %v1472_v49  ;;  %3714 = vmatprep.subr.bf16.mxu0 %v4928_v1  ;;  %v3453_v49 = vsel %vm332_vm3, 1.0, %v4234_v11  ;;  %vm1865_vm3 = vcmp.eq.s32.totalorder %v4780_v54, %v4788_v59 }
0x261b   : > { %3734 = vmatprep.mubr.msk.f32.mxu1 %vm1380_vm5, %v4901_v50  ;;  %3715 = vmatpush3.bf16.msra.mxu0 %v4928_v1 }
0x261c   : > { %3720 = vmatprep.subr.bf16.mxu0 %v4922_v45 }
0x26ed   : > { %v3710_v51 = vpop.f32.mrb[8].mxu1 }
0x26ee   : > { %v1519_v52 = vpop.f32.mrb[9].mxu1  ;;  %v1535_v53 = vmul.f32 0.17677669, %v3710_v51  ;;  %v4949_v51 = vpack.c.bf16 %v3453_v49, %v3452_v36  ;;  %v5006_v36 = vsel %vm1407_vm8, 1.0, %v4234_v11  ;;  %v5014_v49 = vsel %vm1408_vm10, 1.0, %v4234_v11 }
0x26ef   : > { %v1533_v55 = vmul.f32 0.17677669, %v1519_v52  ;;  %v3711_v56 = vpop.f32.mrb[10].mxu1 }
0x26f0   : > { %v1522_v37 = vpop.f32.mrb[11].mxu1  ;;  %v1541_v2 = vsel %vm1538_vm14, %v1535_v53, -1e+30  ;;  %3717 = vmatmul.mubr.msk.bf16.vlgmr.msra.gmra.mrb[12].mxu0 %vm355_vm0, %v4949_v51 }
0x26f1   : > { %v1534_v35 = vmul.f32 0.17677669, %v1522_v37  ;;  %v1539_v62 = vsel %vm1536_vm12, %v1533_v55, -1e+30  ;;  %v1603_v4 = vsel %vm355_vm0, %v1541_v2, -inf  ;;  %3721 = vmatpush3.bf16.msra.mxu0 %v4922_v45 }
0x26f2   : > { %v1597_v63 = vsel %vm355_vm0, %v1539_v62, -inf  ;;  %3722 = vmatprep.subr.bf16.mxu0 %v4928_v1 }
0x26f3   : > { %1598 = vmax.xlane.f32.xlu0 %v1597_v63  ;;  %v1540_v0 = vsel %vm1537_vm13, %v1534_v35, -1e+30 }
0x26f4   : > { %v1600_v3 = vsel %vm355_vm0, %v1540_v0, -inf }
0x26f5   : > { %1601 = vmax.xlane.f32.xlu1 %v1600_v3  ;;  %3723 = vmatpush3.bf16.msra.mxu0 %v4928_v1 }
0x26f7   : > { %1604 = vmax.xlane.f32.xlu0 %v1603_v4 }
0x2780   : > { %v1599_v7 = vpop.xlane.xlu0 %1598 }
0x2781   : > { %v1606_v8 = vsub.f32 %v1539_v62, %v1599_v7 }
0x2782   : > { %v1602_v10 = vpop.xlane.xlu1 %1601 }
0x2783   : > { %v1609_v17 = vmul.f32 1.442695, %v1606_v8  ;;  %v1607_v18 = vsub.f32 %v1540_v0, %v1602_v10 }
0x2784   : > { %v1605_v20 = vpop.xlane.xlu0 %1604 }
0x2785   : > { %3981 = vpow2.f32 %v1609_v17  ;;  %v1611_v22 = vmul.f32 1.442695, %v1607_v18  ;;  %v1608_v24 = vsub.f32 %v1541_v2, %v1605_v20 }
0x2787   : > { %3983 = vpow2.f32 %v1611_v22  ;;  %v1613_v25 = vmul.f32 1.442695, %v1608_v24 }
0x2789   : > { %3985 = vpow2.f32 %v1613_v25 }
0x278f   : > { %v3982_v26 = vpop.eup %3981 }
0x2790   : > { %v1615_v29 = vsel %vm355_vm0, %v3982_v26, 0.0 }
0x2791   : > { %v3984_v31 = vpop.eup %3983  ;;  %1616 = vadd.xlane.f32.xlu1 %v1615_v29 }
0x2792   : > { %v1618_v33 = vsel %vm355_vm0, %v3984_v31, 0.0 }
0x2793   : > { %v3986_v38 = vpop.eup %3985  ;;  %1619 = vadd.xlane.f32.xlu0 %v1618_v33 }
0x2794   : > { %v1621_v39 = vsel %vm355_vm0, %v3986_v38, 0.0 }
0x2795   : > { %1622 = vadd.xlane.f32.xlu1 %v1621_v39 }
0x2797   : > { %1841 = vadd.xlane.f32.xlu0 %v1840_v40 }
0x2799   : > { %1844 = vadd.xlane.f32.xlu1 %v1843_v41 }
0x279b   : > { %1847 = vadd.xlane.f32.xlu0 %v1846_v42 }
0x27aa   : > { %1878 = vrot.lane.b32.xlu1 %v4859_v19, %s4231_s11 }
0x27ae   : > { %1942 = vrot.lane.b32.xlu1 %v4872_v28, %s4231_s11 }
0x27b1   : > { %1880 = vrot.lane.b32.xlu0 %v4865_v23, %s4231_s11 }
0x27b2   : > { %1944 = vrot.lane.b32.xlu1 %v4875_v30, %s4231_s11 }
0x27c3   : > { %v4988_v25 = vpop.f32.mrb[12].mxu0 }
0x281e   : > { %v1617_v21 = vpop.xlane.xlu1 %1616 }
0x281f   : > { %3987 = vrcp.f32 %v1617_v21 }
0x2820   : > { %v1620_v52 = vpop.xlane.xlu0 %1619 }
0x2821   : > { %3989 = vrcp.f32 %v1620_v52 }
0x2822   : > { %v1623_v53 = vpop.xlane.xlu1 %1622 }
0x2823   : > { %3991 = vrcp.f32 %v1623_v53 }
0x2824   : > { %v4969_v56 = vpop.xlane.xlu0 %1841 }
0x2825   : > { %vm1849_vm4 = vcmp.eq.f32.partialorder %v4884_v32, %v4969_v56  ;;  %vm2009_vm13 = vcmp.le.f32.partialorder %v4884_v32, %v4969_v56 }
0x2826   : > { %v4967_v55 = vpop.xlane.xlu1 %1844  ;;  %v3481_v10 = vsel %vm1849_vm4, 1.0, %v4234_v11  ;;  %vm1867_vm4 = vcmp.eq.s32.totalorder %v4931_v47, %v4788_v59 }
0x2827   : > { %vm1850_vm9 = vcmp.eq.f32.partialorder %v4884_v32, %v4967_v55  ;;  %vm2010_vm14 = vcmp.le.f32.partialorder %v4884_v32, %v4967_v55 }
0x2828   : > { %v4975_v3 = vpop.xlane.xlu0 %1847  ;;  %v3482_v7 = vsel %vm1850_vm9, 1.0, %v4234_v11  ;;  %vm1866_vm9 = vcmp.eq.s32.totalorder %v4784_v57, %v4788_v59 }
0x2829   : > { %v3988_v37 = vpop.eup %3987  ;;  %v1858_v18 = vpack.c.bf16 %v3482_v7, %v3481_v10  ;;  %vm1851_vm6 = vcmp.eq.f32.partialorder %v4884_v32, %v4975_v3  ;;  %vm2011_vm12 = vcmp.le.f32.partialorder %v4884_v32, %v4975_v3 }
0x282a   : > { %v1879_v35 = vpop.permute.xlu1 %1878  ;;  %v1627_v63 = vmul.f32 %v3988_v37, %v3982_v26  ;;  %v3483_v22 = vsel %vm1851_vm6, 1.0, %v4234_v11  ;;  %v4990_v26 = vpop.f32.mrb[13].mxu0  ;;  %v5026_v37 = vsel %vm1864_vm11, 1.0, %v4234_v11  ;;  %vm2356_vm6 = vcmp.eq.s32.totalorder %v4647_v27, %v4790_v60 }
0x282b   : > { %v3990_v62 = vpop.eup %3989  ;;  %3740 = vmatprep.subr.bf16.mxu0 %v1879_v35  ;;  %v1859_v24 = vpack.c.bf16 %v3483_v22, %v3483_v22  ;;  %v4992_v29 = vpop.f32.mrb[14].mxu0 }
0x282c   : > { %v1628_v0 = vmul.f32 %v3990_v62, %v3984_v31  ;;  %v1881_v20 = vpop.permute.xlu0 %1880  ;;  %v4994_v31 = vpop.f32.mrb[15].mxu0 }
0x282d   : > { %v3992_v2 = vpop.eup %3991 }
0x282e   : > { %v1629_v4 = vmul.f32 %v3992_v2, %v3986_v38  ;;  %v1630_v8 = vpack.c.bf16 %v1628_v0, %v1627_v63  ;;  %v1943_v44 = vpop.permute.xlu1 %1942 }
0x282f   : > { %v1953_v21 = vsel %vm355_vm0, %v1943_v44, 0 }
0x2830   : > { %3724 = vmatprep.mubr.msk.bf16.mxu0 %vm355_vm0, %v1630_v8  ;;  %v1631_v17 = vpack.c.bf16 %v1629_v4, %v1629_v4 }
0x2832   : > { %3725 = vmatmul.mubr.msk.bf16.vlgmr.msra.gmra.mrb[16].mxu0 %vm355_vm0, %v1631_v17  ;;  %v1945_v52 = vpop.permute.xlu1 %1944 }
0x2833   : > { %3741 = vmatpush3.bf16.msra.mxu0 %v1879_v35  ;;  %3744 = vmatprep.mubr.msk.bf16.mxu0 %vm355_vm0, %v1858_v18  ;;  %v1956_v58 = vsel %vm355_vm0, %v1945_v52, 0 }
0x2834   : > { %3742 = vmatprep.subr.bf16.mxu0 %v1881_v20 }
0x2837   : > { %3743 = vmatpush3.bf16.msra.mxu0 %v1881_v20 }
0x283a   : > { %3745 = vmatmul.mubr.msk.bf16.vlgmr.msra.gmra.mrb[20].mxu0 %vm355_vm0, %v1859_v24 }
0x283b   : > { %3760 = vmatprep.mubr.msk.bf16.mxu0 %vm355_vm0, %v4945_v48 }
0x2905   : > { %v3726_v33 = vpop.f32.mrb[16].mxu0 }
0x2906   : > { %v1672_v38 = vpop.f32.mrb[17].mxu0 }
0x2907   : > { %v3727_v39 = vpop.f32.mrb[18].mxu0 }
0x2908   : > { %v1675_v40 = vpop.f32.mrb[19].mxu0 }
0x2909   : > { %v3872_v41 = vpack.c.bf16 %v1675_v40, %v1672_v38 }
0x290b   : > { %3873 = vmatprep.subr.bf16.mxu1 %v3872_v41 }
0x290c   : > { %3875 = vmatpush3.bf16.msra.mxu1 %v3872_v41 }
0x290d   : > { %3732 = vmatprep.subr.mxu1 %v3726_v33  ;;  %v3746_v42 = vpop.f32.mrb[20].mxu0 }
0x290e   : > { %v1924_v43 = vpop.f32.mrb[21].mxu0  ;;  %v1939_v53 = vpack.c.bf16 %v3746_v42, %v3746_v42 }
0x290f   : > { %v3747_v34 = vpop.f32.mrb[22].mxu0 }
0x2910   : > { %3733 = vmatpush3.msra.mxu1 %v3726_v33  ;;  %v1927_v46 = vpop.f32.mrb[23].mxu0 }
0x2911   : > { %v1938_v6 = vpack.c.bf16 %v1927_v46, %v1924_v43  ;;  %3735 = vmatmul.mubr.msk.f32.vlgmr.msra.gmra.mrb[12].mxu1 %vm1380_vm5, %v5001_v5  ;;  %3898 = vmatprep.subr.msk.bf16.mxu1 %vm355_vm0, %v1943_v44 }
0x2912   : > { %3737 = vmatprep.mubr.msk.f32.mxu1 %vm1380_vm5, %v5006_v36 }
0x2915   : > { %3738 = vmatmul.mubr.msk.f32.gmra.mrb[14].mxu1 %vm1380_vm5, %v5014_v49 }
0x2916   : > { %3752 = vmatprep.mubr.msk.bf16.mxu1 %vm355_vm0, %v1938_v6 }
0x2917   : > { %3749 = vmatpush3.bf16.xpose.msra.mxu1 %v1953_v21 }
0x2918   : > { %3899 = vmatprep.subr.msk.bf16.mxu1 %vm355_vm0, %v1945_v52 }
0x291f   : > { %3751 = vmatpush3.bf16.xpose.msra.mxu1 %v1956_v58 }
0x2926   : > { %3753 = vmatmul.mubr.msk.bf16.vlgmr.msra.gmra.mrb[16].mxu1 %vm355_vm0, %v1939_v53 }
0x2927   : > { %3778 = vmatprep.mubr.msk.f32.mxu1 %vm1380_vm5, %v5026_v37 }
0x29e4   : > { %v5030_v35 = vpop.f32.mrb[12].mxu1 }
0x29e5   : > { %v5032_v62 = vpop.f32.mrb[13].mxu1 }
0x29e8   : > { %v5034_v63 = vpop.f32.mrb[14].mxu1 }
0x29e9   : > { %v5036_v0 = vpop.f32.mrb[15].mxu1 }
0x29f9   : > { %v3754_v2 = vpop.f32.mrb[16].mxu1 }
0x29fa   : > { %v2008_v4 = vmul.f32 0.17677669, %v3754_v2  ;;  %v1992_v7 = vpop.f32.mrb[17].mxu1  ;;  %v2332_v2 = vsel %vm1380_vm5, %v4830_v9, 0.0 }
0x29fb   : > { %v2006_v8 = vmul.f32 0.17677669, %v1992_v7  ;;  %v3755_v10 = vpop.f32.mrb[18].mxu1  ;;  %v2335_v7 = vsel %vm1380_vm5, %v4840_v15, 0.0 }
0x29fc   : > { %v1995_v17 = vpop.f32.mrb[19].mxu1  ;;  %v2014_v18 = vsel %vm2011_vm12, %v2008_v4, -1e+30  ;;  %v2338_v4 = vsel %vm1380_vm5, %v4835_v14, 0.0 }
0x29fd   : > { %v2007_v20 = vmul.f32 0.17677669, %v1995_v17  ;;  %v2012_v22 = vsel %vm2009_vm13, %v2006_v8, -1e+30  ;;  %v2078_v3 = vsel %vm355_vm0, %v2014_v18, -inf }
0x29fe   : > { %v2072_v24 = vsel %vm355_vm0, %v2012_v22, -inf }
0x29ff   : > { %2073 = vmax.xlane.f32.xlu0 %v2072_v24  ;;  %v2013_v33 = vsel %vm2010_vm14, %v2007_v20, -1e+30  ;;  %vm2357_vm14 = vcmp.eq.s32.totalorder %v4780_v54, %v4790_v60 }
0x2a00   : > { %v2075_v38 = vsel %vm355_vm0, %v2013_v33, -inf }
0x2a01   : > { %2076 = vmax.xlane.f32.xlu1 %v2075_v38 }
0x2a03   : > { %2079 = vmax.xlane.f32.xlu0 %v2078_v3 }
0x2a8c   : > { %v2074_v39 = vpop.xlane.xlu0 %2073 }
0x2a8d   : > { %v2081_v56 = vsub.f32 %v2012_v22, %v2074_v39 }
0x2a8e   : > { %v2077_v40 = vpop.xlane.xlu1 %2076 }
0x2a8f   : > { %v2082_v41 = vsub.f32 %v2013_v33, %v2077_v40  ;;  %v2084_v34 = vmul.f32 1.442695, %v2081_v56 }
0x2a90   : > { %v2080_v42 = vpop.xlane.xlu0 %2079 }
0x2a91   : > { %v2086_v43 = vmul.f32 1.442695, %v2082_v41  ;;  %v2083_v44 = vsub.f32 %v2014_v18, %v2080_v42 }
0x2a93   : > { %3993 = vpow2.f32 %v2086_v43  ;;  %v2088_v55 = vmul.f32 1.442695, %v2083_v44 }
0x2a95   : > { %3995 = vpow2.f32 %v2088_v55 }
0x2a96   : > { %3997 = vpow2.f32 %v2084_v34 }
0x2a9d   : > { %v3994_v46 = vpop.eup %3993 }
0x2a9e   : > { %v2093_v6 = vsel %vm355_vm0, %v3994_v46, 0.0 }
0x2a9f   : > { %v3996_v21 = vpop.eup %3995  ;;  %2094 = vadd.xlane.f32.xlu1 %v2093_v6 }
0x2aa0   : > { %v2096_v52 = vsel %vm355_vm0, %v3996_v21, 0.0  ;;  %v3998_v58 = vpop.eup %3997 }
0x2aa1   : > { %2097 = vadd.xlane.f32.xlu0 %v2096_v52  ;;  %v2090_v53 = vsel %vm355_vm0, %v3998_v58, 0.0 }
0x2aa5   : > { %2091 = vadd.xlane.f32.xlu0 %v2090_v53 }
0x2ab0   : > { %2017 = vrot.lane.b32.xlu1 %v4922_v45, %s4231_s11 }
0x2abb   : > { %2019 = vrot.lane.b32.xlu0 %v4928_v1, %s4231_s11 }
0x2ad4   : > { %2333 = vadd.xlane.f32.xlu1 %v2332_v2 }
0x2ad8   : > { %2339 = vadd.xlane.f32.xlu1 %v2338_v4 }
0x2ada   : > { %2336 = vadd.xlane.f32.xlu0 %v2335_v7 }
0x2ae9   : > { %2372 = vrot.lane.b32.xlu1 %v4865_v23, %s4232_s6 }
0x2aed   : > { %2434 = vrot.lane.b32.xlu1 %v4872_v28, %s4232_s6 }
0x2af0   : > { %2370 = vrot.lane.b32.xlu0 %v4859_v19, %s4232_s6 }
0x2af4   : > { %2436 = vrot.lane.b32.xlu0 %v4875_v30, %s4232_s6 }
0x2b2c   : > { %v2095_v9 = vpop.xlane.xlu1 %2094 }
0x2b2e   : > { %v2098_v8 = vpop.xlane.xlu0 %2097 }
0x2b2f   : > { %3999 = vrcp.f32 %v2098_v8 }
0x2b30   : > { %v2018_v14 = vpop.permute.xlu1 %2017  ;;  %4001 = vrcp.f32 %v2095_v9 }
0x2b31   : > { %3756 = vmatprep.subr.bf16.mxu0 %v2018_v14 }
0x2b32   : > { %v2092_v15 = vpop.xlane.xlu0 %2091  ;;  %3757 = vmatpush3.bf16.msra.mxu0 %v2018_v14 }
0x2b33   : > { %4003 = vrcp.f32 %v2092_v15  ;;  %v5109_v15 = vsel %vm1866_vm9, 1.0, %v4234_v11 }
0x2b36   : > { %v2020_v10 = vpop.permute.xlu0 %2019 }
0x2b37   : > { %3758 = vmatprep.subr.bf16.mxu0 %v2020_v10 }
0x2b38   : > { %3759 = vmatpush3.bf16.msra.mxu0 %v2020_v10 }
0x2b39   : > { %3764 = vmatprep.subr.bf16.mxu0 %v2018_v14  ;;  %v4000_v17 = vpop.eup %3999 }
0x2b3a   : > { %v4002_v18 = vpop.eup %4001  ;;  %v2104_v22 = vmul.f32 %v4000_v17, %v3996_v21 }
0x2b3b   : > { %3761 = vmatmul.mubr.msk.bf16.vlgmr.msra.gmra.mrb[24].mxu0 %vm355_vm0, %v4949_v51  ;;  %v2103_v33 = vmul.f32 %v4002_v18, %v3994_v46 }
0x2b3c   : > { %3765 = vmatpush3.bf16.msra.mxu0 %v2018_v14  ;;  %v2106_v3 = vpack.c.bf16 %v2104_v22, %v2104_v22  ;;  %v5104_v14 = vsel %vm1865_vm3, 1.0, %v4234_v11 }
0x2b3d   : > { %v4004_v20 = vpop.eup %4003  ;;  %3766 = vmatprep.subr.bf16.mxu0 %v2020_v10 }
0x2b3e   : > { %v2102_v24 = vmul.f32 %v4004_v20, %v3998_v58 }
0x2b40   : > { %3767 = vmatpush3.bf16.msra.mxu0 %v2020_v10  ;;  %v2105_v38 = vpack.c.bf16 %v2103_v33, %v2102_v24  ;;  %v5117_v10 = vsel %vm1867_vm4, 1.0, %v4234_v11 }
0x2b42   : > { %3768 = vmatprep.mubr.msk.bf16.mxu0 %vm355_vm0, %v2105_v38 }
0x2b43   : > { %3769 = vmatmul.mubr.msk.bf16.vlgmr.msra.gmra.mrb[28].mxu0 %vm355_vm0, %v2106_v3 }
0x2b61   : > { %v5072_v39 = vpop.xlane.xlu1 %2333 }
0x2b62   : > { %vm2341_vm15 = vcmp.eq.f32.partialorder %v4884_v32, %v5072_v39  ;;  %vm2501_vm8 = vcmp.le.f32.partialorder %v4884_v32, %v5072_v39 }
0x2b63   : > { %v3500_v41 = vsel %vm2341_vm15, 1.0, %v4234_v11  ;;  %vm2358_vm15 = vcmp.eq.s32.totalorder %v4784_v57, %v4790_v60 }
0x2b65   : > { %v5076_v40 = vpop.xlane.xlu1 %2339 }
0x2b66   : > { %vm2343_vm2 = vcmp.eq.f32.partialorder %v4884_v32, %v5076_v40  ;;  %vm2503_vm7 = vcmp.le.f32.partialorder %v4884_v32, %v5076_v40 }
0x2b67   : > { %v5078_v56 = vpop.xlane.xlu0 %2336  ;;  %v3502_v55 = vsel %vm2343_vm2, 1.0, %v4234_v11  ;;  %vm2848_vm2 = vcmp.eq.s32.totalorder %v4647_v27, %v4796_v61 }
0x2b68   : > { %vm2342_vm1 = vcmp.eq.f32.partialorder %v4884_v32, %v5078_v56  ;;  %v2351_v46 = vpack.c.bf16 %v3502_v55, %v3502_v55  ;;  %vm2502_vm10 = vcmp.le.f32.partialorder %v4884_v32, %v5078_v56 }
0x2b69   : > { %v3501_v42 = vsel %vm2342_vm1, 1.0, %v4234_v11  ;;  %v2373_v34 = vpop.permute.xlu1 %2372  ;;  %vm2359_vm1 = vcmp.eq.s32.totalorder %v4931_v47, %v4790_v60 }
0x2b6a   : > { %v2350_v43 = vpack.c.bf16 %v3501_v42, %v3500_v41  ;;  %v5129_v41 = vsel %vm2356_vm6, 1.0, %v4234_v11  ;;  %vm2850_vm6 = vcmp.eq.s32.totalorder %v4784_v57, %v4796_v61 }
0x2b6b   : > { %v2371_v44 = vpop.permute.xlu0 %2370 }
0x2b6c   : > { %3784 = vmatprep.subr.bf16.mxu0 %v2371_v44  ;;  %3788 = vmatprep.mubr.msk.bf16.mxu0 %vm355_vm0, %v2350_v43 }
0x2b6d   : > { %3785 = vmatpush3.bf16.msra.mxu0 %v2371_v44  ;;  %v2435_v8 = vpop.permute.xlu1 %2434 }
0x2b6e   : > { %3786 = vmatprep.subr.bf16.mxu0 %v2373_v34  ;;  %v2445_v17 = vsel %vm355_vm0, %v2435_v8, 0 }
0x2b6f   : > { %v2437_v18 = vpop.permute.xlu0 %2436 }
0x2b70   : > { %v2448_v20 = vsel %vm355_vm0, %v2437_v18, 0 }
0x2b71   : > { %3787 = vmatpush3.bf16.msra.mxu0 %v2373_v34 }
0x2b74   : > { %3789 = vmatmul.mubr.msk.bf16.vlgmr.msra.gmra.mrb[32].mxu0 %vm355_vm0, %v2351_v46 }
0x2b75   : > { %3804 = vmatprep.mubr.msk.bf16.mxu0 %vm355_vm0, %v4945_v48 }
0x2c0e   : > { %v5091_v6 = vpop.f32.mrb[24].mxu0 }
0x2c0f   : > { %v5093_v21 = vpop.f32.mrb[25].mxu0 }
0x2c10   : > { %v5095_v52 = vpop.f32.mrb[26].mxu0 }
0x2c11   : > { %v5097_v58 = vpop.f32.mrb[27].mxu0 }
0x2c16   : > { %v3770_v53 = vpop.f32.mrb[28].mxu0 }
0x2c17   : > { %v2147_v2 = vpop.f32.mrb[29].mxu0 }
0x2c18   : > { %v3771_v4 = vpop.f32.mrb[30].mxu0 }
0x2c19   : > { %v2150_v7 = vpop.f32.mrb[31].mxu0 }
0x2c1a   : > { %v3876_v9 = vpack.c.bf16 %v2150_v7, %v2147_v2 }
0x2c1c   : > { %3877 = vmatprep.subr.bf16.mxu1 %v3876_v9 }
0x2c1d   : > { %3879 = vmatpush3.bf16.msra.mxu1 %v3876_v9 }
0x2c1e   : > { %3776 = vmatprep.subr.mxu1 %v3770_v53 }
0x2c21   : > { %3777 = vmatpush3.msra.mxu1 %v3770_v53 }
0x2c22   : > { %3779 = vmatmul.mubr.msk.f32.vlgmr.msra.gmra.mrb[20].mxu1 %vm1380_vm5, %v5104_v14  ;;  %3900 = vmatprep.subr.msk.bf16.mxu1 %vm355_vm0, %v2435_v8 }
0x2c23   : > { %3781 = vmatprep.mubr.msk.f32.mxu1 %vm1380_vm5, %v5109_v15 }
0x2c26   : > { %3782 = vmatmul.mubr.msk.f32.gmra.mrb[22].mxu1 %vm1380_vm5, %v5117_v10 }
0x2c28   : > { %3793 = vmatpush3.bf16.xpose.msra.mxu1 %v2445_v17 }
0x2c29   : > { %3901 = vmatprep.subr.msk.bf16.mxu1 %vm355_vm0, %v2437_v18 }
0x2c30   : > { %3795 = vmatpush3.bf16.xpose.msra.mxu1 %v2448_v20 }
0x2c47   : > { %v3790_v59 = vpop.f32.mrb[32].mxu0 }
0x2c48   : > { %v2416_v22 = vpop.f32.mrb[33].mxu0  ;;  %v2431_v3 = vpack.c.bf16 %v3790_v59, %v3790_v59 }
0x2c49   : > { %v3791_v24 = vpop.f32.mrb[34].mxu0 }
0x2c4a   : > { %v2419_v33 = vpop.f32.mrb[35].mxu0 }
0x2c4b   : > { %v2430_v38 = vpack.c.bf16 %v2419_v33, %v2416_v22 }
0x2c4d   : > { %3796 = vmatprep.mubr.msk.bf16.mxu1 %vm355_vm0, %v2430_v38 }
0x2c4e   : > { %3797 = vmatmul.mubr.msk.bf16.vlgmr.msra.gmra.mrb[24].mxu1 %vm355_vm0, %v2431_v3 }
0x2c4f   : > { %3822 = vmatprep.mubr.msk.f32.mxu1 %vm1380_vm5, %v5129_v41 }
0x2cf5   : > { %v5133_v42 = vpop.f32.mrb[20].mxu1 }
0x2cf6   : > { %v5135_v43 = vpop.f32.mrb[21].mxu1 }
0x2cf9   : > { %v5137_v44 = vpop.f32.mrb[22].mxu1 }
0x2cfa   : > { %v5139_v34 = vpop.f32.mrb[23].mxu1 }
0x2d21   : > { %v3798_v55 = vpop.f32.mrb[24].mxu1 }
0x2d22   : > { %v2500_v46 = vmul.f32 0.17677669, %v3798_v55  ;;  %v2484_v53 = vpop.f32.mrb[25].mxu1 }
0x2d23   : > { %v2498_v2 = vmul.f32 0.17677669, %v2484_v53  ;;  %v3799_v4 = vpop.f32.mrb[26].mxu1 }
0x2d24   : > { %v2506_v7 = vsel %vm2503_vm7, %v2500_v46, -1e+30  ;;  %v2487_v9 = vpop.f32.mrb[27].mxu1  ;;  %vm2849_vm7 = vcmp.eq.s32.totalorder %v4780_v54, %v4796_v61 }
0x2d25   : > { %v2504_v8 = vsel %vm2501_vm8, %v2498_v2, -1e+30  ;;  %v2499_v17 = vmul.f32 0.17677669, %v2487_v9  ;;  %v2570_v40 = vsel %vm355_vm0, %v2506_v7, -inf  ;;  %vm2851_vm8 = vcmp.eq.s32.totalorder %v4931_v47, %v4796_v61 }
0x2d26   : > { %v2564_v18 = vsel %vm355_vm0, %v2504_v8, -inf  ;;  %v1786_v61 = vsel %vm1380_vm5, %v5001_v5, 0.0 }
0x2d27   : > { %v2505_v20 = vsel %vm2502_vm10, %v2499_v17, -1e+30  ;;  %2565 = vmax.xlane.f32.xlu1 %v2564_v18 }
0x2d28   : > { %v2567_v59 = vsel %vm355_vm0, %v2505_v20, -inf }
0x2d29   : > { %2568 = vmax.xlane.f32.xlu0 %v2567_v59 }
0x2d2d   : > { %2571 = vmax.xlane.f32.xlu0 %v2570_v40 }
0x2db4   : > { %v2566_v22 = vpop.xlane.xlu1 %2565 }
0x2db5   : > { %v2573_v33 = vsub.f32 %v2504_v8, %v2566_v22  ;;  %v2830_v8 = vsel %vm1380_vm5, %v4850_v16, 0.0 }
0x2db6   : > { %v2569_v24 = vpop.xlane.xlu0 %2568 }
0x2db7   : > { %v2574_v39 = vsub.f32 %v2505_v20, %v2569_v24  ;;  %v2576_v46 = vmul.f32 1.442695, %v2573_v33  ;;  %v2824_v20 = vsel %vm1380_vm5, %v4855_v13, 0.0 }
0x2db9   : > { %v2578_v38 = vmul.f32 1.442695, %v2574_v39 }
0x2dba   : > { %v2572_v3 = vpop.xlane.xlu0 %2571 }
0x2dbb   : > { %4005 = vpow2.f32 %v2578_v38  ;;  %v2575_v55 = vsub.f32 %v2506_v7, %v2572_v3  ;;  %v2827_v7 = vsel %vm1380_vm5, %v4845_v12, 0.0 }
0x2dbd   : > { %v2580_v56 = vmul.f32 1.442695, %v2575_v55 }
0x2dbf   : > { %4007 = vpow2.f32 %v2580_v56 }
0x2dc0   : > { %4009 = vpow2.f32 %v2576_v46 }
0x2dc5   : > { %v4006_v53 = vpop.eup %4005 }
0x2dc6   : > { %v2585_v2 = vsel %vm355_vm0, %v4006_v53, 0.0 }
0x2dc7   : > { %2586 = vadd.xlane.f32.xlu0 %v2585_v2 }
0x2dc9   : > { %v4008_v4 = vpop.eup %4007 }
0x2dca   : > { %v2588_v9 = vsel %vm355_vm0, %v4008_v4, 0.0  ;;  %v4010_v17 = vpop.eup %4009 }
0x2dcb   : > { %2589 = vadd.xlane.f32.xlu1 %v2588_v9  ;;  %v2582_v18 = vsel %vm355_vm0, %v4010_v17, 0.0 }
0x2dcf   : > { %2583 = vadd.xlane.f32.xlu1 %v2582_v18 }
0x2ddd   : > { %2509 = vrot.lane.b32.xlu0 %v4922_v45, %s4232_s6 }
0x2de0   : > { %2511 = vrot.lane.b32.xlu1 %v4928_v1, %s4232_s6 }
0x2dfc   : > { %2828 = vadd.xlane.f32.xlu0 %v2827_v7 }
0x2e00   : > { %2831 = vadd.xlane.f32.xlu0 %v2830_v8 }
0x2e04   : > { %2825 = vadd.xlane.f32.xlu1 %v2824_v20 }
0x2e15   : > { %2862 = vrot.lane.b32.xlu1 %v4859_v19, %s4233_s18 }
0x2e16   : > { %2864 = vrot.lane.b32.xlu0 %v4865_v23, %s4233_s18 }
0x2e19   : > { %2926 = vrot.lane.b32.xlu1 %v4872_v28, %s4233_s18 }
0x2e1d   : > { %2928 = vrot.lane.b32.xlu1 %v4875_v30, %s4233_s18 }
0x2e54   : > { %v2587_v12 = vpop.xlane.xlu0 %2586 }
0x2e58   : > { %v2590_v59 = vpop.xlane.xlu1 %2589  ;;  %v2510_v16 = vpop.permute.xlu0 %2509 }
0x2e59   : > { %3800 = vmatprep.subr.bf16.mxu0 %v2510_v16  ;;  %4011 = vrcp.f32 %v2590_v59 }
0x2e5a   : > { %3801 = vmatpush3.bf16.msra.mxu0 %v2510_v16  ;;  %4013 = vrcp.f32 %v2587_v12 }
0x2e5c   : > { %v2584_v13 = vpop.xlane.xlu1 %2583 }
0x2e5d   : > { %4015 = vrcp.f32 %v2584_v13 }
0x2e60   : > { %v2512_v40 = vpop.permute.xlu1 %2511 }
0x2e61   : > { %3802 = vmatprep.subr.bf16.mxu0 %v2512_v40 }
0x2e62   : > { %3803 = vmatpush3.bf16.msra.mxu0 %v2512_v40 }
0x2e63   : > { %3808 = vmatprep.subr.bf16.mxu0 %v2510_v16  ;;  %v4012_v19 = vpop.eup %4011 }
0x2e64   : > { %v4014_v23 = vpop.eup %4013  ;;  %v2596_v30 = vmul.f32 %v4012_v19, %v4008_v4  ;;  %v5207_v19 = vsel %vm2357_vm14, 1.0, %v4234_v11 }
0x2e65   : > { %3805 = vmatmul.mubr.msk.bf16.vlgmr.msra.gmra.mrb[36].mxu0 %vm355_vm0, %v4949_v51  ;;  %v2595_v24 = vmul.f32 %v4014_v23, %v4006_v53  ;;  %v5212_v23 = vsel %vm2358_vm15, 1.0, %v4234_v11 }
0x2e66   : > { %3809 = vmatpush3.bf16.msra.mxu0 %v2510_v16  ;;  %v2598_v33 = vpack.c.bf16 %v2596_v30, %v2596_v30 }
0x2e67   : > { %v4016_v28 = vpop.eup %4015  ;;  %3810 = vmatprep.subr.bf16.mxu0 %v2512_v40 }
0x2e68   : > { %v2594_v22 = vmul.f32 %v4016_v28, %v4010_v17  ;;  %v5220_v28 = vsel %vm2359_vm1, 1.0, %v4234_v11 }
0x2e6a   : > { %3811 = vmatpush3.bf16.msra.mxu0 %v2512_v40  ;;  %v2597_v39 = vpack.c.bf16 %v2595_v24, %v2594_v22 }
0x2e6c   : > { %3812 = vmatprep.mubr.msk.bf16.mxu0 %vm355_vm0, %v2597_v39 }
0x2e6d   : > { %3813 = vmatmul.mubr.msk.bf16.vlgmr.msra.gmra.mrb[40].mxu0 %vm355_vm0, %v2598_v33 }
0x2e89   : > { %v5175_v38 = vpop.xlane.xlu0 %2828 }
0x2e8a   : > { %vm2834_vm11 = vcmp.eq.f32.partialorder %v4884_v32, %v5175_v38  ;;  %vm2994_vm4 = vcmp.le.f32.partialorder %v4884_v32, %v5175_v38 }
0x2e8b   : > { %v3520_v46 = vsel %vm2834_vm11, 1.0, %v4234_v11 }
0x2e8d   : > { %v5179_v3 = vpop.xlane.xlu0 %2831 }
0x2e8e   : > { %vm2835_vm13 = vcmp.eq.f32.partialorder %v4884_v32, %v5179_v3  ;;  %vm2995_vm3 = vcmp.le.f32.partialorder %v4884_v32, %v5179_v3 }
0x2e8f   : > { %v3521_v9 = vsel %vm2835_vm13, 1.0, %v4234_v11 }
0x2e90   : > { %v2843_v17 = vpack.c.bf16 %v3521_v9, %v3521_v9 }
0x2e91   : > { %v5181_v55 = vpop.xlane.xlu1 %2825  ;;  %v2865_v4 = vpop.permute.xlu0 %2864 }
0x2e92   : > { %vm2833_vm12 = vcmp.eq.f32.partialorder %v4884_v32, %v5181_v55  ;;  %vm2993_vm9 = vcmp.le.f32.partialorder %v4884_v32, %v5181_v55 }
0x2e93   : > { %v3519_v56 = vsel %vm2833_vm12, 1.0, %v4234_v11 }
0x2e94   : > { %v2842_v53 = vpack.c.bf16 %v3520_v46, %v3519_v56 }
0x2e95   : > { %v2863_v2 = vpop.permute.xlu1 %2862 }
0x2e96   : > { %3828 = vmatprep.subr.bf16.mxu0 %v2863_v2  ;;  %3832 = vmatprep.mubr.msk.bf16.mxu0 %vm355_vm0, %v2842_v53 }
0x2e97   : > { %3829 = vmatpush3.bf16.msra.mxu0 %v2863_v2  ;;  %v5232_v2 = vsel %vm2848_vm2, 1.0, %v4234_v11 }
0x2e98   : > { %3830 = vmatprep.subr.bf16.mxu0 %v2865_v4 }
0x2e9b   : > { %3831 = vmatpush3.bf16.msra.mxu0 %v2865_v4 }
0x2e9e   : > { %3833 = vmatmul.mubr.msk.bf16.vlgmr.msra.gmra.mrb[44].mxu0 %vm355_vm0, %v2843_v17 }
0x2e9f   : > { %3848 = vmatprep.mubr.msk.bf16.mxu0 %vm355_vm0, %v4945_v48  ;;  %v2927_v48 = vpop.permute.xlu1 %2926 }
0x2ea0   : > { %v2937_v30 = vsel %vm355_vm0, %v2927_v48, 0 }
0x2ea3   : > { %v2929_v22 = vpop.permute.xlu1 %2928 }
0x2ea4   : > { %v2940_v24 = vsel %vm355_vm0, %v2929_v22, 0 }
0x2f38   : > { %v5194_v18 = vpop.f32.mrb[36].mxu0 }
0x2f39   : > { %v5196_v7 = vpop.f32.mrb[37].mxu0 }
0x2f3a   : > { %v5198_v8 = vpop.f32.mrb[38].mxu0 }
0x2f3b   : > { %v5200_v20 = vpop.f32.mrb[39].mxu0 }
0x2f40   : > { %v3814_v12 = vpop.f32.mrb[40].mxu0 }
0x2f41   : > { %v2639_v59 = vpop.f32.mrb[41].mxu0 }
0x2f42   : > { %v3815_v16 = vpop.f32.mrb[42].mxu0 }
0x2f43   : > { %v2642_v13 = vpop.f32.mrb[43].mxu0 }
0x2f44   : > { %v3880_v40 = vpack.c.bf16 %v2642_v13, %v2639_v59 }
0x2f46   : > { %3881 = vmatprep.subr.bf16.mxu1 %v3880_v40 }
0x2f47   : > { %3883 = vmatpush3.bf16.msra.mxu1 %v3880_v40 }
0x2f48   : > { %3820 = vmatprep.subr.mxu1 %v3814_v12 }
0x2f4b   : > { %3821 = vmatpush3.msra.mxu1 %v3814_v12 }
0x2f4c   : > { %3823 = vmatmul.mubr.msk.f32.vlgmr.msra.gmra.mrb[28].mxu1 %vm1380_vm5, %v5207_v19  ;;  %3902 = vmatprep.subr.msk.bf16.mxu1 %vm355_vm0, %v2927_v48 }
0x2f4d   : > { %3825 = vmatprep.mubr.msk.f32.mxu1 %vm1380_vm5, %v5212_v23 }
0x2f50   : > { %3826 = vmatmul.mubr.msk.f32.gmra.mrb[30].mxu1 %vm1380_vm5, %v5220_v28 }
0x2f52   : > { %3837 = vmatpush3.bf16.xpose.msra.mxu1 %v2937_v30 }
0x2f53   : > { %3903 = vmatprep.subr.msk.bf16.mxu1 %vm355_vm0, %v2929_v22 }
0x2f5a   : > { %3839 = vmatpush3.bf16.xpose.msra.mxu1 %v2940_v24 }
0x2f71   : > { %v3834_v60 = vpop.f32.mrb[44].mxu0 }
0x2f72   : > { %v2908_v39 = vpop.f32.mrb[45].mxu0  ;;  %v2923_v53 = vpack.c.bf16 %v3834_v60, %v3834_v60 }
0x2f73   : > { %v3835_v33 = vpop.f32.mrb[46].mxu0 }
0x2f74   : > { %v2911_v46 = vpop.f32.mrb[47].mxu0 }
0x2f75   : > { %v2922_v56 = vpack.c.bf16 %v2911_v46, %v2908_v39 }
0x2f77   : > { %3840 = vmatprep.mubr.msk.bf16.mxu1 %vm355_vm0, %v2922_v56 }
0x2f78   : > { %3841 = vmatmul.mubr.msk.bf16.vlgmr.msra.gmra.mrb[32].mxu1 %vm355_vm0, %v2923_v53 }
0x2f79   : > { %3866 = vmatprep.mubr.msk.f32.mxu1 %vm1380_vm5, %v5232_v2 }
0x301f   : > { %v5236_v4 = vpop.f32.mrb[28].mxu1 }
0x3020   : > { %v5238_v9 = vpop.f32.mrb[29].mxu1 }
0x3023   : > { %v5240_v17 = vpop.f32.mrb[30].mxu1 }
0x3024   : > { %v5242_v12 = vpop.f32.mrb[31].mxu1 }
0x304b   : > { %v3842_v27 = vpop.f32.mrb[32].mxu1 }
0x304c   : > { %v2992_v59 = vmul.f32 0.17677669, %v3842_v27  ;;  %v2976_v16 = vpop.f32.mrb[33].mxu1 }
0x304d   : > { %v2990_v13 = vmul.f32 0.17677669, %v2976_v16  ;;  %v3843_v40 = vpop.f32.mrb[34].mxu1 }
0x304e   : > { %v2998_v48 = vsel %vm2995_vm3, %v2992_v59, -1e+30  ;;  %v2979_v30 = vpop.f32.mrb[35].mxu1 }
0x304f   : > { %v2996_v22 = vsel %vm2993_vm9, %v2990_v13, -1e+30  ;;  %v2991_v24 = vmul.f32 0.17677669, %v2979_v30  ;;  %v3062_v3 = vsel %vm355_vm0, %v2998_v48, -inf }
0x3050   : > { %v3056_v60 = vsel %vm355_vm0, %v2996_v22, -inf }
0x3051   : > { %v2997_v39 = vsel %vm2994_vm4, %v2991_v24, -1e+30  ;;  %3057 = vmax.xlane.f32.xlu0 %v3056_v60  ;;  %v2258_v60 = vsel %vm1380_vm5, %v5026_v37, 0.0  ;;  %v2753_v37 = vsel %vm1380_vm5, %v5207_v19, 0.0  ;;  %v5304_v19 = vsel %vm2851_vm8, 1.0, %v4234_v11 }
0x3052   : > { %v3059_v33 = vsel %vm355_vm0, %v2997_v39, -inf  ;;  %vm2794_vm8 = vcmask 785920  }
0x3053   : > { %3060 = vmax.xlane.f32.xlu1 %v3059_v33  ;;  %v2261_v33 = vsel %vm1380_vm5, %v5104_v14, 0.0  ;;  %v3242_v14 = vsel %vm1380_vm5, %v5232_v2, 0.0  ;;  %v1789_v2 = vsel %vm1380_vm5, %v5006_v36, 0.0 }
0x3055   : > { %3063 = vmax.xlane.f32.xlu0 %v3062_v3  ;;  %v2750_v3 = vsel %vm1380_vm5, %v5129_v41, 0.0  ;;  %v5295_v41 = vsel %vm2849_vm7, 1.0, %v4234_v11  ;;  %vm2302_vm7 = vcmask 523520  }
0x3056   : > { %v3245_v54 = vsel %vm1380_vm5, %v5295_v41, 0.0 }
0x30de   : > { %v3058_v46 = vpop.xlane.xlu0 %3057 }
0x30df   : > { %v3065_v55 = vsub.f32 %v2996_v22, %v3058_v46 }
0x30e0   : > { %v3061_v56 = vpop.xlane.xlu1 %3060 }
0x30e1   : > { %v3066_v53 = vsub.f32 %v2997_v39, %v3061_v56  ;;  %v3068_v13 = vmul.f32 1.442695, %v3065_v55  ;;  %v2264_v39 = vsel %vm1380_vm5, %v5109_v15, 0.0  ;;  %v5290_v15 = vsel %vm2850_vm6, 1.0, %v4234_v11 }
0x30e2   : > { %v3064_v27 = vpop.xlane.xlu0 %3063  ;;  %v3248_v57 = vsel %vm1380_vm5, %v5290_v15, 0.0  ;;  %v1792_v11 = vsel %vm1380_vm5, %v5014_v49, 0.0 }
0x30e3   : > { %v3070_v59 = vmul.f32 1.442695, %v3066_v53  ;;  %v3067_v16 = vsub.f32 %v2998_v48, %v3064_v27 }
0x30e5   : > { %4017 = vpow2.f32 %v3070_v59  ;;  %v3072_v32 = vmul.f32 1.442695, %v3067_v16 }
0x30e7   : > { %4019 = vpow2.f32 %v3072_v32 }
0x30e8   : > { %4021 = vpow2.f32 %v3068_v13 }
0x30ef   : > { %v5253_v38 = vpop.eup %4017 }
0x30f0   : > { %v3077_v40 = vsel %vm355_vm0, %v5253_v38, 0.0 }
0x30f1   : > { %v5257_v30 = vpop.eup %4019  ;;  %3078 = vadd.xlane.f32.xlu1 %v3077_v40 }
0x30f2   : > { %v3080_v22 = vsel %vm355_vm0, %v5257_v30, 0.0  ;;  %v5261_v24 = vpop.eup %4021 }
0x30f3   : > { %3081 = vadd.xlane.f32.xlu0 %v3080_v22  ;;  %v3074_v48 = vsel %vm355_vm0, %v5261_v24, 0.0 }
0x30f7   : > { %3075 = vadd.xlane.f32.xlu0 %v3074_v48 }
0x3102   : > { %3001 = vrot.lane.b32.xlu1 %v4922_v45, %s4233_s18  ;;  %v2267_v45 = vsel %vm1380_vm5, %v5117_v10, 0.0  ;;  %v2759_v10 = vsel %vm1380_vm5, %v5220_v28, 0.0  ;;  %v3251_v28 = vsel %vm1380_vm5, %v5304_v19, 0.0 }
0x310d   : > { %3003 = vrot.lane.b32.xlu0 %v4928_v1, %s4233_s18  ;;  %v2756_v1 = vsel %vm1380_vm5, %v5212_v23, 0.0  ;;  %v1783_v23 = vsel %vm1380_vm5, %v4901_v50, 0.0 }
0x3126   : > { %2259 = vadd.xlane.f32.xlu1 %v2258_v60 }
0x312a   : > { %2265 = vadd.xlane.f32.xlu1 %v2264_v39 }
0x312c   : > { %2262 = vadd.xlane.f32.xlu0 %v2261_v33 }
0x312e   : > { %2751 = vadd.xlane.f32.xlu1 %v2750_v3 }
0x3130   : > { %2268 = vadd.xlane.f32.xlu0 %v2267_v45 }
0x3132   : > { %2757 = vadd.xlane.f32.xlu1 %v2756_v1 }
0x3134   : > { %2754 = vadd.xlane.f32.xlu0 %v2753_v37 }
0x3136   : > { %3243 = vadd.xlane.f32.xlu1 %v3242_v14 }
0x3138   : > { %2760 = vadd.xlane.f32.xlu0 %v2759_v10 }
0x313a   : > { %3249 = vadd.xlane.f32.xlu1 %v3248_v57 }
0x313c   : > { %3246 = vadd.xlane.f32.xlu0 %v3245_v54 }
0x313e   : > { %1784 = vadd.xlane.f32.xlu1 %v1783_v23 }
0x3140   : > { %3252 = vadd.xlane.f32.xlu0 %v3251_v28 }
0x3142   : > { %1790 = vadd.xlane.f32.xlu1 %v1789_v2 }
0x3144   : > { %1787 = vadd.xlane.f32.xlu0 %v1786_v61 }
0x3148   : > { %1793 = vadd.xlane.f32.xlu0 %v1792_v11 }
0x317e   : > { %v3079_v47 = vpop.xlane.xlu1 %3078 }
0x3180   : > { %v3082_v46 = vpop.xlane.xlu0 %3081 }
0x3181   : > { %4023 = vrcp.f32 %v3082_v46 }
0x3182   : > { %v3002_v50 = vpop.permute.xlu1 %3001  ;;  %4025 = vrcp.f32 %v3079_v47 }
0x3183   : > { %3844 = vmatprep.subr.bf16.mxu0 %v3002_v50 }
0x3184   : > { %v3076_v56 = vpop.xlane.xlu0 %3075  ;;  %3845 = vmatpush3.bf16.msra.mxu0 %v3002_v50 }
0x3185   : > { %4027 = vrcp.f32 %v3076_v56 }
0x3188   : > { %v3004_v55 = vpop.permute.xlu0 %3003 }
0x3189   : > { %3846 = vmatprep.subr.bf16.mxu0 %v3004_v55 }
0x318a   : > { %3847 = vmatpush3.bf16.msra.mxu0 %v3004_v55 }
0x318b   : > { %3852 = vmatprep.subr.bf16.mxu0 %v3002_v50  ;;  %v4024_v36 = vpop.eup %4023 }
0x318c   : > { %v4026_v5 = vpop.eup %4025  ;;  %v3088_v53 = vmul.f32 %v4024_v36, %v5257_v30 }
0x318d   : > { %3849 = vmatmul.mubr.msk.bf16.vlgmr.msra.gmra.mrb[48].mxu0 %vm355_vm0, %v4949_v51  ;;  %v3087_v59 = vmul.f32 %v4026_v5, %v5253_v38 }
0x318e   : > { %3853 = vmatpush3.bf16.msra.mxu0 %v3002_v50  ;;  %v3090_v13 = vpack.c.bf16 %v3088_v53, %v3088_v53 }
0x318f   : > { %v4028_v49 = vpop.eup %4027  ;;  %3854 = vmatprep.subr.bf16.mxu0 %v3004_v55 }
0x3190   : > { %v3086_v27 = vmul.f32 %v4028_v49, %v5261_v24 }
0x3192   : > { %3855 = vmatpush3.bf16.msra.mxu0 %v3004_v55  ;;  %v3089_v16 = vpack.c.bf16 %v3087_v59, %v3086_v27 }
0x3194   : > { %3856 = vmatprep.mubr.msk.bf16.mxu0 %vm355_vm0, %v3089_v16 }
0x3195   : > { %3857 = vmatmul.mubr.msk.bf16.vlgmr.msra.gmra.mrb[52].mxu0 %vm355_vm0, %v3090_v13 }
0x31b3   : > { %v2260_v32 = vpop.xlane.xlu1 %2259 }
0x31b4   : > { %vm2270_vm10 = vcmp.gt.f32.partialorder %v2260_v32, 0.0 }
0x31b5   : > { %v2282_v51 = vsel %vm2270_vm10, %v5135_v43, %v5093_v21 }
0x31b6   : > { %2290 = vrot.lane.b32.xlu1 %v2282_v51, %s4233_s18 }
0x31b7   : > { %v2266_v40 = vpop.xlane.xlu1 %2265 }
0x31b8   : > { %vm2272_vm11 = vcmp.gt.f32.partialorder %v2266_v40, 0.0 }
0x31b9   : > { %v2284_v30 = vsel %vm2272_vm11, %v5139_v34, %v5091_v6  ;;  %v2263_v38 = vpop.xlane.xlu0 %2262 }
0x31ba   : > { %vm2271_vm12 = vcmp.gt.f32.partialorder %v2263_v38, 0.0  ;;  %2294 = vrot.lane.b32.xlu1 %v2284_v30, %s4233_s18 }
0x31bb   : > { %v2283_v22 = vsel %vm2271_vm12, %v5133_v42, %v5097_v58  ;;  %v2752_v24 = vpop.xlane.xlu1 %2751 }
0x31bc   : > { %vm2762_vm13 = vcmp.gt.f32.partialorder %v2752_v24, 0.0  ;;  %2292 = vrot.lane.b32.xlu0 %v2283_v22, %s4233_s18 }
0x31bd   : > { %v2774_v21 = vsel %vm2762_vm13, %v5238_v9, %v5196_v7  ;;  %v2269_v43 = vpop.xlane.xlu0 %2268 }
0x31be   : > { %vm2273_vm14 = vcmp.gt.f32.partialorder %v2269_v43, 0.0 }
0x31bf   : > { %v2285_v48 = vsel %vm2273_vm14, %v5137_v44, %v5095_v52  ;;  %v2758_v6 = vpop.xlane.xlu1 %2757 }
0x31c0   : > { %vm2764_vm15 = vcmp.gt.f32.partialorder %v2758_v6, 0.0  ;;  %2296 = vrot.lane.b32.xlu1 %v2285_v48, %s4233_s18  ;;  %2782 = vrot.lane.b32.xlu0 %v2774_v21, %s4232_s6 }
0x31c1   : > { %v2776_v58 = vsel %vm2764_vm15, %v5242_v12, %v5194_v18  ;;  %v2755_v42 = vpop.xlane.xlu0 %2754 }
0x31c2   : > { %vm2763_vm1 = vcmp.gt.f32.partialorder %v2755_v42, 0.0 }
0x31c3   : > { %v2775_v34 = vsel %vm2763_vm1, %v5236_v4, %v5200_v20  ;;  %v5342_v7 = vpop.xlane.xlu1 %3243 }
0x31c4   : > { %2784 = vrot.lane.b32.xlu1 %v2775_v34, %s4232_s6  ;;  %2786 = vrot.lane.b32.xlu0 %v2776_v58, %s4232_s6  ;;  %vm3254_vm10 = vcmp.gt.f32.partialorder %v5342_v7, 0.0 }
0x31c5   : > { %v2761_v52 = vpop.xlane.xlu0 %2760 }
0x31c6   : > { %vm2765_vm2 = vcmp.gt.f32.partialorder %v2761_v52, 0.0 }
0x31c7   : > { %v2777_v44 = vsel %vm2765_vm2, %v5240_v17, %v5198_v8  ;;  %v5348_v9 = vpop.xlane.xlu1 %3249 }
0x31c8   : > { %2788 = vrot.lane.b32.xlu1 %v2777_v44, %s4232_s6  ;;  %vm3256_vm12 = vcmp.gt.f32.partialorder %v5348_v9, 0.0 }
0x31c9   : > { %v3247_v18 = vpop.xlane.xlu0 %3246 }
0x31cb   : > { %v1785_v12 = vpop.xlane.xlu1 %1784 }
0x31cc   : > { %vm1795_vm3 = vcmp.gt.f32.partialorder %v1785_v12, 0.0 }
0x31cd   : > { %v1807_v20 = vsel %vm1795_vm3, %v5032_v62, %v4990_v26  ;;  %v3253_v4 = vpop.xlane.xlu0 %3252 }
0x31ce   : > { %1811 = vst.msk [vmem:[%s5354_s19] sm:$0xff] %vm355_vm0, %v1807_v20  ;;  %vm3257_vm11 = vcmp.gt.f32.partialorder %v3253_v4, 0.0 }
0x31cf   : > { %v1791_v8 = vpop.xlane.xlu1 %1790 }
0x31d0   : > { %vm1797_vm9 = vcmp.gt.f32.partialorder %v1791_v8, 0.0 }
0x31d1   : > { %v1809_v17 = vsel %vm1797_vm9, %v5036_v0, %v4988_v25  ;;  %v1788_v60 = vpop.xlane.xlu0 %1787 }
0x31d2   : > { %1813 = vst.msk [vmem:[%s5354_s19 + $0x10] sm:$0xff] %vm355_vm0, %v1809_v17  ;;  %vm1796_vm4 = vcmp.gt.f32.partialorder %v1788_v60, 0.0 }
0x31d3   : > { %v1808_v26 = vsel %vm1796_vm4, %v5030_v35, %v4994_v31 }
0x31d4   : > { %1812 = vst.msk [vmem:[%s5354_s19 + $0x8] sm:$0xff] %vm355_vm0, %v1808_v26 }
0x31d5   : > { %v1794_v62 = vpop.xlane.xlu0 %1793 }
0x31d6   : > { %vm1798_vm6 = vcmp.gt.f32.partialorder %v1794_v62, 0.0 }
0x31d7   : > { %v1810_v39 = vsel %vm1798_vm6, %v5034_v63, %v4992_v29 }
0x31d8   : > { %1814 = vst.msk [vmem:[%s5354_s19 + $0x18] sm:$0xff] %vm355_vm0, %v1810_v39  ;;  %vm3255_vm0 = vcmp.gt.f32.partialorder %v3247_v18, 0.0 }
0x3228   : > { %v2291_v25 = vpop.permute.xlu1 %2290 }
0x3229   : > { %2303 = vst.msk [vmem:[%s5354_s19] sm:$0xff] %vm2302_vm7, %v2291_v25 }
0x322c   : > { %v2295_v0 = vpop.permute.xlu1 %2294 }
0x322d   : > { %2305 = vst.msk [vmem:[%s5354_s19 + $0x10] sm:$0xff] %vm2302_vm7, %v2295_v0 }
0x322e   : > { %v2293_v31 = vpop.permute.xlu0 %2292 }
0x322f   : > { %2304 = vst.msk [vmem:[%s5354_s19 + $0x8] sm:$0xff] %vm2302_vm7, %v2293_v31 }
0x3232   : > { %v2783_v35 = vpop.permute.xlu0 %2782  ;;  %v2297_v33 = vpop.permute.xlu1 %2296 }
0x3233   : > { %2795 = vst.msk [vmem:[%s5354_s19] sm:$0xff] %vm2794_vm8, %v2783_v35 }
0x3234   : > { %2306 = vst.msk [vmem:[%s5354_s19 + $0x18] sm:$0xff] %vm2302_vm7, %v2297_v33 }
0x3236   : > { %v2787_v3 = vpop.permute.xlu0 %2786  ;;  %v2785_v45 = vpop.permute.xlu1 %2784 }
0x3237   : > { %2797 = vst.msk [vmem:[%s5354_s19 + $0x10] sm:$0xff] %vm2794_vm8, %v2787_v3  ;;  %2796 = vst.msk [vmem:[%s5354_s19 + $0x8] sm:$0xff] %vm2794_vm8, %v2785_v45 }
0x323a   : > { %v2789_v29 = vpop.permute.xlu1 %2788 }
0x323b   : > { %2798 = vst.msk [vmem:[%s5354_s19 + $0x18] sm:$0xff] %vm2794_vm8, %v2789_v29 }
0x3260   : > { %v3850_v63 = vpop.f32.mrb[48].mxu0 }
0x3261   : > { %v3041_v1 = vpop.f32.mrb[49].mxu0 }
0x3262   : > { %v3851_v37 = vpop.f32.mrb[50].mxu0 }
0x3263   : > { %v3044_v14 = vpop.f32.mrb[51].mxu0 }
0x3268   : > { %v3858_v10 = vpop.f32.mrb[52].mxu0 }
0x3269   : > { %v3131_v57 = vpop.f32.mrb[53].mxu0 }
0x326a   : > { %v3859_v54 = vpop.f32.mrb[54].mxu0 }
0x326b   : > { %v3134_v23 = vpop.f32.mrb[55].mxu0 }
0x326c   : > { %v3884_v28 = vpack.c.bf16 %v3134_v23, %v3131_v57 }
0x326e   : > { %3885 = vmatprep.subr.bf16.mxu1 %v3884_v28 }
0x326f   : > { %3887 = vmatpush3.bf16.msra.mxu1 %v3884_v28 }
0x3270   : > { %3864 = vmatprep.subr.mxu1 %v3858_v10 }
0x3273   : > { %3865 = vmatpush3.msra.mxu1 %v3858_v10 }
0x3274   : > { %3867 = vmatmul.mubr.msk.f32.vlgmr.msra.gmra.mrb[36].mxu1 %vm1380_vm5, %v5295_v41 }
0x3275   : > { %3869 = vmatprep.mubr.msk.f32.mxu1 %vm1380_vm5, %v5290_v15 }
0x3278   : > { %3870 = vmatmul.mubr.msk.f32.gmra.mrb[38].mxu1 %vm1380_vm5, %v5304_v19  ;;  %vm3286_vm5 = vcmask 1048320  }
0x3347   : > { %v3868_v2 = vpop.f32.mrb[36].mxu1 }
0x3348   : > { %v3267_v61 = vsel %vm3255_vm0, %v3868_v2, %v3044_v14  ;;  %v3223_v11 = vpop.f32.mrb[37].mxu1 }
0x3349   : > { %v3266_v47 = vsel %vm3254_vm10, %v3223_v11, %v3041_v1  ;;  %3276 = vrot.lane.b32.xlu1 %v3267_v61, %s4231_s11 }
0x334a   : > { %3274 = vrot.lane.b32.xlu0 %v3266_v47, %s4231_s11 }
0x334b   : > { %v3871_v15 = vpop.f32.mrb[38].mxu1 }
0x334c   : > { %v3269_v41 = vsel %vm3257_vm11, %v3871_v15, %v3851_v37  ;;  %v3233_v19 = vpop.f32.mrb[39].mxu1 }
0x334d   : > { %v3268_v46 = vsel %vm3256_vm12, %v3233_v19, %v3850_v63  ;;  %3280 = vrot.lane.b32.xlu1 %v3269_v41, %s4231_s11 }
0x334e   : > { %3278 = vrot.lane.b32.xlu0 %v3268_v46, %s4231_s11 }
0x33bb   : > { %v3277_v50 = vpop.permute.xlu1 %3276 }
0x33bc   : > { %3288 = vst.msk [vmem:[%s5354_s19 + $0x8] sm:$0xff] %vm3286_vm5, %v3277_v50  ;;  %v3275_v56 = vpop.permute.xlu0 %3274 }
0x33bd   : > { %3287 = vst.msk [vmem:[%s5354_s19] sm:$0xff] %vm3286_vm5, %v3275_v56 }
0x33bf   : > { %v3281_v55 = vpop.permute.xlu1 %3280 }
0x33c0   : > { %3290 = vst.msk [vmem:[%s5354_s19 + $0x18] sm:$0xff] %vm3286_vm5, %v3281_v55  ;;  %v3279_v36 = vpop.permute.xlu0 %3278 }
0x33c1   : > { %3289 = vst.msk [vmem:[%s5354_s19 + $0x10] sm:$0xff] %vm3286_vm5, %v3279_v36 }
0x33c2   : > { %4160 = shalt.err (!%p4157_p11)
}
0x33c3   : > { %s4161_s27 = scalar_lea.hbm %s5397_s10, 512  ;;  %s4165_s26 = scalar_lea.hbm %s5449_s4, 1024 }
0x33c4   : > { %p4162_p0 = scmp.ne.s32.totalorder %s5397_s10, %s4161_s27  ;;  %p4166_p10 = scmp.lt.u32.totalorder %s5397_s10, %s5449_s4 }
0x33c5   : > { %p4167_p1 = scmp.lt.u32.totalorder %s4165_s26, %s4161_s27  ;;  %p4169_p4 = scmp.lt.u32.totalorder %s4161_s27, %s5397_s10 }
0x33c6   : > { %p4163_p13 = pnand %p4162_p0, %p5493_p9 }
0x33c7   : > { %p4168_p2 = por %p4167_p1, %p4166_p10 }
0x33c8   : > { %p4164_p8 = pneg %p4163_p13 }
0x33c9   : > { %p4170_p12 = por %p4169_p4, %p4168_p2 }
0x33cb   : > { %p4171_p6 = pnand %p4170_p12, %p4164_p8 }
0x33cd   : > { %4174 = shalt.err (!%p4171_p6)
}
0x33ce   : > { %s4236_s7 = smov 128   ;;  %s4237_s12 = smov 8  }
0x33cf   : > { %3914 = dma.vmem_to_hbm [thread:$0]  (%p5493_p9), %s5399_s5, 512, %s5397_s10, %s3292_s25, %s4236_s7, %s4236_s7, %s4237_s12  }
0x33d0 PF: > { %s5494_s15 = sld [smem:[#allocation15_spill]]  ;;  %s5495_s11 = sld [smem:[#allocation19_spill]] }
0x33d1   : > { %s5496_s6 = sld [smem:[#allocation16_spill]] }
0x33d6   : > { %s3320_s18 = sand.u32 1, %s5494_s15   ;;  %p5497_p3 = scmp.ne.s32.totalorder %s5495_s11, 0 }
0x33d7   : > { %p5498_p5 = scmp.ge.s32.totalorder %s5496_s6, 2  ;;  %s3321_s19 = scalar_lea.sflag [#allocation4], %s3320_s18 }
0x33d9   : > { %p3931_p7 = pnand %p5498_p5, %p5497_p3 }
0x33db   : > { %4204 = dma.done.wait (!%p3931_p7), %s3321_s19, 512  }
0x33dc   : > { %4206 = vsyncadd (!%p3931_p7), %s3321_s19, 4294966784  ;;  %s5499_s18 = sld [smem:[#allocation17_spill]]  ;;  %s5500_s22 = sld [smem:[#allocation18_spill]] }
0x33dd   : > { %s5501_s15 = smov %s4213_s16  ;;  %s5502_s16 = smov %s4217_s17 }
0x33e2   : > { %p21_p11 = scmp.ge.s32.totalorder %s5499_s18, 4   ;;  %s5503_s17 = smov %s5500_s22 }
0x33e4   :  { %23 = sbr.rel (!%p21_p11) target bundleno = 10 (0xa), region = 109 }
0x33eb   :  { %3326 = vsyncpa [#allocation3], 1 }
0x33ec   :  { %3328 = vsyncpa [#allocation3 + $0x1], 1 }
0x33ed   :  { %3329 = vsyncpa [#allocation6], 1 }
0x33ee   :  { %3331 = vsyncpa [#allocation6 + $0x1], 1 }
0x33ef   :  { %3332 = vsyncpa [#allocation9], 1 }
0x33f0   :  { %3333 = vsyncpa [#allocation4], 1 }
0x33f1   :  { %3335 = vsyncpa [#allocation4 + $0x1], 1 }

</bundles_post_ra>
